<compile_context>
chip_gen: v7x
topology: tpu7x:2x2x1
jax: 0.10.0
libtpu: 0.0.40
codegen_flags: <defaults>
</compile_context>

<pallas_src>
import math
import functools

import jax
import jax.numpy as jnp
from jax import lax
from jax.experimental import pallas as pl
from jax.experimental.pallas import tpu as pltpu


def _round_up(x: int, m: int) -> int:
    return (x + m - 1) // m * m


def _embedding_kernel(ids_ref, table_ref, o_ref, *, scale):
    """ids_ref: (TN, 1) int32; table_ref: (V, D); o_ref: (TN, D)."""
    ids = ids_ref[...]                                     # (TN, 1) int32
    tn = ids.shape[0]
    vocab = table_ref.shape[0]
    vocab_iota = lax.broadcasted_iota(jnp.int32, (tn, vocab), 1)
    # One-hot with sqrt(d_model) folded in; exact because each row has exactly
    # one nonzero entry (scale * table[id, :]).
    onehot = jnp.where(ids == vocab_iota, scale, 0.0).astype(table_ref.dtype)
    o_ref[...] = jnp.dot(
        onehot, table_ref[...],
        preferred_element_type=jnp.float32,
        precision=lax.Precision.HIGHEST,
    ).astype(o_ref.dtype)


def embedding_forward(input_ids, table, *, tile_rows=None):
    """input_ids: int array, any shape. table: (vocab, d_model) float32.

    Returns input_ids.shape + (d_model,), equal to table[input_ids]*sqrt(d_model).
    """
    vocab, d_model = table.shape
    orig_shape = input_ids.shape
    n_tokens = 1
    for s in orig_shape:
        n_tokens *= int(s)
    scale = float(math.sqrt(d_model))

    ids_flat = input_ids.reshape(n_tokens, 1).astype(jnp.int32)

    if tile_rows is None:
        # Whole problem in one grid step when small; 128-row tiles otherwise.
        tile_rows = _round_up(n_tokens, 8) if n_tokens <= 128 else 128
    n_padded = _round_up(n_tokens, tile_rows)
    if n_padded != n_tokens:
        ids_flat = jnp.pad(ids_flat, ((0, n_padded - n_tokens), (0, 0)))

    grid = (n_padded // tile_rows,)
    kernel = functools.partial(_embedding_kernel, scale=scale)

    out = pl.pallas_call(
        kernel,
        out_shape=jax.ShapeDtypeStruct((n_padded, d_model), table.dtype),
        grid_spec=pltpu.PrefetchScalarGridSpec(
            num_scalar_prefetch=0,
            grid=grid,
            in_specs=[
                pl.BlockSpec((tile_rows, 1), lambda i: (i, 0)),      # token ids
                pl.BlockSpec((vocab, d_model), lambda i: (0, 0)),    # full table, VMEM-resident
            ],
            out_specs=pl.BlockSpec((tile_rows, d_model), lambda i: (i, 0)),
        ),
        compiler_params=pltpu.CompilerParams(
            dimension_semantics=("parallel",)),
    )(ids_flat, table)

    return out[:n_tokens].reshape(*orig_shape, d_model)


def _reference(input_ids, table):
    """Pure-JAX mirror of the PyTorch forward."""
    return jnp.take(table, input_ids, axis=0) * math.sqrt(table.shape[1])


if __name__ == "__main__":
    B, S = 2, 8            # batch, sequence
    VOCAB, D_MODEL = 1024, 32

    root = jax.random.PRNGKey(0)
    k_ids, k_tab = jax.random.split(root)
    input_ids = jax.random.randint(k_ids, (B, S), 0, VOCAB, dtype=jnp.int32)
    # nn.Embedding default init: N(0, 1)
    table = jax.random.normal(k_tab, (VOCAB, D_MODEL), jnp.float32)

    out = embedding_forward(input_ids, table)
    out = jax.block_until_ready(out)

    ref = _reference(input_ids, table)
    assert out.shape == (B, S, D_MODEL)
    assert jnp.allclose(out, ref, atol=1e-4, rtol=1e-4), "mismatch vs pure-JAX reference"
    print("KERNEL_OK")
</pallas_src>

<mosaic_0001>
module attributes {stable_mosaic.version = 11 : i64} {
  func.func @_embedding_kernel(%arg0: i32, %arg1: memref<16x1xi32, #tpu.memory_space<vmem>>, %arg2: memref<1024x32xf32, #tpu.memory_space<vmem>>, %arg3: memref<16x32xf32, #tpu.memory_space<vmem>>) attributes {dimension_semantics = [#tpu.dimension_semantics<parallel>], iteration_bounds = array<i64: 1>, scalar_prefetch = 0 : i64, scratch_operands = 0 : i64, tpu.core_type = #tpu.core_type<tc>, window_params = [{transform_indices = @transform_0, window_bounds = array<i64: 16, 1>}, {pipeline_mode = #tpu.pipeline_mode<synchronous>, transform_indices = @transform_1, window_bounds = array<i64: 1024, 32>}, {transform_indices = @transform_2, window_bounds = array<i64: 16, 32>}]} {
    %c0 = arith.constant 0 : index
    %c0_0 = arith.constant 0 : index
    %0 = vector.load %arg1[%c0, %c0_0] : memref<16x1xi32, #tpu.memory_space<vmem>>, vector<16x1xi32>
    %1 = tpu.iota {dimensions = array<i32: 1>} : vector<16x1024xi32>
    %2 = vector.broadcast %0 : vector<16x1xi32> to vector<16x1024xi32>
    %3 = arith.cmpi eq, %2, %1 : vector<16x1024xi32>
    %cst = arith.constant 5.65685415 : f32
    %cst_1 = arith.constant 0.000000e+00 : f32
    %4 = vector.broadcast %cst : f32 to vector<16x1024xf32>
    %5 = vector.broadcast %cst_1 : f32 to vector<16x1024xf32>
    %6 = arith.select %3, %4, %5 : vector<16x1024xi1>, vector<16x1024xf32>
    %c0_2 = arith.constant 0 : index
    %c0_3 = arith.constant 0 : index
    %7 = vector.load %arg2[%c0_2, %c0_3] : memref<1024x32xf32, #tpu.memory_space<vmem>>, vector<1024x32xf32>
    %cst_4 = arith.constant dense<0.000000e+00> : vector<16x32xf32>
    %8 = tpu.matmul %6, %7, %cst_4 {dimension_numbers = #tpu.dot_dimension_numbers<[1], [0], [0], [1], [0, 0, 1, 1], [], []>, precision = #tpu.contract_precision<fp32>} : vector<16x1024xf32>, vector<1024x32xf32>, vector<16x32xf32> -> vector<16x32xf32>
    %c0_5 = arith.constant 0 : index
    %c0_6 = arith.constant 0 : index
    %9 = vector.load %arg3[%c0_5, %c0_6] : memref<16x32xf32, #tpu.memory_space<vmem>>, vector<16x32xf32>
    tpu.vector_store %arg3[%c0_5, %c0_6], %8 {strides = array<i32>} : memref<16x32xf32, #tpu.memory_space<vmem>>, vector<16x32xf32>,
    return
  }
  func.func @transform_0(%arg0: i32) -> (i32, i32) {
    %c0_i32 = arith.constant 0 : i32
    %c0_i32_0 = arith.constant 0 : i32
    return %arg0, %c0_i32 : i32, i32
  }
  func.func @transform_1(%arg0: i32) -> (i32, i32) {
    %c0_i32 = arith.constant 0 : i32
    %c0_i32_0 = arith.constant 0 : i32
    %c0_i32_1 = arith.constant 0 : i32
    return %c0_i32, %c0_i32_0 : i32, i32
  }
  func.func @transform_2(%arg0: i32) -> (i32, i32) {
    %c0_i32 = arith.constant 0 : i32
    %c0_i32_0 = arith.constant 0 : i32
    return %arg0, %c0_i32 : i32, i32
  }
}

</mosaic_0001>

<bundles_post_ra>
// kernel: tpu_custom_call.1
= control target key start
LH: loop header
LB: loop body
LE: loop exit
PB: predicated region body
PF: predicated region fallthrough
CT: control target
= control target key end

     0   :  { %v5590_v2 = vmov 0   ;;  %s8883_s0 = inlined_call_operand.vmem [shape: s32[16,1], index: 0, kind: input, shape index: {}]   ;;  %s8884_s1 = inlined_call_operand.vmem [shape: f32[1024,32], index: 1, kind: input, shape index: {}]   ;;  %s8885_s2 = inlined_call_operand.hbm [shape: f32[16,32], index: 2, kind: output, shape index: {}]  }
   0x1   :  { %v12_v0 = vld [vmem:[%s8883_s0] sm:$0xff]  ;;  %5565 = vset.pattern.permute.xlu0 %v5590_v2  ;;  %v78_v3 = vld [vmem:[%s8884_s1 + $0x88] sm:$0xff]  ;;  %v5631_v10 = vld [vmem:[%s8884_s1 + $0x90] sm:$0xff] }
   0x2   :  { %v77_v1 = vld [vmem:[%s8884_s1 + $0x80] sm:$0xff]  ;;  %v62_v6 = vld [vmem:[%s8884_s1 + $0x8] sm:$0xff]  ;;  %24 = vperm.xlu0 %5565, %v12_v0   ;;  %v241_v7 = vand.u32 4294901760, %v78_v3  ;;  %v5636_v11 = vld [vmem:[%s8884_s1 + $0x98] sm:$0xff]  ;;  %v244_v15 = vand.u32 4294901760, %v5631_v10 }
   0x3   :  { %v238_v4 = vand.u32 4294901760, %v77_v1  ;;  %v5622_v5 = vld [vmem:[%s8884_s1] sm:$0xff]  ;;  %v193_v9 = vand.u32 4294901760, %v62_v6  ;;  %v5641_v12 = vld [vmem:[%s8884_s1 + $0x10] sm:$0xff]  ;;  %v13_v13 = vld [vmem:[%s8883_s0 + $0x8] sm:$0xff]  ;;  %v247_v16 = vand.u32 4294901760, %v5636_v11 }
   0x4   :  { %v190_v8 = vand.u32 4294901760, %v5622_v5  ;;  %v5653_v17 = vld [vmem:[%s8884_s1 + $0x18] sm:$0xff]  ;;  %v196_v18 = vand.u32 4294901760, %v5641_v12  ;;  %v5656_v19 = vsub.f32 %v78_v3, %v241_v7  ;;  %v5666_v24 = vsub.f32 %v5631_v10, %v244_v15  ;;  %v5712_v43 = vld [vmem:[%s8884_s1 + $0xa0] sm:$0xff]  ;;  %v5720_v48 = vld [vmem:[%s8884_s1 + $0xa8] sm:$0xff] }
   0x5   :  { %v5646_v14 = vsub.f32 %v77_v1, %v238_v4  ;;  %v5661_v21 = vsub.f32 %v62_v6, %v193_v9  ;;  %v199_v22 = vand.u32 4294901760, %v5653_v17  ;;  %v5669_v25 = vsub.f32 %v5636_v11, %v247_v16  ;;  %v5725_v49 = vld [vmem:[%s8884_s1 + $0x20] sm:$0xff]  ;;  %v5732_v54 = vld [vmem:[%s8884_s1 + $0x28] sm:$0xff] }
   0x6   :  { %v5659_v20 = vsub.f32 %v5622_v5, %v190_v8  ;;  %v5674_v26 = vsub.f32 %v5641_v12, %v196_v18  ;;  %27 = vperm.xlu0 %5565, %v13_v13   ;;  %v8908_v27 = vand.u32 4294901760, %v5656_v19  ;;  %v8905_v32 = vand.u32 4294901760, %v5666_v24 }
   0x7   :  { %v8911_v23 = vand.u32 4294901760, %v5646_v14  ;;  %v8906_v29 = vand.u32 4294901760, %v5661_v21  ;;  %v5682_v30 = vsub.f32 %v5653_v17, %v199_v22  ;;  %v8902_v33 = vand.u32 4294901760, %v5669_v25 }
   0x8   :  { %v8907_v28 = vand.u32 4294901760, %v5659_v20  ;;  %v8899_v34 = vand.u32 4294901760, %v5674_v26  ;;  %v439_v35 = vsub.f32 %v5656_v19, %v8908_v27  ;;  %v446_v40 = vsub.f32 %v5666_v24, %v8905_v32 }
   0x9   :  { %v432_v31 = vsub.f32 %v5646_v14, %v8911_v23  ;;  %v327_v37 = vsub.f32 %v5661_v21, %v8906_v29  ;;  %v8898_v38 = vand.u32 4294901760, %v5682_v30  ;;  %v453_v41 = vsub.f32 %v5669_v25, %v8902_v33 }
   0xa   :  { %v320_v36 = vsub.f32 %v5659_v20, %v8907_v28  ;;  %v334_v42 = vsub.f32 %v5674_v26, %v8899_v34  ;;  %v440_v44 = vand.u32 4294901760, %v439_v35  ;;  %v447_v50 = vand.u32 4294901760, %v446_v40 }
   0xb   :  { %v433_v39 = vand.u32 4294901760, %v432_v31  ;;  %v328_v46 = vand.u32 4294901760, %v327_v37  ;;  %v341_v47 = vsub.f32 %v5682_v30, %v8898_v38  ;;  %v454_v51 = vand.u32 4294901760, %v453_v41 }
   0xc   :  { %v321_v45 = vand.u32 4294901760, %v320_v36  ;;  %v335_v52 = vand.u32 4294901760, %v334_v42  ;;  %v5727_v53 = vpack.c.bf16 %v241_v7, %v238_v4 }
   0xd   :  { %7 = vsyncpa [#allocation3], 0  ;;  %v4824_v55 = vpack.c.bf16 %v440_v44, %v433_v39  ;;  %v342_v57 = vand.u32 4294901760, %v341_v47  ;;  %v250_v58 = vand.u32 4294901760, %v5712_v43  ;;  %v5738_v59 = vld [vmem:[%s8884_s1 + $0xb0] sm:$0xff]  ;;  %v5743_v60 = vld [vmem:[%s8884_s1 + $0xb8] sm:$0xff]  ;;  %v4828_v61 = vpack.c.bf16 %v454_v51, %v447_v50 }
   0xe   :  { %v4826_v56 = vpack.c.bf16 %v328_v46, %v321_v45  ;;  %4793 = vmatprep.subr.bf16.mxu0 %v5727_v53  ;;  %v253_v62 = vand.u32 4294901760, %v5720_v48  ;;  %v5747_v63 = vpack.c.bf16 %v193_v9, %v190_v8  ;;  %v202_v0 = vand.u32 4294901760, %v5725_v49  ;;  %v5753_v1 = vld [vmem:[%s8884_s1 + $0x30] sm:$0xff]  ;;  %v5775_v10 = vld [vmem:[%s8884_s1 + $0x38] sm:$0xff]  ;;  %v5826_v47 = vld [vmem:[%s8884_s1 + $0xc0] sm:$0xff] }
   0xf   :  { %4825 = vmatprep.subr.bf16.mxu1 %v4824_v55  ;;  %v4830_v2 = vpack.c.bf16 %v342_v57, %v335_v52  ;;  %v5756_v3 = vsub.f32 %v5712_v43, %v250_v58  ;;  %v205_v4 = vand.u32 4294901760, %v5732_v54  ;;  %v5759_v5 = vpack.c.bf16 %v247_v16, %v244_v15 }
  0x10   :  { %4827 = vmatpush3.bf16.msra.mxu1 %v4826_v56  ;;  %v5762_v6 = vsub.f32 %v5720_v48, %v253_v62  ;;  %4795 = vmatpush3.bf16.msra.mxu0 %v5747_v63  ;;  %v5768_v7 = vsub.f32 %v5725_v49, %v202_v0  ;;  %v256_v8 = vand.u32 4294901760, %v5738_v59  ;;  %v259_v9 = vand.u32 4294901760, %v5743_v60 }
  0x11   :  { %4829 = vmatprep.subr.bf16.mxu1 %v4828_v61  ;;  %v8897_v11 = vand.u32 4294901760, %v5756_v3  ;;  %v5779_v13 = vsub.f32 %v5732_v54, %v205_v4  ;;  %4797 = vmatprep.subr.bf16.mxu0 %v5759_v5  ;;  %v5786_v15 = vpack.c.bf16 %v199_v22, %v196_v18  ;;  %v208_v16 = vand.u32 4294901760, %v5753_v1  ;;  %v5837_v54 = vld [vmem:[%s8884_s1 + $0xc8] sm:$0xff] }
  0x12   :  { %v8896_v31 = vand.u32 4294901760, %v5762_v6  ;;  %v8895_v35 = vand.u32 4294901760, %v5768_v7  ;;  %v5792_v36 = vsub.f32 %v5738_v59, %v256_v8  ;;  %v5795_v37 = vsub.f32 %v5743_v60, %v259_v9  ;;  %v5848_v60 = vld [vmem:[%s8884_s1 + $0x40] sm:$0xff] }
  0x13   :  { %v460_v12 = vsub.f32 %v5756_v3, %v8897_v11  ;;  %v8894_v17 = vand.u32 4294901760, %v5779_v13  ;;  %v211_v18 = vand.u32 4294901760, %v5775_v10  ;;  %v5805_v22 = vsub.f32 %v5753_v1, %v208_v16 }
  0x14   :  { %4831 = vmatpush3.bf16.msra.mxu1 %v4830_v2  ;;  %v467_v39 = vsub.f32 %v5762_v6, %v8896_v31  ;;  %v348_v40 = vsub.f32 %v5768_v7, %v8895_v35  ;;  %v8892_v41 = vand.u32 4294901760, %v5792_v36  ;;  %v8888_v42 = vand.u32 4294901760, %v5795_v37  ;;  %4799 = vmatpush3.bf16.msra.mxu0 %v5786_v15 }
  0x15   :  { %v461_v43 = vand.u32 4294901760, %v460_v12  ;;  %v355_v44 = vsub.f32 %v5779_v13, %v8894_v17  ;;  %v8887_v45 = vand.u32 4294901760, %v5805_v22  ;;  %v5821_v46 = vsub.f32 %v5775_v10, %v211_v18 }
  0x16   :  { %v468_v48 = vand.u32 4294901760, %v467_v39  ;;  %v349_v50 = vand.u32 4294901760, %v348_v40  ;;  %v474_v51 = vsub.f32 %v5792_v36, %v8892_v41  ;;  %v481_v52 = vsub.f32 %v5795_v37, %v8888_v42  ;;  %v5854_v39 = vld [vmem:[%s8884_s1 + $0x48] sm:$0xff] }
  0x17   :  { %v356_v55 = vand.u32 4294901760, %v355_v44  ;;  %v362_v56 = vsub.f32 %v5805_v22, %v8887_v45  ;;  %v8886_v57 = vand.u32 4294901760, %v5821_v46  ;;  %v5843_v59 = vpack.c.bf16 %v253_v62, %v250_v58  ;;  %v5950_v41 = vld [vmem:[%s8884_s1 + $0xe8] sm:$0xff] }
  0x18   :  { %v4832_v61 = vpack.c.bf16 %v468_v48, %v461_v43  ;;  %v475_v2 = vand.u32 4294901760, %v474_v51  ;;  %v482_v10 = vand.u32 4294901760, %v481_v52  ;;  %v262_v12 = vand.u32 4294901760, %v5826_v47  ;;  %v5864_v43 = vld [vmem:[%s8884_s1 + $0xd0] sm:$0xff]  ;;  %v5869_v48 = vld [vmem:[%s8884_s1 + $0xd8] sm:$0xff] }
  0x19   :  { %v4834_v40 = vpack.c.bf16 %v356_v55, %v349_v50  ;;  %v363_v44 = vand.u32 4294901760, %v362_v56  ;;  %v369_v58 = vsub.f32 %v5821_v46, %v8886_v57  ;;  %4801 = vmatprep.subr.bf16.mxu0 %v5843_v59  ;;  %v265_v62 = vand.u32 4294901760, %v5837_v54 }
  0x1a   :  { %4833 = vmatprep.subr.bf16.mxu1 %v4832_v61  ;;  %v4836_v50 = vpack.c.bf16 %v482_v10, %v475_v2  ;;  %v5872_v51 = vsub.f32 %v5826_v47, %v262_v12  ;;  %v5876_v52 = vpack.c.bf16 %v205_v4, %v202_v0  ;;  %v214_v55 = vand.u32 4294901760, %v5848_v60  ;;  %v5895_v47 = vld [vmem:[%s8884_s1 + $0x50] sm:$0xff] }
  0x1b   :  { %4835 = vmatpush3.bf16.msra.mxu1 %v4834_v40  ;;  %v370_v56 = vand.u32 4294901760, %v369_v58  ;;  %v5880_v57 = vsub.f32 %v5837_v54, %v265_v62  ;;  %v217_v45 = vand.u32 4294901760, %v5854_v39  ;;  %v5883_v42 = vpack.c.bf16 %v259_v9, %v256_v8  ;;  %v5900_v8 = vld [vmem:[%s8884_s1 + $0x58] sm:$0xff] }
  0x1c   :  { %4837 = vmatprep.subr.bf16.mxu1 %v4836_v50  ;;  %v8890_v61 = vand.u32 4294901760, %v5872_v51  ;;  %4803 = vmatpush3.bf16.msra.mxu0 %v5876_v52  ;;  %v5888_v49 = vsub.f32 %v5848_v60, %v214_v55  ;;  %v268_v0 = vand.u32 4294901760, %v5864_v43  ;;  %v271_v4 = vand.u32 4294901760, %v5869_v48 }
  0x1d   :  { %v4838_v9 = vpack.c.bf16 %v370_v56, %v363_v44  ;;  %v8889_v54 = vand.u32 4294901760, %v5880_v57  ;;  %v5904_v60 = vsub.f32 %v5854_v39, %v217_v45  ;;  %4805 = vmatprep.subr.bf16.mxu0 %v5883_v42  ;;  %v5909_v2 = vpack.c.bf16 %v211_v18, %v208_v16 }
  0x1e   :  { %v488_v10 = vsub.f32 %v5872_v51, %v8890_v61  ;;  %v8891_v40 = vand.u32 4294901760, %v5888_v49  ;;  %v5916_v58 = vsub.f32 %v5864_v43, %v268_v0  ;;  %v5919_v44 = vsub.f32 %v5869_v48, %v271_v4 }
  0x1f   :  { %4839 = vmatpush3.bf16.msra.mxu1 %v4838_v9  ;;  %v495_v39 = vsub.f32 %v5880_v57, %v8889_v54  ;;  %v8893_v1 = vand.u32 4294901760, %v5904_v60  ;;  %v220_v16 = vand.u32 4294901760, %v5895_v47  ;;  %v223_v18 = vand.u32 4294901760, %v5900_v8 }
  0x20   :  { %v489_v50 = vand.u32 4294901760, %v488_v10  ;;  %v376_v43 = vsub.f32 %v5888_v49, %v8891_v40  ;;  %v8900_v56 = vand.u32 4294901760, %v5916_v58  ;;  %v8901_v48 = vand.u32 4294901760, %v5919_v44  ;;  %4807 = vmatpush3.bf16.msra.mxu0 %v5909_v2  ;;  %v5945_v40 = vld [vmem:[%s8884_s1 + $0xe0] sm:$0xff] }
  0x21   :  { %v496_v9 = vand.u32 4294901760, %v495_v39  ;;  %v383_v54 = vsub.f32 %v5904_v60, %v8893_v1  ;;  %v5937_v61 = vsub.f32 %v5895_v47, %v220_v16  ;;  %v5940_v10 = vsub.f32 %v5900_v8, %v223_v18 }
  0x22   :  { %v377_v39 = vand.u32 4294901760, %v376_v43  ;;  %v502_v1 = vsub.f32 %v5916_v58, %v8900_v56  ;;  %v509_v47 = vsub.f32 %v5919_v44, %v8901_v48  ;;  %v5958_v8 = vpack.c.bf16 %v265_v62, %v262_v12  ;;  %v5965_v43 = vld [vmem:[%s8884_s1 + $0x60] sm:$0xff]  ;;  %v74_v62 = vld [vmem:[%s8884_s1 + $0x68] sm:$0xff] }
  0x23   :  { %v4840_v17 = vpack.c.bf16 %v496_v9, %v489_v50  ;;  %v384_v35 = vand.u32 4294901760, %v383_v54  ;;  %v8904_v31 = vand.u32 4294901760, %v5937_v61  ;;  %v8903_v11 = vand.u32 4294901760, %v5940_v10 }
  0x24   :  { %v503_v38 = vand.u32 4294901760, %v502_v1  ;;  %v510_v34 = vand.u32 4294901760, %v509_v47  ;;  %4809 = vmatprep.subr.bf16.mxu0 %v5958_v8  ;;  %v274_v56 = vand.u32 4294901760, %v5945_v40  ;;  %v277_v12 = vand.u32 4294901760, %v5950_v41  ;;  %v91_v47 = vld [vmem:[%s8884_s1 + $0xf0] sm:$0xff] }
  0x25   :  { %4841 = vmatprep.subr.bf16.mxu1 %v4840_v17  ;;  %v4842_v54 = vpack.c.bf16 %v384_v35, %v377_v39  ;;  %v390_v50 = vsub.f32 %v5937_v61, %v8904_v31  ;;  %v397_v1 = vsub.f32 %v5940_v10, %v8903_v11  ;;  %v5979_v9 = vpack.c.bf16 %v217_v45, %v214_v55  ;;  %v92_v39 = vld [vmem:[%s8884_s1 + $0xf8] sm:$0xff] }
  0x26   :  { %v4844_v48 = vpack.c.bf16 %v510_v34, %v503_v38  ;;  %v5985_v33 = vsub.f32 %v5945_v40, %v274_v56  ;;  %v5988_v35 = vsub.f32 %v5950_v41, %v277_v12  ;;  %v226_v17 = vand.u32 4294901760, %v5965_v43 }
  0x27   :  { %9176 = vst [vmem:[#allocation5_spill] sm:$0xff] %v5979_v9  ;;  %4843 = vmatpush3.bf16.msra.mxu1 %v4842_v54  ;;  %v391_v45 = vand.u32 4294901760, %v390_v50  ;;  %v398_v55 = vand.u32 4294901760, %v397_v1  ;;  %4811 = vmatpush3.bf16.msra.mxu0 %v5979_v9  ;;  %v229_v11 = vand.u32 4294901760, %v74_v62  ;;  %v5995_v31 = vpack.c.bf16 %v271_v4, %v268_v0  ;;  %v75_v54 = vld [vmem:[%s8884_s1 + $0x70] sm:$0xff]  ;;  %v76_v50 = vld [vmem:[%s8884_s1 + $0x78] sm:$0xff] }
  0x28   :  { %4845 = vmatprep.subr.bf16.mxu1 %v4844_v48  ;;  %v8909_v34 = vand.u32 4294901760, %v5985_v33  ;;  %v8910_v38 = vand.u32 4294901760, %v5988_v35  ;;  %v6000_v41 = vsub.f32 %v5965_v43, %v226_v17  ;;  %v280_v40 = vand.u32 4294901760, %v91_v47 }
  0x29   :  { %9177 = vst [vmem:[#allocation6_spill] sm:$0xff] %v5995_v31  ;;  %v4846_v1 = vpack.c.bf16 %v398_v55, %v391_v45  ;;  %v6008_v0 = vsub.f32 %v74_v62, %v229_v11  ;;  %4813 = vmatprep.subr.bf16.mxu0 %v5995_v31  ;;  %v283_v4 = vand.u32 4294901760, %v92_v39  ;;  %v6011_v48 = vpack.c.bf16 %v223_v18, %v220_v16 }
  0x2a   :  { %v516_v43 = vsub.f32 %v5985_v33, %v8909_v34  ;;  %v523_v32 = vsub.f32 %v5988_v35, %v8910_v38  ;;  %v8916_v29 = vand.u32 4294901760, %v6000_v41  ;;  %v6020_v28 = vsub.f32 %v91_v47, %v280_v40 }
  0x2b   :  { %9178 = vst [vmem:[#allocation7_spill] sm:$0xff] %v6011_v48  ;;  %4847 = vmatpush3.bf16.msra.mxu1 %v4846_v1  ;;  %v8919_v62 = vand.u32 4294901760, %v6008_v0  ;;  %v6023_v45 = vsub.f32 %v92_v39, %v283_v4  ;;  %4815 = vmatpush3.bf16.msra.mxu0 %v6011_v48  ;;  %v232_v16 = vand.u32 4294901760, %v75_v54  ;;  %v235_v18 = vand.u32 4294901760, %v76_v50 }
  0x2c   :  { %v517_v55 = vand.u32 4294901760, %v516_v43  ;;  %v524_v27 = vand.u32 4294901760, %v523_v32  ;;  %v404_v34 = vsub.f32 %v6000_v41, %v8916_v29  ;;  %v8921_v38 = vand.u32 4294901760, %v6020_v28 }
  0x2d   :  { %v411_v47 = vsub.f32 %v6008_v0, %v8919_v62  ;;  %v8920_v1 = vand.u32 4294901760, %v6023_v45  ;;  %v6034_v39 = vsub.f32 %v75_v54, %v232_v16  ;;  %v6036_v23 = vsub.f32 %v76_v50, %v235_v18 }
  0x2e   :  { %v4848_v48 = vpack.c.bf16 %v524_v27, %v517_v55  ;;  %v405_v31 = vand.u32 4294901760, %v404_v34  ;;  %v530_v32 = vsub.f32 %v6020_v28, %v8921_v38  ;;  %v6041_v43 = vpack.c.bf16 %v277_v12, %v274_v56 }
  0x2f   :  { %9179 = vst [vmem:[#allocation8_spill] sm:$0xff] %v6034_v39  ;;  %v412_v29 = vand.u32 4294901760, %v411_v47  ;;  %v537_v9 = vsub.f32 %v6023_v45, %v8920_v1  ;;  %v417_v62 = vand.u32 4294901760, %v6034_v39  ;;  %v424_v54 = vand.u32 4294901760, %v6036_v23 }
  0x30   :  { %4849 = vmatprep.subr.bf16.mxu1 %v4848_v48  ;;  %v531_v50 = vand.u32 4294901760, %v530_v32  ;;  %4817 = vmatprep.subr.bf16.mxu0 %v6041_v43  ;;  %v6049_v27 = vpack.c.bf16 %v229_v11, %v226_v17  ;;  %v6054_v47 = vpack.c.bf16 %v283_v4, %v280_v40  ;;  %v6056_v1 = vpack.c.bf16 %v235_v18, %v232_v16 }
  0x31   :  { %v4850_v34 = vpack.c.bf16 %v412_v29, %v405_v31  ;;  %v538_v55 = vand.u32 4294901760, %v537_v9  ;;  %v418_v56 = vsub.f32 %v6034_v39, %v417_v62  ;;  %v425_v12 = vsub.f32 %v6036_v23, %v424_v54 }
  0x32   :  { %4819 = vmatpush3.bf16.msra.mxu0 %v6049_v27  ;;  %v4856_v48 = vpack.c.bf16 %v5656_v19, %v5646_v14 }
  0x33   :  { %4851 = vmatpush3.bf16.msra.mxu1 %v4850_v34  ;;  %v4852_v32 = vpack.c.bf16 %v538_v55, %v531_v50  ;;  %v419_v38 = vand.u32 4294901760, %v418_v56  ;;  %v426_v11 = vand.u32 4294901760, %v425_v12  ;;  %4821 = vmatprep.subr.bf16.mxu0 %v6054_v47  ;;  %v9180_v55 = vand.u32 4294901760, %v5646_v14 }
  0x34   :  { %v9186_v12 = vand.u32 4294901760, %v5666_v24  ;;  %v9190_v14 = vand.u32 4294901760, %v5682_v30 }
  0x35   :  { %4853 = vmatprep.subr.bf16.mxu1 %v4852_v32  ;;  %v4854_v4 = vpack.c.bf16 %v426_v11, %v419_v38  ;;  %v9181_v38 = vand.u32 4294901760, %v5656_v19  ;;  %v9187_v32 = vand.u32 4294901760, %v5669_v25  ;;  %v9189_v11 = vand.u32 4294901760, %v5674_v26 }
  0x36   :  { %4823 = vmatpush3.bf16.msra.mxu0 %v6056_v1  ;;  %v9192_v19 = vand.u32 4294901760, %v5756_v3 }
  0x37   :  { %4855 = vmatpush3.bf16.msra.mxu1 %v4854_v4  ;;  %4857 = vmatprep.subr.bf16.mxu0 %v4856_v48  ;;  %v6097_v34 = vpack.c.bf16 %v9181_v38, %v9180_v55  ;;  %v9183_v4 = vand.u32 4294901760, %v5659_v20  ;;  %v9184_v48 = vand.u32 4294901760, %v5661_v21  ;;  %v6109_v50 = vpack.c.bf16 %v9187_v32, %v9186_v12 }
  0x38   :  { %4889 = vmatprep.subr.bf16.mxu1 %v5727_v53  ;;  %v6115_v18 = vpack.c.bf16 %v9190_v14, %v9189_v11  ;;  %v9193_v55 = vand.u32 4294901760, %v5762_v6  ;;  %v9198_v12 = vand.u32 4294901760, %v5792_v36  ;;  %v9199_v32 = vand.u32 4294901760, %v5795_v37 }
  0x39   :  { %9182 = vst [vmem:[#allocation9_spill] sm:$0xff] %v6097_v34  ;;  %v6103_v56 = vpack.c.bf16 %v9184_v48, %v9183_v4  ;;  %9188 = vst [vmem:[#allocation11_spill] sm:$0xff] %v6109_v50  ;;  %v9195_v4 = vand.u32 4294901760, %v5768_v7  ;;  %v9196_v48 = vand.u32 4294901760, %v5779_v13  ;;  %v9201_v11 = vand.u32 4294901760, %v5805_v22 }
  0x3a   :  { %9191 = vst [vmem:[#allocation12_spill] sm:$0xff] %v6115_v18  ;;  %v6121_v38 = vpack.c.bf16 %v9193_v55, %v9192_v19  ;;  %v6133_v40 = vpack.c.bf16 %v9199_v32, %v9198_v12  ;;  %v9202_v14 = vand.u32 4294901760, %v5821_v46  ;;  %v9204_v19 = vand.u32 4294901760, %v5872_v51 }
  0x3b   :  { %9185 = vst [vmem:[#allocation10_spill] sm:$0xff] %v6103_v56  ;;  %v6127_v16 = vpack.c.bf16 %v9196_v48, %v9195_v4  ;;  %v9205_v55 = vand.u32 4294901760, %v5880_v57  ;;  %v9207_v4 = vand.u32 4294901760, %v5888_v49  ;;  %v9208_v48 = vand.u32 4294901760, %v5904_v60 }
  0x3c   :  { %9194 = vst [vmem:[#allocation13_spill] sm:$0xff] %v6121_v38  ;;  %9200 = vst [vmem:[#allocation15_spill] sm:$0xff] %v6133_v40  ;;  %v6139_v17 = vpack.c.bf16 %v9202_v14, %v9201_v11  ;;  %v9210_v12 = vand.u32 4294901760, %v5916_v58  ;;  %v9211_v32 = vand.u32 4294901760, %v5919_v44  ;;  %v9213_v11 = vand.u32 4294901760, %v5937_v61 }
  0x3d   :  { %9197 = vst [vmem:[#allocation14_spill] sm:$0xff] %v6127_v16  ;;  %v6145_v9 = vpack.c.bf16 %v9205_v55, %v9204_v19  ;;  %v6151_v31 = vpack.c.bf16 %v9208_v48, %v9207_v4  ;;  %v9214_v14 = vand.u32 4294901760, %v5940_v10  ;;  %v9216_v19 = vand.u32 4294901760, %v5985_v33 }
  0x3e   :  { %9203 = vst [vmem:[#allocation16_spill] sm:$0xff] %v6139_v17  ;;  %v6157_v29 = vpack.c.bf16 %v9211_v32, %v9210_v12  ;;  %v9217_v55 = vand.u32 4294901760, %v5988_v35  ;;  %v9219_v4 = vand.u32 4294901760, %v6000_v41  ;;  %v9220_v48 = vand.u32 4294901760, %v6008_v0 }
  0x3f   :  { %9206 = vst [vmem:[#allocation17_spill] sm:$0xff] %v6145_v9  ;;  %9209 = vst [vmem:[#allocation18_spill] sm:$0xff] %v6151_v31  ;;  %v6163_v17 = vpack.c.bf16 %v9214_v14, %v9213_v11  ;;  %v9222_v12 = vand.u32 4294901760, %v6020_v28  ;;  %v9223_v32 = vand.u32 4294901760, %v6023_v45  ;;  %v6183_v11 = vpack.c.bf16 %v424_v54, %v417_v62 }
  0x40   :  { %9212 = vst [vmem:[#allocation19_spill] sm:$0xff] %v6157_v29  ;;  %v6169_v9 = vpack.c.bf16 %v9217_v55, %v9216_v19  ;;  %v6175_v31 = vpack.c.bf16 %v9220_v48, %v9219_v4  ;;  %v14_v14 = vlaneseq  ;;  %v8924_v62 = vmov 0.0  }
  0x41   :  { %9215 = vst [vmem:[#allocation20_spill] sm:$0xff] %v6163_v17  ;;  %v6181_v29 = vpack.c.bf16 %v9223_v32, %v9222_v12  ;;  %9225 = vst [vmem:[#allocation24_spill] sm:$0xff] %v6183_v11 }
  0x42   :  { %9218 = vst [vmem:[#allocation21_spill] sm:$0xff] %v6169_v9  ;;  %9221 = vst [vmem:[#allocation22_spill] sm:$0xff] %v6175_v31  ;;  %v6185_v17 = vand.u32 127, %v14_v14 }
  0x43   :  { %9224 = vst [vmem:[#allocation23_spill] sm:$0xff] %v6181_v29 }
  0x44   :  { %v16_v19 = vadd.s32 128, %v6185_v17  ;;  %v18_v55 = vadd.s32 384, %v6185_v17  ;;  %v17_v9 = vadd.s32 256, %v6185_v17 }
  0x81   :  { %v6190_v40 = vpop.permute.xlu0 %24 }
  0x82   :  { %vm30_vm0 = vcmp.eq.s32.totalorder %v6190_v40, %v16_v19  ;;  %vm29_vm1 = vcmp.eq.s32.totalorder %v6190_v40, %v6185_v17  ;;  %vm32_vm2 = vcmp.eq.s32.totalorder %v6190_v40, %v18_v55  ;;  %vm31_vm3 = vcmp.eq.s32.totalorder %v6190_v40, %v17_v9 }
  0x83   :  { %v46_v54 = vsel %vm30_vm0, 5.656854, %v8924_v62  ;;  %v45_v4 = vsel %vm29_vm1, 5.656854, %v8924_v62  ;;  %v6200_v48 = vsel %vm32_vm2, 5.656854, %v8924_v62 }
  0x84   :  { %9226 = vst [vmem:[#allocation25_spill] sm:$0xff] %v6200_v48  ;;  %v6202_v12 = vand.u32 4294901760, %v46_v54  ;;  %v6204_v32 = vand.u32 4294901760, %v45_v4  ;;  %v6207_v14 = vsel %vm31_vm3, 5.656854, %v8924_v62  ;;  %vm3861_vm0 = vcmask 261120  }
  0x85   :  { %9229 = vst [vmem:[#allocation28_spill] sm:$0xff] %v6207_v14  ;;  %v6209_v11 = vpop.permute.xlu0 %27 }
  0x86   :  { %9227 = vst [vmem:[#allocation26_spill] sm:$0xff] %v6202_v12  ;;  %9228 = vst [vmem:[#allocation27_spill] sm:$0xff] %v6204_v32  ;;  %541 = vmatprep.mubr.f32.mxu1 %v6202_v12  ;;  %vm38_vm4 = vcmp.eq.s32.totalorder %v6209_v11, %v16_v19  ;;  %vm37_vm5 = vcmp.eq.s32.totalorder %v6209_v11, %v6185_v17  ;;  %v286_v29 = vsub.f32 %v46_v54, %v6202_v12 }
  0x87   :  { %v6217_v31 = vsub.f32 %v45_v4, %v6204_v32  ;;  %543 = vmatmul.mubr.f32.vlgmr.msra.gmra.mrb[0].mxu1 %v6204_v32  ;;  %v54_v48 = vsel %vm38_vm4, 5.656854, %v8924_v62  ;;  %v53_v14 = vsel %vm37_vm5, 5.656854, %v8924_v62  ;;  %vm40_vm6 = vcmp.eq.s32.totalorder %v6209_v11, %v18_v55 }
  0x88   :  { %4891 = vmatpush3.bf16.msra.mxu1 %v5747_v63  ;;  %v6223_v16 = vand.u32 4294901760, %v54_v48  ;;  %v6225_v38 = vand.u32 4294901760, %v53_v14  ;;  %v287_v19 = vand.u32 4294901760, %v286_v29  ;;  %vm39_vm7 = vcmp.eq.s32.totalorder %v6209_v11, %v17_v9 }
  0x89   :  { %v8931_v18 = vand.u32 4294901760, %v6217_v31  ;;  %4893 = vmatprep.subr.bf16.mxu1 %v5759_v5  ;;  %v20_v54 = vadd.s32 640, %v6185_v17  ;;  %v19_v4 = vadd.s32 512, %v6185_v17  ;;  %v9230_v9 = vmov 0.0  }
  0x8a   :  { %548 = vmatprep.mubr.f32.mxu1 %v6223_v16  ;;  %v288_v62 = vsub.f32 %v286_v29, %v287_v19  ;;  %v6238_v50 = vsub.f32 %v54_v48, %v6223_v16  ;;  %v6241_v56 = vsub.f32 %v53_v14, %v6225_v38  ;;  %v6245_v55 = vsel %vm40_vm6, 5.656854, %v9230_v9 }
  0x8b   :  { %v294_v32 = vsub.f32 %v6217_v31, %v8931_v18  ;;  %550 = vmatmul.mubr.f32.gmra.mrb[2].mxu1 %v6225_v38  ;;  %9231 = vst [vmem:[#allocation29_spill] sm:$0xff] %v6245_v55  ;;  %v6248_v34 = vsel %vm39_vm7, 5.656854, %v9230_v9  ;;  %vm34_vm8 = vcmp.eq.s32.totalorder %v6190_v40, %v20_v54  ;;  %vm33_vm9 = vcmp.eq.s32.totalorder %v6190_v40, %v19_v4 }
  0x8c   :  { %9232 = vst [vmem:[#allocation30_spill] sm:$0xff] %v6248_v34  ;;  %4895 = vmatpush3.bf16.msra.mxu1 %v5786_v15  ;;  %801 = vmatprep.mubr.f32.mxu1 %v287_v19  ;;  %v289_v12 = vand.u32 4294901760, %v288_v62  ;;  %v8933_v18 = vand.u32 4294901760, %v6238_v50  ;;  %v8939_v48 = vand.u32 4294901760, %v6241_v56  ;;  %v9233_v62 = vpack.c.bf16 %v5661_v21, %v5659_v20 }
  0x8d   :  { %v295_v39 = vand.u32 4294901760, %v294_v32  ;;  %4897 = vmatprep.subr.bf16.mxu1 %v5843_v59  ;;  %v9235_v55 = vpack.c.bf16 %v5669_v25, %v5666_v24  ;;  %vm42_vm10 = vcmp.eq.s32.totalorder %v6209_v11, %v20_v54  ;;  %vm41_vm11 = vcmp.eq.s32.totalorder %v6209_v11, %v19_v4  ;;  %v6319_v4 = vld [vmem:[%s8884_s1 + $0x1e0] sm:$0xff] }
  0x8e   :  { %290 = vmatprep.mubr.f32.mxu0 %v289_v12  ;;  %v303_v14 = vsub.f32 %v6238_v50, %v8933_v18  ;;  %v309_v34 = vsub.f32 %v6241_v56, %v8939_v48  ;;  %v6267_v12 = vsel %vm34_vm8, 5.656854, %v9230_v9  ;;  %v22_v18 = vadd.s32 896, %v6185_v17 }
  0x8f   :  { %296 = vmatmul.mubr.f32.vlgmr.msra.gmra.mrb[0].mxu0 %v295_v39  ;;  %9234 = vst [vmem:[#allocation31_spill] sm:$0xff] %v6267_v12  ;;  %v6275_v39 = vsel %vm33_vm9, 5.656854, %v9230_v9  ;;  %v21_v20 = vadd.s32 768, %v6185_v17  ;;  %v9237_v21 = vpack.c.bf16 %v5682_v30, %v5674_v26  ;;  %v6285_v24 = vsel %vm42_vm10, 5.656854, %v9230_v9 }
  0x90   :  { %4859 = vmatpush3.bf16.msra.mxu0 %v9233_v62  ;;  %4899 = vmatpush3.bf16.msra.mxu1 %v5876_v52  ;;  %v304_v32 = vand.u32 4294901760, %v303_v14  ;;  %v310_v19 = vand.u32 4294901760, %v309_v34  ;;  %9236 = vst [vmem:[#allocation32_spill] sm:$0xff] %v6275_v39  ;;  %9238 = vst [vmem:[#allocation33_spill] sm:$0xff] %v6285_v24  ;;  %v6288_v25 = vsel %vm41_vm11, 5.656854, %v9230_v9  ;;  %vm36_vm12 = vcmp.eq.s32.totalorder %v6190_v40, %v22_v18 }
  0x91   :  { %4861 = vmatprep.subr.bf16.mxu0 %v9235_v55  ;;  %4901 = vmatprep.subr.bf16.mxu1 %v5883_v42  ;;  %9239 = vst [vmem:[#allocation34_spill] sm:$0xff] %v6288_v25  ;;  %v9240_v34 = vpack.c.bf16 %v5762_v6, %v5756_v3  ;;  %v6297_v26 = vld [vmem:[%s8884_s1 + $0x150] sm:$0xff]  ;;  %v6302_v30 = vld [vmem:[%s8884_s1 + $0x158] sm:$0xff]  ;;  %v6306_v17 = vsel %vm36_vm12, 5.656854, %v9230_v9  ;;  %vm35_vm13 = vcmp.eq.s32.totalorder %v6190_v40, %v21_v20  ;;  %v6324_v40 = vld [vmem:[%s8884_s1 + $0x1e8] sm:$0xff] }
  0x92   :  { %305 = vmatprep.mubr.f32.mxu0 %v304_v32  ;;  %9241 = vst [vmem:[#allocation35_spill] sm:$0xff] %v6297_v26  ;;  %9242 = vst [vmem:[#allocation36_spill] sm:$0xff] %v6302_v30  ;;  %vm44_vm14 = vcmp.eq.s32.totalorder %v6209_v11, %v22_v18  ;;  %v9244_v3 = vpack.c.bf16 %v5779_v13, %v5768_v7  ;;  %v9245_v6 = vld [vmem:[#allocation5_spill] sm:$0xff]  ;;  %v8935_v54 = vand.u32 4294901760, %v6302_v30  ;;  %v9249_v13 = vld [vmem:[#allocation6_spill] sm:$0xff]  ;;  %v8938_v62 = vand.u32 4294901760, %v6319_v4 }
  0x93   :  { %311 = vmatmul.mubr.f32.gmra.mrb[2].mxu0 %v310_v19  ;;  %9243 = vst [vmem:[#allocation37_spill] sm:$0xff] %v6306_v17  ;;  %9246 = vst [vmem:[#allocation5_spill] sm:$0xff] %v6319_v4  ;;  %v9248_v7 = vpack.c.bf16 %v5795_v37, %v5792_v36  ;;  %v6331_v18 = vsel %vm35_vm13, 5.656854, %v9230_v9  ;;  %v6334_v55 = vsel %vm44_vm14, 5.656854, %v9230_v9  ;;  %v9254_v37 = vpack.c.bf16 %v5821_v46, %v5805_v22 }
  0x94   :  { %4863 = vmatpush3.bf16.msra.mxu0 %v9237_v21  ;;  %4903 = vmatpush3.bf16.msra.mxu1 %v5909_v2  ;;  %9247 = vst [vmem:[#allocation38_spill] sm:$0xff] %v6324_v40  ;;  %9250 = vst [vmem:[#allocation6_spill] sm:$0xff] %v6331_v18  ;;  %v6339_v14 = vld [vmem:[%s8884_s1 + $0x160] sm:$0xff]  ;;  %v8937_v32 = vand.u32 4294901760, %v6324_v40  ;;  %v6346_v36 = vld [vmem:[%s8884_s1 + $0x168] sm:$0xff]  ;;  %vm43_vm15 = vcmp.eq.s32.totalorder %v6209_v11, %v21_v20  ;;  %v9258_v46 = vpack.c.bf16 %v5880_v57, %v5872_v51 }
  0x95   :  { %685 = vmatprep.mubr.f32.mxu0 %v286_v29  ;;  %4865 = vmatprep.subr.bf16.mxu0 %v9240_v34  ;;  %v8936_v29 = vand.u32 4294901760, %v6297_v26  ;;  %9251 = vst [vmem:[#allocation39_spill] sm:$0xff] %v6334_v55  ;;  %9252 = vst [vmem:[#allocation40_spill] sm:$0xff] %v6339_v14  ;;  %v9255_v19 = vld [vmem:[#allocation7_spill] sm:$0xff]  ;;  %v6360_v34 = vsub.f32 %v6302_v30, %v8935_v54  ;;  %v6370_v22 = vld [vmem:[%s8884_s1 + $0x1f8] sm:$0xff]  ;;  %v9263_v48 = vpack.c.bf16 %v5919_v44, %v5916_v58 }
  0x96   :  { %4905 = vmatprep.subr.bf16.mxu1 %v5958_v8  ;;  %9253 = vst [vmem:[#allocation41_spill] sm:$0xff] %v6346_v36  ;;  %9257 = vst [vmem:[#allocation42_spill] sm:$0xff] %v6370_v22  ;;  %v6380_v54 = vsel %vm43_vm15, 5.656854, %v9230_v9  ;;  %v6390_v11 = vsub.f32 %v6324_v40, %v8937_v32  ;;  %v6397_v20 = vld [vmem:[%s8884_s1 + $0x170] sm:$0xff]  ;;  %v6402_v9 = vld [vmem:[%s8884_s1 + $0x178] sm:$0xff] }
  0x97   :  { %v6355_v21 = vsub.f32 %v6297_v26, %v8936_v29  ;;  %9259 = vst [vmem:[#allocation43_spill] sm:$0xff] %v6380_v54  ;;  %v6385_v29 = vsub.f32 %v6319_v4, %v8938_v62  ;;  %9260 = vst [vmem:[#allocation44_spill] sm:$0xff] %v6397_v20  ;;  %v8942_v62 = vand.u32 4294901760, %v6360_v34  ;;  %v6495_v54 = vld [vmem:[%s8884_s1 + $0x190] sm:$0xff]  ;;  %v9273_v55 = vand.u32 4294901760, %v6238_v50  ;;  %v6509_v18 = vld [vmem:[%s8884_s1 + $0x198] sm:$0xff] }
  0x98   :  { %4867 = vmatpush3.bf16.msra.mxu0 %v9244_v3  ;;  %4907 = vmatpush3.bf16.msra.mxu1 %v9245_v6  ;;  %v6365_v3 = vld [vmem:[%s8884_s1 + $0x1f0] sm:$0xff]  ;;  %9261 = vst [vmem:[#allocation45_spill] sm:$0xff] %v6402_v9  ;;  %v9301_v25 = vld [vmem:[#allocation11_spill] sm:$0xff]  ;;  %v9318_v12 = vld [vmem:[#allocation14_spill] sm:$0xff] }
  0x99   :  { %4869 = vmatprep.subr.bf16.mxu0 %v9248_v7  ;;  %4909 = vmatprep.subr.bf16.mxu1 %v9249_v13  ;;  %9256 = vst [vmem:[#allocation7_spill] sm:$0xff] %v6365_v3  ;;  %v8940_v7 = vand.u32 4294901760, %v6339_v14  ;;  %v8943_v57 = vand.u32 4294901760, %v6365_v3  ;;  %v8946_v32 = vand.u32 4294901760, %v6355_v21  ;;  %v8945_v44 = vand.u32 4294901760, %v6385_v29  ;;  %v9343_v40 = vld [vmem:[#allocation20_spill] sm:$0xff] }
  0x9b   :  { %v6417_v51 = vsub.f32 %v6339_v14, %v8940_v7  ;;  %v6430_v58 = vpack.c.bf16 %v8942_v62, %v8946_v32  ;;  %v6437_v7 = vsub.f32 %v6365_v3, %v8943_v57  ;;  %v9267_v62 = vpack.c.bf16 %v5988_v35, %v5985_v33  ;;  %v6455_v57 = vld [vmem:[%s8884_s1 + $0x180] sm:$0xff] }
  0x9c   :  { %4871 = vmatpush3.bf16.msra.mxu0 %v9254_v37  ;;  %4911 = vmatpush3.bf16.msra.mxu1 %v9255_v19  ;;  %v8941_v37 = vand.u32 4294901760, %v6346_v36  ;;  %v6471_v33 = vld [vmem:[%s8884_s1 + $0x100] sm:$0xff]  ;;  %v9271_v32 = vand.u32 4294901760, %v6217_v31 }
  0x9d   :  { %4873 = vmatprep.subr.bf16.mxu0 %v9258_v46  ;;  %4913 = vmatprep.subr.bf16.mxu1 %v6041_v43  ;;  %v9262_v46 = vpack.c.bf16 %v5904_v60, %v5888_v49  ;;  %9264 = vst [vmem:[#allocation46_spill] sm:$0xff] %v6430_v58  ;;  %v9274_v35 = vand.u32 4294901760, %v6417_v51 }
  0x9e   :  { %v6422_v49 = vsub.f32 %v6346_v36, %v8941_v37  ;;  %v9265_v37 = vand.u32 4294901760, %v6370_v22 }
  0xa0   :  { %4875 = vmatpush3.bf16.msra.mxu0 %v9262_v46  ;;  %4915 = vmatpush3.bf16.msra.mxu1 %v6049_v27  ;;  %v6442_v60 = vsub.f32 %v6370_v22, %v9265_v37  ;;  %v9266_v46 = vpack.c.bf16 %v5940_v10, %v5937_v61  ;;  %v6460_v37 = vld [vmem:[%s8884_s1 + $0x188] sm:$0xff]  ;;  %v9275_v10 = vand.u32 4294901760, %v6422_v49 }
  0xa1   :  { %4877 = vmatprep.subr.bf16.mxu0 %v9263_v48  ;;  %4917 = vmatprep.subr.bf16.mxu1 %v6054_v47  ;;  %v8944_v48 = vand.u32 4294901760, %v6390_v11  ;;  %v9354_v26 = vand.u32 4294901760, %v6460_v37 }
  0xa2   :  { %v6515_v17 = vpack.c.bf16 %v9275_v10, %v9274_v35  ;;  %v9281_v35 = vand.u32 4294901760, %v6241_v56  ;;  %v9285_v10 = vand.u32 4294901760, %v6455_v57 }
  0xa3   :  { %v6466_v61 = vpack.c.bf16 %v8944_v48, %v8945_v44  ;;  %v9270_v48 = vand.u32 4294901760, %v6402_v9 }
  0xa4   :  { %4879 = vmatpush3.bf16.msra.mxu0 %v9266_v46  ;;  %4919 = vmatpush3.bf16.msra.mxu1 %v6056_v1  ;;  %9276 = vst [vmem:[#allocation48_spill] sm:$0xff] %v6515_v17 }
  0xa5   :  { %4881 = vmatprep.subr.bf16.mxu0 %v9267_v62  ;;  %4953 = vmatprep.subr.bf16.mxu1 %v5727_v53  ;;  %9268 = vst [vmem:[#allocation47_spill] sm:$0xff] %v6466_v61  ;;  %v6476_v53 = vld [vmem:[%s8884_s1 + $0x108] sm:$0xff]  ;;  %v9269_v62 = vand.u32 4294901760, %v6397_v20  ;;  %v6488_v44 = vsub.f32 %v6402_v9, %v9270_v48 }
  0xa7   :  { %v6483_v46 = vsub.f32 %v6397_v20, %v9269_v62  ;;  %805 = vmatmul.mubr.f32.vlgmr.msra.gmra.mrb[4].mxu1 %v9271_v32  ;;  %v9272_v62 = vpack.c.bf16 %v6008_v0, %v6000_v41  ;;  %v9277_v41 = vpack.c.bf16 %v6023_v45, %v6020_v28  ;;  %v9279_v32 = vand.u32 4294901760, %v6442_v60  ;;  %v9335_v20 = vld [vmem:[#allocation18_spill] sm:$0xff] }
  0xa8   :  { %812 = vmatprep.mubr.f32.mxu1 %v9273_v55  ;;  %4955 = vmatpush3.bf16.msra.mxu1 %v5747_v63  ;;  %v6534_v63 = vld [vmem:[%s8884_s1 + $0x110] sm:$0xff]  ;;  %v6548_v55 = vsub.f32 %v6455_v57, %v9285_v10  ;;  %v9287_v0 = vand.u32 4294901760, %v6460_v37 }
  0xa9   :  { %4883 = vmatpush3.bf16.msra.mxu0 %v9272_v62  ;;  %v9278_v62 = vand.u32 4294901760, %v6437_v7  ;;  %4957 = vmatprep.subr.bf16.mxu1 %v5759_v5  ;;  %v8952_v28 = vand.u32 4294901760, %v6483_v46  ;;  %v9284_v5 = vld [vmem:[#allocation26_spill] sm:$0xff] }
  0xaa   :  { %4885 = vmatprep.subr.bf16.mxu0 %v9277_v41  ;;  %v6553_v45 = vsub.f32 %v6460_v37, %v9287_v0  ;;  %v9365_v37 = vld [vmem:[#allocation24_spill] sm:$0xff] }
  0xab   :  { %v6527_v48 = vpack.c.bf16 %v9279_v32, %v9278_v62  ;;  %816 = vmatmul.mubr.f32.gmra.mrb[6].mxu1 %v9281_v35  ;;  %v9282_v32 = vld [vmem:[#allocation8_spill] sm:$0xff]  ;;  %v9289_v35 = vand.u32 4294901760, %v6488_v44 }
  0xac   :  { %v9283_v62 = vpack.c.bf16 %v6036_v23, %v9282_v32  ;;  %1093 = vmatprep.mubr.f32.mxu1 %v9284_v5  ;;  %9286 = vst [vmem:[#allocation8_spill] sm:$0xff] %v6548_v55  ;;  %9288 = vst [vmem:[#allocation26_spill] sm:$0xff] %v6553_v45  ;;  %4959 = vmatpush3.bf16.msra.mxu1 %v5786_v15  ;;  %v9291_v23 = vld [vmem:[#allocation9_spill] sm:$0xff]  ;;  %v9292_v32 = vand.u32 4294901760, %v6471_v33  ;;  %v9306_v24 = vand.u32 4294901760, %v6553_v45 }
  0xad   :  { %9280 = vst [vmem:[#allocation49_spill] sm:$0xff] %v6527_v48  ;;  %v6559_v41 = vpack.c.bf16 %v9289_v35, %v8952_v28  ;;  %4961 = vmatprep.subr.bf16.mxu1 %v5843_v59  ;;  %v9296_v35 = vand.u32 4294901760, %v6495_v54  ;;  %v9300_v59 = vld [vmem:[#allocation10_spill] sm:$0xff] }
  0xae   :  { %4887 = vmatpush3.bf16.msra.mxu0 %v9283_v62  ;;  %v6566_v10 = vsub.f32 %v6471_v33, %v9292_v32  ;;  %v9294_v62 = vand.u32 4294901760, %v6476_v53  ;;  %v1357_v39 = vsub.f32 %v6553_v45, %v9306_v24  ;;  %v6646_v24 = vld [vmem:[%s8884_s1 + $0x128] sm:$0xff] }
  0xaf   :  { %9290 = vst [vmem:[#allocation50_spill] sm:$0xff] %v6559_v41  ;;  %4921 = vmatprep.subr.bf16.mxu0 %v9291_v23  ;;  %v6578_v15 = vsub.f32 %v6495_v54, %v9296_v35  ;;  %v9298_v23 = vand.u32 4294901760, %v6509_v18  ;;  %v9302_v35 = vand.u32 4294901760, %v6534_v63 }
  0xb0   :  { %9293 = vst [vmem:[#allocation9_spill] sm:$0xff] %v6566_v10  ;;  %v6571_v0 = vsub.f32 %v6476_v53, %v9294_v62  ;;  %v6589_v62 = vld [vmem:[%s8884_s1 + $0x118] sm:$0xff]  ;;  %4963 = vmatpush3.bf16.msra.mxu1 %v5876_v52 }
  0xb1   :  { %9297 = vst [vmem:[#allocation52_spill] sm:$0xff] %v6578_v15  ;;  %688 = vmatmul.mubr.f32.vlgmr.msra.gmra.mrb[4].mxu0 %v6217_v31  ;;  %v6584_v32 = vsub.f32 %v6509_v18, %v9298_v23  ;;  %v6598_v31 = vld [vmem:[%s8884_s1 + $0x1a0] sm:$0xff]  ;;  %v6603_v23 = vld [vmem:[%s8884_s1 + $0x1a8] sm:$0xff]  ;;  %v6612_v28 = vsub.f32 %v6534_v63, %v9302_v35  ;;  %4965 = vmatprep.subr.bf16.mxu1 %v5883_v42  ;;  %v9305_v35 = vand.u32 4294901760, %v6548_v55 }
  0xb2   :  { %9295 = vst [vmem:[#allocation51_spill] sm:$0xff] %v6571_v0  ;;  %694 = vmatprep.mubr.f32.mxu0 %v6238_v50  ;;  %4923 = vmatpush3.bf16.msra.mxu0 %v9300_v59  ;;  %v9304_v59 = vld [vmem:[#allocation12_spill] sm:$0xff]  ;;  %v9307_v50 = vld [vmem:[#allocation13_spill] sm:$0xff]  ;;  %v9314_v17 = vand.u32 4294901760, %v6598_v31 }
  0xb3   :  { %9299 = vst [vmem:[#allocation53_spill] sm:$0xff] %v6584_v32  ;;  %4925 = vmatprep.subr.bf16.mxu0 %v9301_v25  ;;  %9303 = vst [vmem:[#allocation10_spill] sm:$0xff] %v6612_v28  ;;  %v1350_v42 = vsub.f32 %v6548_v55, %v9305_v35  ;;  %v9309_v25 = vand.u32 4294901760, %v6571_v0  ;;  %v9313_v41 = vand.u32 4294901760, %v6584_v32 }
  0xb4   :  { %4967 = vmatpush3.bf16.msra.mxu1 %v5909_v2  ;;  %v6651_v2 = vld [vmem:[%s8884_s1 + $0x1b0] sm:$0xff]  ;;  %v6668_v61 = vsub.f32 %v6598_v31, %v9314_v17 }
  0xb5   :  { %697 = vmatmul.mubr.f32.gmra.mrb[6].mxu0 %v6241_v56  ;;  %v6632_v56 = vld [vmem:[%s8884_s1 + $0x120] sm:$0xff]  ;;  %v1245_v35 = vsub.f32 %v6571_v0, %v9309_v25  ;;  %4969 = vmatprep.subr.bf16.mxu1 %v5958_v8  ;;  %v9311_v25 = vand.u32 4294901760, %v6589_v62  ;;  %v1371_v48 = vsub.f32 %v6584_v32, %v9313_v41  ;;  %v9316_v8 = vand.u32 4294901760, %v6603_v23 }
  0xb6   :  { %4927 = vmatpush3.bf16.msra.mxu0 %v9304_v59  ;;  %982 = vmatprep.mubr.f32.mxu0 %v9284_v5  ;;  %v9308_v59 = vand.u32 4294901760, %v6566_v10  ;;  %9315 = vst [vmem:[#allocation12_spill] sm:$0xff] %v6668_v61  ;;  %v1351_v41 = vand.u32 4294901760, %v1350_v42  ;;  %v1358_v32 = vand.u32 4294901760, %v1357_v39  ;;  %v8971_v17 = vand.u32 4294901760, %v6651_v2  ;;  %v9319_v0 = vld [vmem:[#allocation15_spill] sm:$0xff] }
  0xb7   :  { %4929 = vmatprep.subr.bf16.mxu0 %v9307_v50  ;;  %v9310_v50 = vand.u32 4294901760, %v6578_v15  ;;  %v6660_v52 = vsub.f32 %v6589_v62, %v9311_v25  ;;  %v6673_v58 = vsub.f32 %v6603_v23, %v9316_v8  ;;  %v6679_v25 = vld [vmem:[%s8884_s1 + $0x1b8] sm:$0xff]  ;;  %v6714_v42 = vld [vmem:[%s8884_s1 + $0x1c0] sm:$0xff]  ;;  %v6719_v39 = vld [vmem:[%s8884_s1 + $0x1c8] sm:$0xff] }
  0xb8   :  { %v1238_v5 = vsub.f32 %v6566_v10, %v9308_v59  ;;  %4971 = vmatpush3.bf16.msra.mxu1 %v9245_v6  ;;  %v1246_v10 = vand.u32 4294901760, %v1245_v35  ;;  %v6697_v6 = vld [vmem:[%s8884_s1 + $0x130] sm:$0xff]  ;;  %v5016_v35 = vpack.c.bf16 %v1358_v32, %v1351_v41  ;;  %v9333_v32 = vand.u32 4294901760, %v6668_v61 }
  0xb9   :  { %v1364_v59 = vsub.f32 %v6578_v15, %v9310_v50  ;;  %9312 = vst [vmem:[#allocation11_spill] sm:$0xff] %v6660_v52  ;;  %9317 = vst [vmem:[#allocation13_spill] sm:$0xff] %v6673_v58  ;;  %v8972_v15 = vand.u32 4294901760, %v6646_v24  ;;  %v9320_v50 = vand.u32 4294901760, %v6612_v28  ;;  %4973 = vmatprep.subr.bf16.mxu1 %v9249_v13  ;;  %v6763_v41 = vld [vmem:[%s8884_s1 + $0x1d0] sm:$0xff]  ;;  %v9340_v22 = vand.u32 4294901760, %v6714_v42 }
  0xba   :  { %4931 = vmatpush3.bf16.msra.mxu0 %v9318_v12  ;;  %v1239_v8 = vand.u32 4294901760, %v1238_v5  ;;  %v1372_v5 = vand.u32 4294901760, %v1371_v48  ;;  %v9323_v48 = vld [vmem:[#allocation16_spill] sm:$0xff]  ;;  %9331 = vst [vmem:[#allocation55_spill] sm:$0xff] %v6763_v41 }
  0xbb   :  { %4933 = vmatprep.subr.bf16.mxu0 %v9319_v0  ;;  %v6689_v45 = vsub.f32 %v6612_v28, %v9320_v50  ;;  %v1365_v12 = vand.u32 4294901760, %v1364_v59  ;;  %v6702_v0 = vld [vmem:[%s8884_s1 + $0x138] sm:$0xff]  ;;  %v9321_v59 = vand.u32 4294901760, %v6632_v56  ;;  %v6725_v13 = vsub.f32 %v6646_v24, %v8972_v15  ;;  %v9326_v28 = vld [vmem:[#allocation17_spill] sm:$0xff] }
  0xbc   :  { %4975 = vmatpush3.bf16.msra.mxu1 %v9255_v19  ;;  %v6734_v55 = vpack.c.bf16 %v1246_v10, %v1239_v8  ;;  %v9328_v19 = vand.u32 4294901760, %v6660_v52  ;;  %v9338_v15 = vand.u32 4294901760, %v6702_v0 }
  0xbd   :  { %v6709_v50 = vsub.f32 %v6632_v56, %v9321_v59  ;;  %9324 = vst [vmem:[#allocation15_spill] sm:$0xff] %v6725_v13  ;;  %v6730_v59 = vsub.f32 %v6651_v2, %v8971_v17  ;;  %v1253_v9 = vand.u32 4294901760, %v6689_v45  ;;  %v6747_v17 = vld [vmem:[%s8884_s1 + $0x148] sm:$0xff]  ;;  %4977 = vmatprep.subr.bf16.mxu1 %v6041_v43  ;;  %v9329_v45 = vand.u32 4294901760, %v6679_v25  ;;  %v6768_v43 = vld [vmem:[%s8884_s1 + $0x1d8] sm:$0xff] }
  0xbe   :  { %4935 = vmatpush3.bf16.msra.mxu0 %v9323_v48  ;;  %v6742_v48 = vld [vmem:[%s8884_s1 + $0x140] sm:$0xff]  ;;  %9327 = vst [vmem:[#allocation17_spill] sm:$0xff] %v6747_v17  ;;  %9332 = vst [vmem:[#allocation56_spill] sm:$0xff] %v6768_v43 }
  0xbf   :  { %9322 = vst [vmem:[#allocation14_spill] sm:$0xff] %v6709_v50  ;;  %9325 = vst [vmem:[#allocation16_spill] sm:$0xff] %v6730_v59  ;;  %4937 = vmatprep.subr.bf16.mxu0 %v9326_v28  ;;  %v1259_v28 = vsub.f32 %v6660_v52, %v9328_v19  ;;  %v6756_v10 = vsub.f32 %v6679_v25, %v9329_v45  ;;  %v5020_v19 = vpack.c.bf16 %v1372_v5, %v1365_v12  ;;  %v9336_v5 = vld [vmem:[#allocation19_spill] sm:$0xff]  ;;  %v9339_v12 = vld [vmem:[#allocation25_spill] sm:$0xff] }
  0xc0   :  { %v1378_v45 = vsub.f32 %v6668_v61, %v9333_v32  ;;  %v9334_v52 = vand.u32 4294901760, %v6673_v58  ;;  %4979 = vmatpush3.bf16.msra.mxu1 %v6049_v27  ;;  %v9337_v32 = vand.u32 4294901760, %v6697_v6  ;;  %v6798_v27 = vand.u32 4294901760, %v9339_v12 }
  0xc1   :  { %9330 = vst [vmem:[#allocation54_spill] sm:$0xff] %v6756_v10  ;;  %4981 = vmatprep.subr.bf16.mxu1 %v6054_v47  ;;  %v1260_v3 = vand.u32 4294901760, %v1259_v28  ;;  %v9342_v47 = vand.u32 4294901760, %v6709_v50 }
  0xc2   :  { %v1385_v8 = vsub.f32 %v6673_v58, %v9334_v52  ;;  %4939 = vmatpush3.bf16.msra.mxu0 %v9335_v20  ;;  %v6787_v52 = vsub.f32 %v6697_v6, %v9337_v32  ;;  %v6792_v20 = vsub.f32 %v6702_v0, %v9338_v15  ;;  %v6804_v32 = vsub.f32 %v6714_v42, %v9340_v22 }
  0xc3   :  { %4941 = vmatprep.subr.bf16.mxu0 %v9336_v5  ;;  %v9341_v58 = vand.u32 4294901760, %v6719_v39  ;;  %v1379_v61 = vand.u32 4294901760, %v1378_v45  ;;  %v1266_v14 = vsub.f32 %v6709_v50, %v9342_v47  ;;  %v9344_v5 = vand.u32 4294901760, %v6725_v13 }
  0xc4   :  { %v1386_v36 = vand.u32 4294901760, %v1385_v8  ;;  %v9345_v22 = vand.u32 4294901760, %v6730_v59  ;;  %v9347_v8 = vand.u32 4294901760, %v6747_v17  ;;  %4983 = vmatpush3.bf16.msra.mxu1 %v6056_v1  ;;  %v9353_v50 = vand.u32 4294901760, %v6455_v57 }
  0xc5   :  { %v6809_v15 = vsub.f32 %v6719_v39, %v9341_v58  ;;  %v1273_v4 = vsub.f32 %v6725_v13, %v9344_v5  ;;  %v9346_v58 = vand.u32 4294901760, %v6742_v48  ;;  %5017 = vmatprep.subr.bf16.mxu1 %v5016_v35 }
  0xc6   :  { %4943 = vmatpush3.bf16.msra.mxu0 %v9343_v40  ;;  %v1392_v30 = vsub.f32 %v6730_v59, %v9345_v22  ;;  %v6829_v45 = vsub.f32 %v6747_v17, %v9347_v8  ;;  %v9348_v40 = vld [vmem:[#allocation21_spill] sm:$0xff]  ;;  %v9349_v22 = vand.u32 4294901760, %v6763_v41  ;;  %v9352_v8 = vand.u32 4294901760, %v6756_v10 }
  0xc7   :  { %v6824_v28 = vsub.f32 %v6742_v48, %v9346_v58  ;;  %4945 = vmatprep.subr.bf16.mxu0 %v9348_v40  ;;  %v9350_v58 = vand.u32 4294901760, %v6768_v43  ;;  %v6850_v40 = vsub.f32 %v9339_v12, %v6798_v27  ;;  %v8999_v5 = vand.u32 4294901760, %v6809_v15 }
  0xc8   :  { %v6838_v59 = vsub.f32 %v6763_v41, %v9349_v22  ;;  %v1399_v1 = vsub.f32 %v6756_v10, %v9352_v8  ;;  %v5022_v22 = vpack.c.bf16 %v1260_v3, %v1253_v9  ;;  %v5024_v35 = vpack.c.bf16 %v1386_v36, %v1379_v61  ;;  %v9355_v41 = vld [vmem:[#allocation27_spill] sm:$0xff]  ;;  %v9356_v8 = vld [vmem:[#allocation22_spill] sm:$0xff] }
  0xc9   :  { %v6843_v13 = vsub.f32 %v6768_v43, %v9350_v58  ;;  %v6858_v58 = vpack.c.bf16 %v9354_v26, %v9353_v50  ;;  %v1267_v43 = vand.u32 4294901760, %v1266_v14  ;;  %1095 = vmatmul.mubr.f32.vlgmr.msra.gmra.mrb[8].mxu1 %v9355_v41  ;;  %v1274_v10 = vand.u32 4294901760, %v1273_v4  ;;  %v9359_v4 = vld [vmem:[#allocation23_spill] sm:$0xff] }
  0xca   :  { %4947 = vmatpush3.bf16.msra.mxu0 %v9356_v8  ;;  %v1393_v12 = vand.u32 4294901760, %v1392_v30  ;;  %v9003_v17 = vand.u32 4294901760, %v6824_v28  ;;  %v9002_v47 = vand.u32 4294901760, %v6829_v45  ;;  %1100 = vmatprep.mubr.f32.mxu1 %v6223_v16  ;;  %v9357_v3 = vand.u32 4294901760, %v6787_v52 }
  0xcb   :  { %9351 = vst [vmem:[#allocation18_spill] sm:$0xff] %v6843_v13  ;;  %5019 = vmatpush3.bf16.msra.mxu1 %v6734_v55  ;;  %v9358_v14 = vand.u32 4294901760, %v6792_v20  ;;  %v9001_v57 = vand.u32 4294901760, %v6838_v59  ;;  %v9000_v30 = vand.u32 4294901760, %v6843_v13  ;;  %4949 = vmatprep.subr.bf16.mxu0 %v9359_v4  ;;  %v1400_v9 = vand.u32 4294901760, %v1399_v1 }
  0xcc   :  { %v1280_v26 = vsub.f32 %v6787_v52, %v9357_v3  ;;  %5021 = vmatprep.subr.bf16.mxu1 %v5020_v19  ;;  %v9360_v61 = vand.u32 4294901760, %v6804_v32  ;;  %v1413_v50 = vsub.f32 %v6809_v15, %v8999_v5  ;;  %v9361_v8 = vand.u32 4294901760, %v6471_v33 }
  0xcd   :  { %v1287_v36 = vsub.f32 %v6792_v20, %v9358_v14  ;;  %v9362_v3 = vand.u32 4294901760, %v6476_v53  ;;  %v9363_v4 = vand.u32 4294901760, %v6495_v54  ;;  %v9364_v19 = vand.u32 4294901760, %v6509_v18  ;;  %1102 = vmatmul.mubr.f32.gmra.mrb[10].mxu1 %v6225_v38 }
  0xce   :  { %v1406_v55 = vsub.f32 %v6804_v32, %v9360_v61  ;;  %4951 = vmatpush3.bf16.msra.mxu0 %v9365_v37  ;;  %v5026_v61 = vpack.c.bf16 %v1274_v10, %v1267_v43  ;;  %v1294_v5 = vsub.f32 %v6824_v28, %v9003_v17  ;;  %v1301_v33 = vsub.f32 %v6829_v45, %v9002_v47 }
  0xcf   :  { %v6886_v14 = vpack.c.bf16 %v9362_v3, %v9361_v8  ;;  %v6892_v1 = vpack.c.bf16 %v9364_v19, %v9363_v4  ;;  %5023 = vmatpush3.bf16.msra.mxu1 %v5022_v22  ;;  %1459 = vmatprep.mubr.f32.mxu1 %v6798_v27  ;;  %v1281_v54 = vand.u32 4294901760, %v1280_v26  ;;  %v1288_v18 = vand.u32 4294901760, %v1287_v36 }
  0xd0   :  { %v1420_v53 = vsub.f32 %v6838_v59, %v9001_v57  ;;  %v1427_v10 = vsub.f32 %v6843_v13, %v9000_v30  ;;  %4985 = vmatprep.subr.bf16.mxu0 %v6858_v58  ;;  %5025 = vmatprep.subr.bf16.mxu1 %v5024_v35  ;;  %v5028_v43 = vpack.c.bf16 %v1400_v9, %v1393_v12  ;;  %v9366_v37 = vand.u32 4294901760, %v6850_v40 }
  0xd1   :  { %v1407_v8 = vand.u32 4294901760, %v1406_v55  ;;  %v1414_v3 = vand.u32 4294901760, %v1413_v50  ;;  %984 = vmatmul.mubr.f32.vlgmr.msra.gmra.mrb[8].mxu0 %v9355_v41  ;;  %v9367_v26 = vand.u32 4294901760, %v6534_v63  ;;  %v9368_v36 = vand.u32 4294901760, %v6589_v62 }
  0xd2   :  { %v1206_v22 = vsub.f32 %v6850_v40, %v9366_v37  ;;  %989 = vmatprep.mubr.f32.mxu0 %v6223_v16  ;;  %4987 = vmatpush3.bf16.msra.mxu0 %v6886_v14  ;;  %v1295_v35 = vand.u32 4294901760, %v1294_v5  ;;  %v1302_v12 = vand.u32 4294901760, %v1301_v33  ;;  %v9369_v9 = vand.u32 4294901760, %v6355_v21 }
  0xd3   :  { %v6918_v4 = vpack.c.bf16 %v9368_v36, %v9367_v26  ;;  %v9370_v55 = vand.u32 4294901760, %v6360_v34  ;;  %5027 = vmatpush3.bf16.msra.mxu1 %v5026_v61  ;;  %4989 = vmatprep.subr.bf16.mxu0 %v6892_v1  ;;  %v5030_v63 = vpack.c.bf16 %v1288_v18, %v1281_v54  ;;  %v9371_v62 = vand.u32 4294901760, %v6598_v31 }
  0xd4   :  { %v1308_v19 = vsub.f32 %v6355_v21, %v9369_v9  ;;  %v9372_v16 = vand.u32 4294901760, %v6603_v23  ;;  %v1421_v5 = vand.u32 4294901760, %v1420_v53  ;;  %v1428_v33 = vand.u32 4294901760, %v1427_v10  ;;  %5029 = vmatprep.subr.bf16.mxu1 %v5028_v43 }
  0xd5   :  { %v1315_v41 = vsub.f32 %v6360_v34, %v9370_v55  ;;  %v1207_v37 = vand.u32 4294901760, %v1206_v22  ;;  %v5032_v26 = vpack.c.bf16 %v1414_v3, %v1407_v8  ;;  %v9373_v36 = vand.u32 4294901760, %v6385_v29  ;;  %991 = vmatmul.mubr.f32.gmra.mrb[10].mxu0 %v6225_v38 }
  0xd6   :  { %v6933_v50 = vpack.c.bf16 %v9372_v16, %v9371_v62  ;;  %v9374_v61 = vand.u32 4294901760, %v6390_v11  ;;  %v9375_v31 = vand.u32 4294901760, %v6632_v56  ;;  %v9376_v23 = vand.u32 4294901760, %v6646_v24  ;;  %4991 = vmatpush3.bf16.msra.mxu0 %v6918_v4 }
  0xd7   :  { %v1434_v9 = vsub.f32 %v6385_v29, %v9373_v36  ;;  %1208 = vmatprep.mubr.f32.mxu0 %v1207_v37  ;;  %v5034_v18 = vpack.c.bf16 %v1302_v12, %v1295_v35  ;;  %v9378_v53 = vand.u32 4294901760, %v6651_v2  ;;  %v9379_v10 = vand.u32 4294901760, %v6679_v25  ;;  %5031 = vmatpush3.bf16.msra.mxu1 %v5030_v63 }
  0xd8   :  { %v1441_v55 = vsub.f32 %v6390_v11, %v9374_v61  ;;  %v6946_v54 = vpack.c.bf16 %v9376_v23, %v9375_v31  ;;  %v1309_v22 = vand.u32 4294901760, %v1308_v19  ;;  %v1316_v8 = vand.u32 4294901760, %v1315_v41  ;;  %4993 = vmatprep.subr.bf16.mxu0 %v6933_v50  ;;  %5033 = vmatprep.subr.bf16.mxu1 %v5032_v26 }
  0xd9   :  { %v6953_v43 = vpack.c.bf16 %v9379_v10, %v9378_v53  ;;  %v5036_v38 = vpack.c.bf16 %v1428_v33, %v1421_v5  ;;  %v9381_v56 = vand.u32 4294901760, %v6417_v51  ;;  %v9382_v3 = vand.u32 4294901760, %v6422_v49 }
  0xda   :  { %9377 = vst [vmem:[#allocation19_spill] sm:$0xff] %v6946_v54  ;;  %v1435_v2 = vand.u32 4294901760, %v1434_v9  ;;  %v1442_v12 = vand.u32 4294901760, %v1441_v55  ;;  %v9383_v25 = vand.u32 4294901760, %v6437_v7  ;;  %v9384_v41 = vand.u32 4294901760, %v6442_v60  ;;  %4995 = vmatpush3.bf16.msra.mxu0 %v6946_v54 }
  0xdb   :  { %9380 = vst [vmem:[#allocation25_spill] sm:$0xff] %v6953_v43  ;;  %v1322_v24 = vsub.f32 %v6417_v51, %v9381_v56  ;;  %v1329_v35 = vsub.f32 %v6422_v49, %v9382_v3  ;;  %v9385_v62 = vand.u32 4294901760, %v6697_v6  ;;  %v9386_v16 = vand.u32 4294901760, %v6702_v0  ;;  %5035 = vmatpush3.bf16.msra.mxu1 %v5034_v18  ;;  %4997 = vmatprep.subr.bf16.mxu0 %v6953_v43  ;;  %v9393_v18 = vld [vmem:[#allocation17_spill] sm:$0xff] }
  0xdc   :  { %v1448_v19 = vsub.f32 %v6437_v7, %v9383_v25  ;;  %v1455_v63 = vsub.f32 %v6442_v60, %v9384_v41  ;;  %v5038_v33 = vpack.c.bf16 %v1316_v8, %v1309_v22  ;;  %v9388_v37 = vand.u32 4294901760, %v6714_v42  ;;  %5037 = vmatprep.subr.bf16.mxu1 %v5036_v38  ;;  %v9395_v8 = vld [vmem:[#allocation55_spill] sm:$0xff]  ;;  %v9399_v25 = vld [vmem:[#allocation28_spill] sm:$0xff]  ;;  %v9401_v41 = vld [vmem:[#allocation29_spill] sm:$0xff] }
  0xdd   :  { %v6973_v5 = vpack.c.bf16 %v9386_v16, %v9385_v62  ;;  %v9389_v26 = vand.u32 4294901760, %v6719_v39  ;;  %v1323_v9 = vand.u32 4294901760, %v1322_v24  ;;  %v1330_v61 = vand.u32 4294901760, %v1329_v35  ;;  %v9397_v24 = vld [vmem:[#allocation56_spill] sm:$0xff]  ;;  %v9403_v62 = vld [vmem:[#allocation35_spill] sm:$0xff] }
  0xde   :  { %v9390_v55 = vand.u32 4294901760, %v6483_v46  ;;  %v9391_v0 = vand.u32 4294901760, %v6488_v44  ;;  %v5040_v23 = vpack.c.bf16 %v1442_v12, %v1435_v2  ;;  %v1449_v42 = vand.u32 4294901760, %v1448_v19 }
  0xdf   :  { %9387 = vst [vmem:[#allocation20_spill] sm:$0xff] %v6973_v5  ;;  %v6979_v36 = vpack.c.bf16 %v9389_v26, %v9388_v37  ;;  %v1456_v53 = vand.u32 4294901760, %v1455_v63  ;;  %4999 = vmatpush3.bf16.msra.mxu0 %v6973_v5  ;;  %v9392_v39 = vand.u32 4294901760, %v6742_v48  ;;  %v9394_v10 = vand.u32 4294901760, %v9393_v18  ;;  %5039 = vmatpush3.bf16.msra.mxu1 %v5038_v33  ;;  %v9405_v37 = vld [vmem:[#allocation36_spill] sm:$0xff] }
  0xe0   :  { %v1336_v6 = vsub.f32 %v6483_v46, %v9390_v55  ;;  %v1343_v31 = vsub.f32 %v6488_v44, %v9391_v0  ;;  %v9396_v56 = vand.u32 4294901760, %v9395_v8  ;;  %v9398_v3 = vand.u32 4294901760, %v9397_v24  ;;  %5041 = vmatprep.subr.bf16.mxu1 %v5040_v23  ;;  %v9414_v18 = vld [vmem:[#allocation40_spill] sm:$0xff]  ;;  %v9416_v8 = vld [vmem:[#allocation41_spill] sm:$0xff] }
  0xe1   :  { %v6993_v22 = vpack.c.bf16 %v9394_v10, %v9392_v39  ;;  %5001 = vmatprep.subr.bf16.mxu0 %v6979_v36  ;;  %v5042_v38 = vpack.c.bf16 %v1330_v61, %v1323_v9  ;;  %v7003_v19 = vand.u32 4294901760, %v9399_v25  ;;  %v5044_v48 = vpack.c.bf16 %v1456_v53, %v1449_v42  ;;  %v9407_v61 = vld [vmem:[#allocation5_spill] sm:$0xff]  ;;  %v9412_v42 = vld [vmem:[#allocation30_spill] sm:$0xff] }
  0xe2   :  { %v6999_v35 = vpack.c.bf16 %v9398_v3, %v9396_v56  ;;  %v1337_v2 = vand.u32 4294901760, %v1336_v6  ;;  %v1344_v12 = vand.u32 4294901760, %v1343_v31  ;;  %v7006_v63 = vand.u32 4294901760, %v9401_v41  ;;  %v9409_v6 = vld [vmem:[#allocation38_spill] sm:$0xff] }
  0xe3   :  { %9400 = vst [vmem:[#allocation21_spill] sm:$0xff] %v7003_v19  ;;  %5003 = vmatpush3.bf16.msra.mxu0 %v6993_v22  ;;  %v9404_v16 = vand.u32 4294901760, %v9403_v62  ;;  %v9406_v26 = vand.u32 4294901760, %v9405_v37  ;;  %5043 = vmatpush3.bf16.msra.mxu1 %v5042_v38  ;;  %v9408_v55 = vand.u32 4294901760, %v9407_v61  ;;  %v9410_v0 = vand.u32 4294901760, %v9409_v6  ;;  %v7070_v6 = vld [vmem:[%s8884_s1 + $0x2a8] sm:$0xff] }
  0xe4   :  { %9402 = vst [vmem:[#allocation27_spill] sm:$0xff] %v7006_v63  ;;  %5005 = vmatprep.subr.bf16.mxu0 %v6999_v35  ;;  %v5046_v9 = vpack.c.bf16 %v1344_v12, %v1337_v2  ;;  %v7024_v23 = vsub.f32 %v9399_v25, %v7003_v19  ;;  %v7027_v53 = vand.u32 4294901760, %v9412_v42  ;;  %5045 = vmatprep.subr.bf16.mxu1 %v5044_v48  ;;  %v9415_v10 = vand.u32 4294901760, %v9414_v18  ;;  %v9418_v2 = vld [vmem:[#allocation7_spill] sm:$0xff]  ;;  %v9420_v25 = vld [vmem:[#allocation42_spill] sm:$0xff] }
  0xe5   :  { %v7013_v33 = vpack.c.bf16 %v9406_v26, %v9404_v16  ;;  %v7020_v31 = vpack.c.bf16 %v9410_v0, %v9408_v55  ;;  %v7031_v39 = vsub.f32 %v9401_v41, %v7006_v63  ;;  %v9417_v56 = vand.u32 4294901760, %v9416_v8  ;;  %v9422_v16 = vld [vmem:[#allocation44_spill] sm:$0xff]  ;;  %v9424_v26 = vld [vmem:[#allocation45_spill] sm:$0xff]  ;;  %v7065_v55 = vld [vmem:[%s8884_s1 + $0x2a0] sm:$0xff]  ;;  %9427 = vst [vmem:[#allocation17_spill] sm:$0xff] %v7070_v6 }
  0xe6   :  { %9413 = vst [vmem:[#allocation23_spill] sm:$0xff] %v7027_v53  ;;  %v9005_v3 = vand.u32 4294901760, %v7024_v23  ;;  %v7044_v38 = vsub.f32 %v9412_v42, %v7027_v53  ;;  %v9419_v12 = vand.u32 4294901760, %v9418_v2  ;;  %v9421_v48 = vand.u32 4294901760, %v9420_v25  ;;  %9426 = vst [vmem:[#allocation24_spill] sm:$0xff] %v7065_v55  ;;  %v7081_v18 = vld [vmem:[%s8884_s1 + $0x220] sm:$0xff] }
  0xe7   :  { %9411 = vst [vmem:[#allocation22_spill] sm:$0xff] %v7020_v31  ;;  %5007 = vmatpush3.bf16.msra.mxu0 %v7013_v33  ;;  %v7038_v24 = vpack.c.bf16 %v9417_v56, %v9415_v10  ;;  %5047 = vmatpush3.bf16.msra.mxu1 %v5046_v9  ;;  %v9004_v62 = vand.u32 4294901760, %v7031_v39  ;;  %v9423_v37 = vand.u32 4294901760, %v9422_v16  ;;  %v9425_v9 = vand.u32 4294901760, %v9424_v26  ;;  %9428 = vst [vmem:[#allocation55_spill] sm:$0xff] %v7081_v18  ;;  %v7086_v10 = vld [vmem:[%s8884_s1 + $0x228] sm:$0xff] }
  0xe8   :  { %5009 = vmatprep.subr.bf16.mxu0 %v7020_v31  ;;  %5081 = vmatprep.subr.bf16.mxu1 %v6858_v58  ;;  %v7051_v41 = vpack.c.bf16 %v9421_v48, %v9419_v12  ;;  %v1212_v0 = vsub.f32 %v7024_v23, %v9005_v3  ;;  %v9006_v42 = vand.u32 4294901760, %v7044_v38  ;;  %9429 = vst [vmem:[#allocation56_spill] sm:$0xff] %v7086_v10  ;;  %v9430_v8 = vld [vmem:[#allocation8_spill] sm:$0xff]  ;;  %v9431_v56 = vld [vmem:[#allocation26_spill] sm:$0xff]  ;;  %v9432_v16 = vld [vmem:[#allocation9_spill] sm:$0xff]  ;;  %v9434_v57 = vand.u32 4294901760, %v6850_v40 }
  0xe9   :  { %v7060_v61 = vpack.c.bf16 %v9425_v9, %v9423_v37  ;;  %v5048_v2 = vpack.c.bf16 %v9431_v56, %v9430_v8  ;;  %v1221_v12 = vsub.f32 %v7031_v39, %v9004_v62  ;;  %v9433_v37 = vld [vmem:[#allocation51_spill] sm:$0xff]  ;;  %v9435_v62 = vld [vmem:[#allocation52_spill] sm:$0xff]  ;;  %v9436_v3 = vld [vmem:[#allocation53_spill] sm:$0xff]  ;;  %v9437_v30 = vand.u32 4294901760, %v7065_v55 }
  0xea   :  { %1461 = vmatmul.mubr.f32.vlgmr.msra.gmra.mrb[12].mxu1 %v7003_v19  ;;  %v5050_v26 = vpack.c.bf16 %v9433_v37, %v9432_v16  ;;  %v1213_v47 = vand.u32 4294901760, %v1212_v0  ;;  %v1227_v17 = vsub.f32 %v7044_v38, %v9006_v42  ;;  %v5052_v48 = vpack.c.bf16 %v9436_v3, %v9435_v62  ;;  %v9441_v42 = vld [vmem:[#allocation10_spill] sm:$0xff] }
  0xeb   :  { %5011 = vmatpush3.bf16.msra.mxu0 %v7038_v24  ;;  %1466 = vmatprep.mubr.f32.mxu1 %v7006_v63  ;;  %v1222_v25 = vand.u32 4294901760, %v1221_v12  ;;  %v7115_v9 = vsub.f32 %v7065_v55, %v9437_v30 }
  0xec   :  { %5083 = vmatpush3.bf16.msra.mxu1 %v6886_v14  ;;  %5013 = vmatprep.subr.bf16.mxu0 %v7051_v41  ;;  %v1228_v55 = vand.u32 4294901760, %v1227_v17  ;;  %v7148_v17 = vld [vmem:[%s8884_s1 + $0x2c8] sm:$0xff] }
  0xed   :  { %5085 = vmatprep.subr.bf16.mxu1 %v6892_v1  ;;  %9438 = vst [vmem:[#allocation28_spill] sm:$0xff] %v7115_v9  ;;  %9450 = vst [vmem:[#allocation38_spill] sm:$0xff] %v7148_v17 }
  0xee   :  { %1468 = vmatmul.mubr.f32.gmra.mrb[14].mxu1 %v7027_v53  ;;  %v9442_v53 = vld [vmem:[#allocation11_spill] sm:$0xff] }
  0xef   :  { %5015 = vmatpush3.bf16.msra.mxu0 %v7060_v61  ;;  %1719 = vmatprep.mubr.f32.mxu1 %v9434_v57  ;;  %v9439_v57 = vand.u32 4294901760, %v7070_v6  ;;  %v5054_v63 = vpack.c.bf16 %v9442_v53, %v9441_v42  ;;  %v9457_v53 = vand.u32 4294901760, %v7115_v9 }
  0xf0   :  { %5087 = vmatpush3.bf16.msra.mxu1 %v6918_v4  ;;  %5049 = vmatprep.subr.bf16.mxu0 %v5048_v2  ;;  %v9443_v2 = vand.u32 4294901760, %v7081_v18 }
  0xf1   :  { %5089 = vmatprep.subr.bf16.mxu1 %v6933_v50  ;;  %v7120_v0 = vsub.f32 %v7070_v6, %v9439_v57  ;;  %v9447_v57 = vld [vmem:[#allocation12_spill] sm:$0xff]  ;;  %v7141_v6 = vld [vmem:[%s8884_s1 + $0x2c0] sm:$0xff] }
  0xf2   :  { %1214 = vmatmul.mubr.f32.vlgmr.msra.gmra.mrb[12].mxu0 %v1213_v47  ;;  %v7127_v12 = vsub.f32 %v7081_v18, %v9443_v2  ;;  %v9445_v47 = vand.u32 4294901760, %v7086_v10  ;;  %9449 = vst [vmem:[#allocation5_spill] sm:$0xff] %v7141_v6  ;;  %v9023_v18 = vand.u32 4294901760, %v7148_v17 }
  0xf3   :  { %9440 = vst [vmem:[#allocation29_spill] sm:$0xff] %v7120_v0  ;;  %1223 = vmatprep.mubr.f32.mxu0 %v1222_v25  ;;  %5051 = vmatpush3.bf16.msra.mxu0 %v5050_v26  ;;  %v9448_v25 = vld [vmem:[#allocation13_spill] sm:$0xff] }
  0xf4   :  { %9444 = vst [vmem:[#allocation35_spill] sm:$0xff] %v7127_v12  ;;  %v7132_v30 = vsub.f32 %v7086_v10, %v9445_v47  ;;  %5091 = vmatpush3.bf16.msra.mxu1 %v6946_v54  ;;  %5053 = vmatprep.subr.bf16.mxu0 %v5052_v48  ;;  %v5056_v26 = vpack.c.bf16 %v9448_v25, %v9447_v57  ;;  %v7153_v48 = vld [vmem:[%s8884_s1 + $0x240] sm:$0xff]  ;;  %v7158_v10 = vld [vmem:[%s8884_s1 + $0x248] sm:$0xff]  ;;  %v9456_v25 = vld [vmem:[#allocation54_spill] sm:$0xff] }
  0xf5   :  { %5093 = vmatprep.subr.bf16.mxu1 %v6953_v43  ;;  %9451 = vst [vmem:[#allocation30_spill] sm:$0xff] %v7153_v48  ;;  %9452 = vst [vmem:[#allocation40_spill] sm:$0xff] %v7158_v10  ;;  %v9454_v47 = vld [vmem:[#allocation15_spill] sm:$0xff]  ;;  %v9455_v43 = vld [vmem:[#allocation16_spill] sm:$0xff]  ;;  %v9024_v19 = vand.u32 4294901760, %v7153_v48  ;;  %v5062_v54 = vpack.c.bf16 %v6792_v20, %v6787_v52 }
  0xf6   :  { %9446 = vst [vmem:[#allocation36_spill] sm:$0xff] %v7132_v30  ;;  %1229 = vmatmul.mubr.f32.gmra.mrb[14].mxu0 %v1228_v55  ;;  %v9453_v55 = vld [vmem:[#allocation14_spill] sm:$0xff]  ;;  %v5060_v57 = vpack.c.bf16 %v9456_v25, %v9455_v43  ;;  %v9461_v25 = vand.u32 4294901760, %v7132_v30  ;;  %v5066_v30 = vpack.c.bf16 %v6829_v45, %v6824_v28 }
  0xf7   :  { %5055 = vmatpush3.bf16.msra.mxu0 %v5054_v63  ;;  %1603 = vmatprep.mubr.f32.mxu0 %v6850_v40  ;;  %v5058_v2 = vpack.c.bf16 %v9454_v47, %v9453_v55  ;;  %v9458_v63 = vand.u32 4294901760, %v7120_v0 }
  0xf8   :  { %5095 = vmatpush3.bf16.msra.mxu1 %v6973_v5  ;;  %5057 = vmatprep.subr.bf16.mxu0 %v5056_v26  ;;  %v9460_v26 = vand.u32 4294901760, %v7127_v12  ;;  %v7209_v5 = vsub.f32 %v7148_v17, %v9023_v18  ;;  %v7228_v18 = vld [vmem:[%s8884_s1 + $0x2e0] sm:$0xff]  ;;  %v7261_v17 = vld [vmem:[%s8884_s1 + $0x2f8] sm:$0xff] }
  0xf9   :  { %v7173_v40 = vpack.c.bf16 %v9458_v63, %v9457_v53  ;;  %5097 = vmatprep.subr.bf16.mxu1 %v6979_v36  ;;  %v7190_v53 = vld [vmem:[%s8884_s1 + $0x250] sm:$0xff]  ;;  %v7195_v63 = vld [vmem:[%s8884_s1 + $0x258] sm:$0xff] }
  0xfa   :  { %v7183_v43 = vpack.c.bf16 %v9461_v25, %v9460_v26  ;;  %9463 = vst [vmem:[#allocation42_spill] sm:$0xff] %v7190_v53  ;;  %9464 = vst [vmem:[#allocation44_spill] sm:$0xff] %v7195_v63  ;;  %v5064_v25 = vpack.c.bf16 %v6809_v15, %v6804_v32  ;;  %v9470_v12 = vand.u32 4294901760, %v7195_v63 }
  0xfb   :  { %9459 = vst [vmem:[#allocation41_spill] sm:$0xff] %v7173_v40  ;;  %5059 = vmatpush3.bf16.msra.mxu0 %v5058_v2  ;;  %v9465_v2 = vand.u32 4294901760, %v7141_v6  ;;  %9467 = vst [vmem:[#allocation8_spill] sm:$0xff] %v7209_v5 }
  0xfc   :  { %9462 = vst [vmem:[#allocation7_spill] sm:$0xff] %v7183_v43  ;;  %5099 = vmatpush3.bf16.msra.mxu1 %v6993_v22  ;;  %5061 = vmatprep.subr.bf16.mxu0 %v5060_v57  ;;  %v7214_v43 = vsub.f32 %v7153_v48, %v9024_v19  ;;  %v9468_v57 = vand.u32 4294901760, %v7158_v10  ;;  %v7251_v19 = vld [vmem:[%s8884_s1 + $0x268] sm:$0xff]  ;;  %v7256_v48 = vld [vmem:[%s8884_s1 + $0x2f0] sm:$0xff]  ;;  %v7273_v0 = vsub.f32 %v7195_v63, %v9470_v12  ;;  %v9472_v12 = vand.u32 4294901760, %v7209_v5 }
  0xfd   :  { %v7203_v26 = vsub.f32 %v7141_v6, %v9465_v2  ;;  %5101 = vmatprep.subr.bf16.mxu1 %v6999_v35  ;;  %v7242_v6 = vld [vmem:[%s8884_s1 + $0x260] sm:$0xff]  ;;  %v5072_v63 = vpack.c.bf16 %v6390_v11, %v6385_v29  ;;  %v9477_v11 = vand.u32 4294901760, %v7228_v18 }
  0xfe   :  { %v7219_v40 = vsub.f32 %v7158_v10, %v9468_v57  ;;  %v5068_v57 = vpack.c.bf16 %v6843_v13, %v6838_v59  ;;  %v9469_v10 = vand.u32 4294901760, %v7190_v53  ;;  %v9043_v29 = vand.u32 4294901760, %v7273_v0 }
  0xff   :  { %9466 = vst [vmem:[#allocation45_spill] sm:$0xff] %v7203_v26  ;;  %5063 = vmatpush3.bf16.msra.mxu0 %v5062_v54  ;;  %v7237_v54 = vld [vmem:[%s8884_s1 + $0x2e8] sm:$0xff] }
 0x100   :  { %5103 = vmatpush3.bf16.msra.mxu1 %v7013_v33  ;;  %5065 = vmatprep.subr.bf16.mxu0 %v5064_v25  ;;  %v5070_v25 = vpack.c.bf16 %v6360_v34, %v6355_v21  ;;  %v7268_v2 = vsub.f32 %v7190_v53, %v9469_v10  ;;  %v7281_v21 = vld [vmem:[%s8884_s1 + $0x270] sm:$0xff]  ;;  %v7286_v34 = vld [vmem:[%s8884_s1 + $0x278] sm:$0xff]  ;;  %v9471_v10 = vand.u32 4294901760, %v7203_v26  ;;  %v9475_v13 = vand.u32 4294901760, %v7219_v40 }
 0x101   :  { %5105 = vmatprep.subr.bf16.mxu1 %v7020_v31  ;;  %v9042_v53 = vand.u32 4294901760, %v7251_v19  ;;  %v9478_v5 = vand.u32 4294901760, %v7237_v54 }
 0x102   :  { %v7292_v9 = vpack.c.bf16 %v9472_v12, %v9471_v10  ;;  %v5074_v10 = vpack.c.bf16 %v6422_v49, %v6417_v51  ;;  %v9479_v51 = vand.u32 4294901760, %v7242_v6 }
 0x103   :  { %5067 = vmatpush3.bf16.msra.mxu0 %v5066_v30  ;;  %v9474_v30 = vand.u32 4294901760, %v7214_v43  ;;  %v7321_v26 = vsub.f32 %v7237_v54, %v9478_v5  ;;  %v9481_v5 = vand.u32 4294901760, %v7261_v17 }
 0x104   :  { %9473 = vst [vmem:[#allocation26_spill] sm:$0xff] %v7292_v9  ;;  %5107 = vmatpush3.bf16.msra.mxu1 %v7038_v24  ;;  %5069 = vmatprep.subr.bf16.mxu0 %v5068_v57  ;;  %v7326_v49 = vsub.f32 %v7242_v6, %v9479_v51 }
 0x105   :  { %v7298_v31 = vpack.c.bf16 %v9475_v13, %v9474_v30  ;;  %5109 = vmatprep.subr.bf16.mxu1 %v7051_v41  ;;  %v9044_v13 = vand.u32 4294901760, %v7268_v2  ;;  %v7316_v30 = vsub.f32 %v7228_v18, %v9477_v11  ;;  %v9480_v11 = vand.u32 4294901760, %v7256_v48 }
 0x106   :  { %v7342_v12 = vsub.f32 %v7261_v17, %v9481_v5 }
 0x107   :  { %9476 = vst [vmem:[#allocation9_spill] sm:$0xff] %v7298_v31  ;;  %5071 = vmatpush3.bf16.msra.mxu0 %v5070_v25  ;;  %v7332_v25 = vsub.f32 %v7251_v19, %v9042_v53  ;;  %v7337_v57 = vsub.f32 %v7256_v48, %v9480_v11  ;;  %v7351_v51 = vpack.c.bf16 %v9043_v29, %v9044_v13  ;;  %v9483_v53 = vand.u32 4294901760, %v7281_v21 }
 0x108   :  { %5111 = vmatpush3.bf16.msra.mxu1 %v7060_v61  ;;  %5073 = vmatprep.subr.bf16.mxu0 %v5072_v63  ;;  %v5076_v63 = vpack.c.bf16 %v6442_v60, %v6437_v7  ;;  %v9484_v31 = vand.u32 4294901760, %v7286_v34  ;;  %v5078_v7 = vpack.c.bf16 %v6488_v44, %v6483_v46  ;;  %v9045_v60 = vand.u32 4294901760, %v7316_v30 }
 0x109   :  { %5145 = vmatprep.subr.bf16.mxu1 %v6858_v58  ;;  %9482 = vst [vmem:[#allocation51_spill] sm:$0xff] %v7351_v51  ;;  %v7356_v11 = vsub.f32 %v7281_v21, %v9483_v53  ;;  %v9485_v58 = vand.u32 4294901760, %v7024_v23  ;;  %v9486_v13 = vand.u32 4294901760, %v7031_v39  ;;  %v7380_v53 = vld [vmem:[%s8884_s1 + $0x288] sm:$0xff]  ;;  %v9046_v44 = vand.u32 4294901760, %v7326_v49 }
 0x10a   :  { %v7361_v5 = vsub.f32 %v7286_v34, %v9484_v31  ;;  %v7375_v31 = vld [vmem:[%s8884_s1 + $0x280] sm:$0xff]  ;;  %v9489_v51 = vand.u32 4294901760, %v7321_v26 }
 0x10b   :  { %1723 = vmatmul.mubr.f32.vlgmr.msra.gmra.mrb[16].mxu1 %v9485_v58  ;;  %5075 = vmatpush3.bf16.msra.mxu0 %v5074_v10  ;;  %v9488_v58 = vand.u32 4294901760, %v9431_v56  ;;  %v9047_v46 = vand.u32 4294901760, %v7356_v11  ;;  %v9050_v10 = vand.u32 4294901760, %v7375_v31 }
 0x10c   :  { %1730 = vmatprep.mubr.f32.mxu1 %v9486_v13  ;;  %5147 = vmatpush3.bf16.msra.mxu1 %v6886_v14  ;;  %v9048_v13 = vand.u32 4294901760, %v7342_v12  ;;  %v9487_v14 = vand.u32 4294901760, %v9430_v8  ;;  %v7395_v9 = vpack.c.bf16 %v9489_v51, %v9045_v60  ;;  %v9493_v8 = vand.u32 4294901760, %v7337_v57 }
 0x10d   :  { %5077 = vmatprep.subr.bf16.mxu0 %v5076_v63  ;;  %5149 = vmatprep.subr.bf16.mxu1 %v6892_v1  ;;  %v9491_v63 = vand.u32 4294901760, %v7332_v25  ;;  %v9496_v51 = vand.u32 4294901760, %v9432_v16  ;;  %v9498_v16 = vand.u32 4294901760, %v9435_v62  ;;  %v7453_v62 = vld [vmem:[%s8884_s1 + $0x298] sm:$0xff] }
 0x10e   :  { %v5112_v29 = vpack.c.bf16 %v9488_v58, %v9487_v14  ;;  %9490 = vst [vmem:[#allocation52_spill] sm:$0xff] %v7395_v9  ;;  %v7409_v56 = vpack.c.bf16 %v9048_v13, %v9493_v8  ;;  %v9495_v14 = vand.u32 4294901760, %v7044_v38  ;;  %v9497_v58 = vand.u32 4294901760, %v9433_v37  ;;  %v7427_v8 = vld [vmem:[%s8884_s1 + $0x208] sm:$0xff] }
 0x10f   :  { %v7403_v1 = vpack.c.bf16 %v9491_v63, %v9046_v44  ;;  %5079 = vmatpush3.bf16.msra.mxu0 %v5078_v7  ;;  %v9049_v63 = vand.u32 4294901760, %v7380_v53  ;;  %v7422_v44 = vld [vmem:[%s8884_s1 + $0x200] sm:$0xff]  ;;  %v9499_v37 = vand.u32 4294901760, %v9436_v3  ;;  %v7448_v3 = vld [vmem:[%s8884_s1 + $0x290] sm:$0xff] }
 0x110   :  { %9494 = vst [vmem:[#allocation10_spill] sm:$0xff] %v7409_v56  ;;  %1734 = vmatmul.mubr.f32.gmra.mrb[18].mxu1 %v9495_v14  ;;  %v5114_v60 = vpack.c.bf16 %v9497_v58, %v9496_v51  ;;  %v9500_v14 = vand.u32 4294901760, %v7361_v5  ;;  %5113 = vmatprep.subr.bf16.mxu0 %v5112_v29  ;;  %v9518_v58 = vld [vmem:[#allocation20_spill] sm:$0xff] }
 0x111   :  { %9492 = vst [vmem:[#allocation53_spill] sm:$0xff] %v7403_v1  ;;  %5151 = vmatpush3.bf16.msra.mxu1 %v6918_v4  ;;  %2011 = vmatprep.mubr.f32.mxu1 %v6798_v27  ;;  %v5116_v7 = vpack.c.bf16 %v9499_v37, %v9498_v16  ;;  %v9051_v4 = vand.u32 4294901760, %v7422_v44  ;;  %v7463_v37 = vsub.f32 %v7375_v31, %v9050_v10  ;;  %v9540_v1 = vld [vmem:[#allocation18_spill] sm:$0xff] }
 0x112   :  { %v7439_v51 = vpack.c.bf16 %v9500_v14, %v9047_v46  ;;  %5153 = vmatprep.subr.bf16.mxu1 %v6933_v50  ;;  %1606 = vmatmul.mubr.f32.vlgmr.msra.gmra.mrb[16].mxu0 %v7024_v23  ;;  %v9502_v50 = vand.u32 4294901760, %v9441_v42  ;;  %v9503_v23 = vld [vmem:[#allocation11_spill] sm:$0xff]  ;;  %v7468_v14 = vsub.f32 %v7380_v53, %v9049_v63  ;;  %v7478_v42 = vld [vmem:[%s8884_s1 + $0x218] sm:$0xff]  ;;  %v9512_v63 = vld [vmem:[#allocation25_spill] sm:$0xff]  ;;  %v9541_v9 = vand.u32 4294901760, %v9540_v1 }
 0x113   :  { %1612 = vmatprep.mubr.f32.mxu0 %v7031_v39  ;;  %5115 = vmatpush3.bf16.msra.mxu0 %v5114_v60  ;;  %v9504_v29 = vand.u32 4294901760, %v9503_v23  ;;  %9505 = vst [vmem:[#allocation15_spill] sm:$0xff] %v7463_v37  ;;  %v7473_v39 = vld [vmem:[%s8884_s1 + $0x210] sm:$0xff]  ;;  %v9507_v60 = vld [vmem:[#allocation19_spill] sm:$0xff] }
 0x114   :  { %9501 = vst [vmem:[#allocation14_spill] sm:$0xff] %v7439_v51  ;;  %9506 = vst [vmem:[#allocation11_spill] sm:$0xff] %v7468_v14  ;;  %5117 = vmatprep.subr.bf16.mxu0 %v5116_v7  ;;  %v7492_v51 = vsub.f32 %v7422_v44, %v9051_v4  ;;  %v9514_v7 = vand.u32 4294901760, %v7427_v8  ;;  %v9052_v4 = vand.u32 4294901760, %v7468_v14 }
 0x115   :  { %v5118_v16 = vpack.c.bf16 %v9504_v29, %v9502_v50  ;;  %5155 = vmatpush3.bf16.msra.mxu1 %v9507_v60  ;;  %v9508_v50 = vld [vmem:[#allocation12_spill] sm:$0xff]  ;;  %v9510_v29 = vld [vmem:[#allocation13_spill] sm:$0xff] }
 0x116   :  { %v9509_v23 = vand.u32 4294901760, %v9508_v50  ;;  %v9511_v46 = vand.u32 4294901760, %v9510_v29  ;;  %5157 = vmatprep.subr.bf16.mxu1 %v9512_v63  ;;  %1615 = vmatmul.mubr.f32.gmra.mrb[18].mxu0 %v7044_v38  ;;  %9513 = vst [vmem:[#allocation19_spill] sm:$0xff] %v7492_v51  ;;  %v7497_v60 = vsub.f32 %v7427_v8, %v9514_v7  ;;  %v9516_v50 = vand.u32 4294901760, %v9453_v55  ;;  %v9519_v7 = vld [vmem:[#allocation16_spill] sm:$0xff] }
 0x117   :  { %5119 = vmatpush3.bf16.msra.mxu0 %v5118_v16  ;;  %1900 = vmatprep.mubr.f32.mxu0 %v6798_v27  ;;  %v9517_v38 = vand.u32 4294901760, %v9454_v47  ;;  %v9053_v29 = vand.u32 4294901760, %v7463_v37  ;;  %v9520_v10 = vand.u32 4294901760, %v9519_v7  ;;  %v9523_v27 = vand.u32 4294901760, %v7448_v3 }
 0x118   :  { %v5120_v13 = vpack.c.bf16 %v9511_v46, %v9509_v23  ;;  %9515 = vst [vmem:[#allocation12_spill] sm:$0xff] %v7497_v60  ;;  %v9521_v46 = vld [vmem:[#allocation54_spill] sm:$0xff]  ;;  %v9525_v47 = vand.u32 4294901760, %v7453_v62  ;;  %v9531_v7 = vand.u32 4294901760, %v6787_v52 }
 0x119   :  { %v5122_v23 = vpack.c.bf16 %v9517_v38, %v9516_v50  ;;  %5159 = vmatpush3.bf16.msra.mxu1 %v9518_v58  ;;  %v9522_v56 = vand.u32 4294901760, %v9521_v46  ;;  %v7517_v55 = vsub.f32 %v7448_v3, %v9523_v27  ;;  %v9527_v50 = vand.u32 4294901760, %v7473_v39  ;;  %v7539_v46 = vld [vmem:[%s8884_s1 + $0x2b0] sm:$0xff]  ;;  %v7544_v38 = vld [vmem:[%s8884_s1 + $0x2b8] sm:$0xff] }
 0x11a   :  { %5121 = vmatprep.subr.bf16.mxu0 %v5120_v13  ;;  %5161 = vmatprep.subr.bf16.mxu1 %v6979_v36  ;;  %v7522_v16 = vsub.f32 %v7453_v62, %v9525_v47  ;;  %v9529_v36 = vand.u32 4294901760, %v7478_v42  ;;  %v9532_v27 = vand.u32 4294901760, %v6792_v20  ;;  %v9533_v13 = vand.u32 4294901760, %v6804_v32  ;;  %v7574_v32 = vld [vmem:[%s8884_s1 + $0x238] sm:$0xff] }
 0x11b   :  { %v5124_v63 = vpack.c.bf16 %v9522_v56, %v9520_v10  ;;  %9524 = vst [vmem:[#allocation13_spill] sm:$0xff] %v7517_v55  ;;  %v7529_v10 = vsub.f32 %v7473_v39, %v9527_v50  ;;  %5123 = vmatpush3.bf16.msra.mxu0 %v5122_v23  ;;  %v2268_v50 = vsub.f32 %v7463_v37, %v9053_v29  ;;  %v9534_v23 = vand.u32 4294901760, %v6809_v15 }
 0x11c   :  { %9526 = vst [vmem:[#allocation25_spill] sm:$0xff] %v7522_v16  ;;  %v7534_v56 = vsub.f32 %v7478_v42, %v9529_v36  ;;  %v5126_v47 = vpack.c.bf16 %v9532_v27, %v9531_v7  ;;  %v2275_v36 = vsub.f32 %v7468_v14, %v9052_v4  ;;  %v9535_v15 = vand.u32 4294901760, %v7492_v51  ;;  %v9544_v4 = vld [vmem:[#allocation22_spill] sm:$0xff] }
 0x11d   :  { %9528 = vst [vmem:[#allocation20_spill] sm:$0xff] %v7529_v10  ;;  %5163 = vmatpush3.bf16.msra.mxu1 %v6993_v22  ;;  %5125 = vmatprep.subr.bf16.mxu0 %v5124_v63  ;;  %v5128_v58 = vpack.c.bf16 %v9534_v23, %v9533_v13  ;;  %v7569_v22 = vld [vmem:[%s8884_s1 + $0x230] sm:$0xff]  ;;  %v9536_v63 = vand.u32 4294901760, %v7497_v60  ;;  %v9537_v29 = vand.u32 4294901760, %v6824_v28  ;;  %v9538_v27 = vand.u32 4294901760, %v6829_v45 }
 0x11e   :  { %9530 = vst [vmem:[#allocation16_spill] sm:$0xff] %v7534_v56  ;;  %5165 = vmatprep.subr.bf16.mxu1 %v6999_v35  ;;  %v2156_v35 = vsub.f32 %v7492_v51, %v9535_v15  ;;  %v2269_v20 = vand.u32 4294901760, %v2268_v50  ;;  %v2276_v52 = vand.u32 4294901760, %v2275_v36  ;;  %v9539_v15 = vand.u32 4294901760, %v6838_v59  ;;  %v7623_v36 = vld [vmem:[%s8884_s1 + $0x2d8] sm:$0xff]  ;;  %v9554_v51 = vld [vmem:[#allocation29_spill] sm:$0xff] }
 0x11f   :  { %v2163_v13 = vsub.f32 %v7497_v60, %v9536_v63  ;;  %5127 = vmatpush3.bf16.msra.mxu0 %v5126_v47  ;;  %v5130_v7 = vpack.c.bf16 %v9538_v27, %v9537_v29  ;;  %v9542_v60 = vld [vmem:[#allocation31_spill] sm:$0xff]  ;;  %v9545_v45 = vand.u32 4294901760, %v7517_v55  ;;  %v9547_v1 = vand.u32 4294901760, %v7539_v46  ;;  %v9552_v47 = vld [vmem:[#allocation28_spill] sm:$0xff] }
 0x120   :  { %5129 = vmatprep.subr.bf16.mxu0 %v5128_v58  ;;  %v5132_v63 = vpack.c.bf16 %v9541_v9, %v9539_v15  ;;  %v7594_v23 = vand.u32 4294901760, %v9542_v60  ;;  %v9549_v58 = vand.u32 4294901760, %v7544_v38  ;;  %v2157_v27 = vand.u32 4294901760, %v2156_v35 }
 0x121   :  { %5167 = vmatpush3.bf16.msra.mxu1 %v7013_v33  ;;  %v2282_v29 = vsub.f32 %v7517_v55, %v9545_v45  ;;  %v9546_v33 = vand.u32 4294901760, %v7522_v16  ;;  %v7608_v9 = vsub.f32 %v7539_v46, %v9547_v1  ;;  %v2164_v15 = vand.u32 4294901760, %v2163_v13 }
 0x122   :  { %9543 = vst [vmem:[#allocation54_spill] sm:$0xff] %v7594_v23  ;;  %5169 = vmatprep.subr.bf16.mxu1 %v9544_v4  ;;  %v7613_v50 = vsub.f32 %v7544_v38, %v9549_v58  ;;  %v7618_v4 = vld [vmem:[%s8884_s1 + $0x2d0] sm:$0xff]  ;;  %v9550_v45 = vand.u32 4294901760, %v7529_v10  ;;  %v9551_v1 = vand.u32 4294901760, %v7534_v56  ;;  %v5208_v28 = vpack.c.bf16 %v2276_v52, %v2269_v20 }
 0x123   :  { %v2289_v59 = vsub.f32 %v7522_v16, %v9546_v33  ;;  %9548 = vst [vmem:[#allocation18_spill] sm:$0xff] %v7608_v9  ;;  %5131 = vmatpush3.bf16.msra.mxu0 %v5130_v7  ;;  %v9553_v16 = vand.u32 4294901760, %v9552_v47  ;;  %v9555_v14 = vand.u32 4294901760, %v9554_v51  ;;  %v9556_v35 = vand.u32 4294901760, %v7569_v22 }
 0x124   :  { %v2170_v33 = vsub.f32 %v7529_v10, %v9550_v45  ;;  %v2177_v58 = vsub.f32 %v7534_v56, %v9551_v1  ;;  %5133 = vmatprep.subr.bf16.mxu0 %v5132_v63  ;;  %v9558_v45 = vand.u32 4294901760, %v7574_v32  ;;  %v9075_v63 = vand.u32 4294901760, %v7613_v50 }
 0x125   :  { %v2296_v55 = vsub.f32 %v9552_v47, %v9553_v16  ;;  %v2303_v37 = vsub.f32 %v9554_v51, %v9555_v14  ;;  %5171 = vmatpush3.bf16.msra.mxu1 %v7038_v24  ;;  %v7641_v13 = vsub.f32 %v7569_v22, %v9556_v35  ;;  %v2283_v14 = vand.u32 4294901760, %v2282_v29  ;;  %v9560_v16 = vld [vmem:[#allocation35_spill] sm:$0xff]  ;;  %v9562_v29 = vld [vmem:[#allocation36_spill] sm:$0xff] }
 0x126   :  { %v7646_v52 = vsub.f32 %v7574_v32, %v9558_v45  ;;  %5173 = vmatprep.subr.bf16.mxu1 %v7051_v41  ;;  %v2290_v7 = vand.u32 4294901760, %v2289_v59  ;;  %v5210_v1 = vpack.c.bf16 %v2164_v15, %v2157_v27  ;;  %v2171_v35 = vand.u32 4294901760, %v2170_v33  ;;  %v9559_v45 = vld [vmem:[#allocation46_spill] sm:$0xff]  ;;  %v9564_v27 = vld [vmem:[#allocation47_spill] sm:$0xff] }
 0x127   :  { %9557 = vst [vmem:[#allocation31_spill] sm:$0xff] %v7641_v13  ;;  %v2178_v51 = vand.u32 4294901760, %v2177_v58  ;;  %v7655_v47 = vsub.f32 %v9542_v60, %v7594_v23  ;;  %5135 = vmatpush3.bf16.msra.mxu0 %v9559_v45  ;;  %v2297_v20 = vand.u32 4294901760, %v2296_v55  ;;  %v2304_v56 = vand.u32 4294901760, %v2303_v37 }
 0x128   :  { %v9561_v10 = vand.u32 4294901760, %v9560_v16  ;;  %v9563_v59 = vand.u32 4294901760, %v9562_v29  ;;  %5137 = vmatprep.subr.bf16.mxu0 %v9564_v27  ;;  %v9565_v33 = vand.u32 4294901760, %v7618_v4  ;;  %v9566_v55 = vand.u32 4294901760, %v7623_v36 }
 0x129   :  { %5175 = vmatpush3.bf16.msra.mxu1 %v7060_v61  ;;  %v5212_v58 = vpack.c.bf16 %v2290_v7, %v2283_v14  ;;  %v9567_v61 = vand.u32 4294901760, %v7608_v9  ;;  %v9568_v27 = vand.u32 4294901760, %v7375_v31  ;;  %v5214_v14 = vpack.c.bf16 %v2178_v51, %v2171_v35  ;;  %v9578_v35 = vld [vmem:[#allocation8_spill] sm:$0xff] }
 0x12a   :  { %v2184_v41 = vsub.f32 %v9560_v16, %v9561_v10  ;;  %v2191_v24 = vsub.f32 %v9562_v29, %v9563_v59  ;;  %v7671_v37 = vsub.f32 %v7618_v4, %v9565_v33  ;;  %v7676_v10 = vsub.f32 %v7623_v36, %v9566_v55  ;;  %5209 = vmatprep.subr.bf16.mxu1 %v5208_v28  ;;  %v9570_v55 = vld [vmem:[#allocation21_spill] sm:$0xff]  ;;  %v9571_v28 = vld [vmem:[#allocation48_spill] sm:$0xff] }
 0x12b   :  { %v2310_v45 = vsub.f32 %v7608_v9, %v9567_v61  ;;  %v2317_v59 = vsub.f32 %v7613_v50, %v9075_v63  ;;  %v9569_v33 = vand.u32 4294901760, %v7380_v53  ;;  %5139 = vmatpush3.bf16.msra.mxu0 %v9571_v28  ;;  %v5216_v7 = vpack.c.bf16 %v2304_v56, %v2297_v20  ;;  %v9572_v9 = vld [vmem:[#allocation27_spill] sm:$0xff]  ;;  %v9575_v28 = vld [vmem:[#allocation49_spill] sm:$0xff] }
 0x12c   :  { %2013 = vmatmul.mubr.f32.vlgmr.msra.gmra.mrb[20].mxu1 %v9570_v55  ;;  %v2185_v29 = vand.u32 4294901760, %v2184_v41  ;;  %v2192_v61 = vand.u32 4294901760, %v2191_v24  ;;  %v9573_v63 = vand.u32 4294901760, %v7641_v13  ;;  %v9574_v53 = vand.u32 4294901760, %v7646_v52  ;;  %5141 = vmatprep.subr.bf16.mxu0 %v9575_v28  ;;  %v9576_v20 = vld [vmem:[#allocation45_spill] sm:$0xff]  ;;  %v9585_v28 = vld [vmem:[#allocation50_spill] sm:$0xff] }
 0x12d   :  { %v7688_v60 = vpack.c.bf16 %v9569_v33, %v9568_v27  ;;  %2018 = vmatprep.mubr.f32.mxu1 %v9572_v9  ;;  %5211 = vmatpush3.bf16.msra.mxu1 %v5210_v1  ;;  %v2311_v51 = vand.u32 4294901760, %v2310_v45  ;;  %v2318_v56 = vand.u32 4294901760, %v2317_v59  ;;  %v9577_v24 = vand.u32 4294901760, %v9576_v20  ;;  %v9584_v59 = vld [vmem:[#allocation23_spill] sm:$0xff] }
 0x12e   :  { %v2198_v31 = vsub.f32 %v7641_v13, %v9573_v63  ;;  %v2205_v27 = vsub.f32 %v7646_v52, %v9574_v53  ;;  %5213 = vmatprep.subr.bf16.mxu1 %v5212_v58  ;;  %v9579_v41 = vand.u32 4294901760, %v9578_v35  ;;  %v9580_v13 = vand.u32 4294901760, %v7422_v44 }
 0x12f   :  { %v2324_v1 = vsub.f32 %v9576_v20, %v9577_v24  ;;  %v9581_v53 = vand.u32 4294901760, %v7427_v8  ;;  %v9582_v15 = vand.u32 4294901760, %v7448_v3  ;;  %v9583_v58 = vand.u32 4294901760, %v7453_v62  ;;  %5143 = vmatpush3.bf16.msra.mxu0 %v9585_v28 }
 0x130   :  { %v2331_v63 = vsub.f32 %v9578_v35, %v9579_v41  ;;  %2020 = vmatmul.mubr.f32.gmra.mrb[22].mxu1 %v9584_v59  ;;  %v5218_v24 = vpack.c.bf16 %v2192_v61, %v2185_v29  ;;  %v9586_v20 = vand.u32 4294901760, %v7214_v43  ;;  %v9587_v44 = vand.u32 4294901760, %v7219_v40  ;;  %5177 = vmatprep.subr.bf16.mxu0 %v7688_v60 }
 0x131   :  { %v7713_v33 = vpack.c.bf16 %v9581_v53, %v9580_v13  ;;  %v7719_v45 = vpack.c.bf16 %v9583_v58, %v9582_v15  ;;  %5215 = vmatpush3.bf16.msra.mxu1 %v5214_v14  ;;  %2377 = vmatprep.mubr.f32.mxu1 %v7594_v23  ;;  %v2199_v3 = vand.u32 4294901760, %v2198_v31  ;;  %v2206_v62 = vand.u32 4294901760, %v2205_v27 }
 0x132   :  { %v2212_v41 = vsub.f32 %v7214_v43, %v9586_v20  ;;  %v2219_v8 = vsub.f32 %v7219_v40, %v9587_v44  ;;  %v9588_v13 = vand.u32 4294901760, %v7671_v37  ;;  %v9589_v53 = vand.u32 4294901760, %v7676_v10  ;;  %5217 = vmatprep.subr.bf16.mxu1 %v5216_v7  ;;  %1902 = vmatmul.mubr.f32.vlgmr.msra.gmra.mrb[20].mxu0 %v9570_v55 }
 0x133   :  { %v5220_v61 = vpack.c.bf16 %v2318_v56, %v2311_v51  ;;  %v9590_v20 = vand.u32 4294901760, %v7655_v47  ;;  %v2325_v58 = vand.u32 4294901760, %v2324_v1  ;;  %v2332_v28 = vand.u32 4294901760, %v2331_v63  ;;  %1907 = vmatprep.mubr.f32.mxu0 %v9572_v9  ;;  %5179 = vmatpush3.bf16.msra.mxu0 %v7713_v33 }
 0x134   :  { %v2338_v15 = vsub.f32 %v7671_v37, %v9588_v13  ;;  %v2345_v29 = vsub.f32 %v7676_v10, %v9589_v53  ;;  %v9591_v31 = vand.u32 4294901760, %v7473_v39  ;;  %v9592_v27 = vand.u32 4294901760, %v7478_v42  ;;  %5181 = vmatprep.subr.bf16.mxu0 %v7719_v45  ;;  %v9595_v42 = vld [vmem:[#allocation24_spill] sm:$0xff]  ;;  %v9597_v53 = vld [vmem:[#allocation17_spill] sm:$0xff] }
 0x135   :  { %v2124_v14 = vsub.f32 %v7655_v47, %v9590_v20  ;;  %v2213_v7 = vand.u32 4294901760, %v2212_v41  ;;  %v2220_v51 = vand.u32 4294901760, %v2219_v8  ;;  %v9593_v56 = vand.u32 4294901760, %v7268_v2  ;;  %5219 = vmatpush3.bf16.msra.mxu1 %v5218_v24 }
 0x136   :  { %v7745_v44 = vpack.c.bf16 %v9592_v27, %v9591_v31  ;;  %v9594_v1 = vand.u32 4294901760, %v7273_v0  ;;  %v5222_v39 = vpack.c.bf16 %v2206_v62, %v2199_v3  ;;  %v9596_v63 = vand.u32 4294901760, %v9595_v42  ;;  %5221 = vmatprep.subr.bf16.mxu1 %v5220_v61  ;;  %1909 = vmatmul.mubr.f32.gmra.mrb[22].mxu0 %v9584_v59  ;;  %v9602_v3 = vld [vmem:[#allocation55_spill] sm:$0xff]  ;;  %v9604_v42 = vld [vmem:[#allocation56_spill] sm:$0xff] }
 0x137   :  { %v2226_v13 = vsub.f32 %v7268_v2, %v9593_v56  ;;  %v9598_v9 = vand.u32 4294901760, %v9597_v53  ;;  %v2339_v41 = vand.u32 4294901760, %v2338_v15  ;;  %v2346_v8 = vand.u32 4294901760, %v2345_v29 }
 0x138   :  { %v2233_v55 = vsub.f32 %v7273_v0, %v9594_v1  ;;  %v2125_v31 = vand.u32 4294901760, %v2124_v14  ;;  %v5224_v27 = vpack.c.bf16 %v2332_v28, %v2325_v58  ;;  %v9600_v56 = vand.u32 4294901760, %v7316_v30  ;;  %5183 = vmatpush3.bf16.msra.mxu0 %v7745_v44 }
 0x139   :  { %v7760_v20 = vpack.c.bf16 %v9598_v9, %v9596_v63  ;;  %v9601_v24 = vand.u32 4294901760, %v7321_v26  ;;  %v9603_v62 = vand.u32 4294901760, %v9602_v3  ;;  %v9605_v63 = vand.u32 4294901760, %v9604_v42  ;;  %5223 = vmatpush3.bf16.msra.mxu1 %v5222_v39 }
 0x13a   :  { %v2352_v23 = vsub.f32 %v7316_v30, %v9600_v56  ;;  %2126 = vmatprep.mubr.f32.mxu0 %v2125_v31  ;;  %v5226_v15 = vpack.c.bf16 %v2220_v51, %v2213_v7  ;;  %v9607_v29 = vand.u32 4294901760, %v7539_v46  ;;  %v9608_v61 = vand.u32 4294901760, %v7544_v38  ;;  %5225 = vmatprep.subr.bf16.mxu1 %v5224_v27  ;;  %v9616_v27 = vld [vmem:[#allocation5_spill] sm:$0xff] }
 0x13b   :  { %9599 = vst [vmem:[#allocation22_spill] sm:$0xff] %v7760_v20  ;;  %v2359_v1 = vsub.f32 %v7321_v26, %v9601_v24  ;;  %v7773_v53 = vpack.c.bf16 %v9605_v63, %v9603_v62  ;;  %v2227_v58 = vand.u32 4294901760, %v2226_v13  ;;  %v2234_v28 = vand.u32 4294901760, %v2233_v55  ;;  %5185 = vmatprep.subr.bf16.mxu0 %v7760_v20 }
 0x13c   :  { %v7780_v14 = vpack.c.bf16 %v9608_v61, %v9607_v29  ;;  %v5228_v59 = vpack.c.bf16 %v2346_v8, %v2339_v41  ;;  %v9610_v9 = vand.u32 4294901760, %v7326_v49  ;;  %v9611_v24 = vand.u32 4294901760, %v7332_v25 }
 0x13d   :  { %9606 = vst [vmem:[#allocation46_spill] sm:$0xff] %v7773_v53  ;;  %v2353_v46 = vand.u32 4294901760, %v2352_v23  ;;  %v2360_v51 = vand.u32 4294901760, %v2359_v1  ;;  %v9612_v38 = vand.u32 4294901760, %v7337_v57  ;;  %v9613_v55 = vand.u32 4294901760, %v7342_v12  ;;  %5187 = vmatpush3.bf16.msra.mxu0 %v7773_v53  ;;  %v9618_v1 = vld [vmem:[#allocation38_spill] sm:$0xff]  ;;  %5227 = vmatpush3.bf16.msra.mxu1 %v5226_v15 }
 0x13e   :  { %9609 = vst [vmem:[#allocation35_spill] sm:$0xff] %v7780_v14  ;;  %v2240_v56 = vsub.f32 %v7326_v49, %v9610_v9  ;;  %v2247_v7 = vsub.f32 %v7332_v25, %v9611_v24  ;;  %v9614_v41 = vand.u32 4294901760, %v7569_v22  ;;  %v9615_v8 = vand.u32 4294901760, %v7574_v32  ;;  %5189 = vmatprep.subr.bf16.mxu0 %v7780_v14  ;;  %5229 = vmatprep.subr.bf16.mxu1 %v5228_v59 }
 0x13f   :  { %v2366_v13 = vsub.f32 %v7337_v57, %v9612_v38  ;;  %v2373_v39 = vsub.f32 %v7342_v12, %v9613_v55  ;;  %v5230_v3 = vpack.c.bf16 %v2234_v28, %v2227_v58  ;;  %v9617_v23 = vand.u32 4294901760, %v9616_v27  ;;  %v9622_v38 = vld [vmem:[#allocation30_spill] sm:$0xff]  ;;  %v9624_v55 = vld [vmem:[#allocation40_spill] sm:$0xff] }
 0x140   :  { %v7800_v31 = vpack.c.bf16 %v9615_v8, %v9614_v41  ;;  %v9619_v62 = vand.u32 4294901760, %v9618_v1  ;;  %v2241_v63 = vand.u32 4294901760, %v2240_v56  ;;  %v2248_v29 = vand.u32 4294901760, %v2247_v7  ;;  %v9626_v7 = vld [vmem:[#allocation32_spill] sm:$0xff]  ;;  %v9630_v1 = vld [vmem:[#allocation33_spill] sm:$0xff] }
 0x141   :  { %v9620_v61 = vand.u32 4294901760, %v7356_v11  ;;  %v9621_v32 = vand.u32 4294901760, %v7361_v5  ;;  %v5232_v58 = vpack.c.bf16 %v2360_v51, %v2353_v46  ;;  %v2367_v28 = vand.u32 4294901760, %v2366_v13  ;;  %5231 = vmatpush3.bf16.msra.mxu1 %v5230_v3  ;;  %v9634_v3 = vld [vmem:[#allocation42_spill] sm:$0xff] }
 0x142   :  { %v7806_v42 = vpack.c.bf16 %v9619_v62, %v9617_v23  ;;  %v2374_v24 = vand.u32 4294901760, %v2373_v39  ;;  %5191 = vmatpush3.bf16.msra.mxu0 %v7800_v31  ;;  %v9623_v15 = vand.u32 4294901760, %v9622_v38  ;;  %v9625_v41 = vand.u32 4294901760, %v9624_v55 }
 0x143   :  { %v2254_v22 = vsub.f32 %v7356_v11, %v9620_v61  ;;  %v2261_v9 = vsub.f32 %v7361_v5, %v9621_v32  ;;  %v7823_v8 = vand.u32 4294901760, %v9626_v7  ;;  %v5234_v27 = vpack.c.bf16 %v2248_v29, %v2241_v63  ;;  %5233 = vmatprep.subr.bf16.mxu1 %v5232_v58  ;;  %v9632_v61 = vld [vmem:[#allocation34_spill] sm:$0xff]  ;;  %v9636_v29 = vld [vmem:[#allocation44_spill] sm:$0xff] }
 0x144   :  { %v7820_v56 = vpack.c.bf16 %v9625_v41, %v9623_v15  ;;  %5193 = vmatprep.subr.bf16.mxu0 %v7806_v42  ;;  %v9628_v59 = vand.u32 4294901760, %v7618_v4  ;;  %v9629_v46 = vand.u32 4294901760, %v7623_v36  ;;  %v5236_v23 = vpack.c.bf16 %v2374_v24, %v2367_v28 }
 0x145   :  { %9627 = vst [vmem:[#allocation47_spill] sm:$0xff] %v7823_v8  ;;  %v2255_v13 = vand.u32 4294901760, %v2254_v22  ;;  %v2262_v39 = vand.u32 4294901760, %v2261_v9  ;;  %v7833_v62 = vand.u32 4294901760, %v9630_v1  ;;  %v7836_v32 = vand.u32 4294901760, %v9632_v61  ;;  %5235 = vmatpush3.bf16.msra.mxu1 %v5234_v27 }
 0x146   :  { %v7830_v51 = vpack.c.bf16 %v9629_v46, %v9628_v59  ;;  %5195 = vmatpush3.bf16.msra.mxu0 %v7820_v56  ;;  %v9635_v63 = vand.u32 4294901760, %v9634_v3  ;;  %v9637_v4 = vand.u32 4294901760, %v9636_v29  ;;  %v9638_v22 = vand.u32 4294901760, %v7228_v18  ;;  %5237 = vmatprep.subr.bf16.mxu1 %v5236_v23  ;;  %v9652_v29 = vld [vmem:[#allocation15_spill] sm:$0xff] }
 0x147   :  { %9631 = vst [vmem:[#allocation21_spill] sm:$0xff] %v7833_v62  ;;  %9633 = vst [vmem:[#allocation48_spill] sm:$0xff] %v7836_v32  ;;  %v5238_v36 = vpack.c.bf16 %v2262_v39, %v2255_v13  ;;  %v9639_v9 = vand.u32 4294901760, %v7237_v54  ;;  %v7854_v28 = vsub.f32 %v9626_v7, %v7823_v8  ;;  %v7858_v24 = vsub.f32 %v9630_v1, %v7833_v62  ;;  %v7908_v1 = vld [vmem:[%s8884_s1 + $0x3a8] sm:$0xff] }
 0x148   :  { %v7843_v38 = vpack.c.bf16 %v9637_v4, %v9635_v63  ;;  %5197 = vmatprep.subr.bf16.mxu0 %v7830_v51  ;;  %v7862_v15 = vsub.f32 %v9632_v61, %v7836_v32  ;;  %v9640_v18 = vand.u32 4294901760, %v7242_v6  ;;  %v9641_v54 = vand.u32 4294901760, %v7251_v19  ;;  %v7884_v19 = vld [vmem:[%s8884_s1 + $0x310] sm:$0xff]  ;;  %v7889_v6 = vld [vmem:[%s8884_s1 + $0x318] sm:$0xff]  ;;  %9649 = vst [vmem:[#allocation23_spill] sm:$0xff] %v7908_v1  ;;  %v7925_v63 = vld [vmem:[%s8884_s1 + $0x328] sm:$0xff] }
 0x149   :  { %v7850_v58 = vpack.c.bf16 %v9639_v9, %v9638_v22  ;;  %5239 = vmatpush3.bf16.msra.mxu1 %v5238_v36  ;;  %v9081_v41 = vand.u32 4294901760, %v7854_v28  ;;  %v9642_v7 = vand.u32 4294901760, %v7256_v48  ;;  %v9643_v27 = vand.u32 4294901760, %v7261_v17  ;;  %9644 = vst [vmem:[#allocation27_spill] sm:$0xff] %v7884_v19  ;;  %9645 = vst [vmem:[#allocation49_spill] sm:$0xff] %v7889_v6  ;;  %v7895_v17 = vld [vmem:[%s8884_s1 + $0x3a0] sm:$0xff] }
 0x14a   :  { %5199 = vmatpush3.bf16.msra.mxu0 %v7843_v38  ;;  %v7869_v55 = vpack.c.bf16 %v9641_v54, %v9640_v18  ;;  %5273 = vmatprep.subr.bf16.mxu1 %v7688_v60  ;;  %v9082_v46 = vand.u32 4294901760, %v7858_v24  ;;  %v9083_v13 = vand.u32 4294901760, %v7862_v15  ;;  %9646 = vst [vmem:[#allocation8_spill] sm:$0xff] %v7895_v17  ;;  %v9647_v48 = vand.u32 4294901760, %v7281_v21  ;;  %9651 = vst [vmem:[#allocation24_spill] sm:$0xff] %v7925_v63  ;;  %v9653_v4 = vld [vmem:[#allocation11_spill] sm:$0xff] }
 0x14b   :  { %5201 = vmatprep.subr.bf16.mxu0 %v7850_v58  ;;  %v7878_v59 = vpack.c.bf16 %v9643_v27, %v9642_v7  ;;  %v9648_v39 = vand.u32 4294901760, %v7286_v34  ;;  %v2130_v61 = vsub.f32 %v7854_v28, %v9081_v41  ;;  %v9090_v3 = vand.u32 4294901760, %v7884_v19  ;;  %v7920_v34 = vld [vmem:[%s8884_s1 + $0x320] sm:$0xff]  ;;  %v9655_v27 = vld [vmem:[#allocation12_spill] sm:$0xff]  ;;  %v9658_v21 = vld [vmem:[#allocation25_spill] sm:$0xff] }
 0x14c   :  { %2379 = vmatmul.mubr.f32.vlgmr.msra.gmra.mrb[24].mxu1 %v7823_v8  ;;  %9650 = vst [vmem:[#allocation50_spill] sm:$0xff] %v7920_v34  ;;  %v5240_v36 = vpack.c.bf16 %v9653_v4, %v9652_v29  ;;  %v2139_v22 = vsub.f32 %v7858_v24, %v9082_v46  ;;  %v2145_v18 = vsub.f32 %v7862_v15, %v9083_v13  ;;  %v9654_v7 = vld [vmem:[#allocation19_spill] sm:$0xff]  ;;  %v9656_v46 = vand.u32 4294901760, %v7655_v47  ;;  %v9657_v13 = vld [vmem:[#allocation13_spill] sm:$0xff] }
 0x14d   :  { %v7903_v23 = vpack.c.bf16 %v9648_v39, %v9647_v48  ;;  %2384 = vmatprep.mubr.f32.mxu1 %v7833_v62  ;;  %5275 = vmatpush3.bf16.msra.mxu1 %v7713_v33  ;;  %v5242_v48 = vpack.c.bf16 %v9655_v27, %v9654_v7  ;;  %v2131_v9 = vand.u32 4294901760, %v2130_v61  ;;  %v5244_v54 = vpack.c.bf16 %v9658_v21, %v9657_v13  ;;  %v7963_v41 = vld [vmem:[%s8884_s1 + $0x3b0] sm:$0xff] }
 0x14e   :  { %5203 = vmatpush3.bf16.msra.mxu0 %v7869_v55  ;;  %5277 = vmatprep.subr.bf16.mxu1 %v7719_v45  ;;  %v9660_v62 = vand.u32 4294901760, %v7889_v6  ;;  %9662 = vst [vmem:[#allocation56_spill] sm:$0xff] %v7963_v41  ;;  %v9663_v61 = vand.u32 4294901760, %v7895_v17  ;;  %v9672_v21 = vand.u32 4294901760, %v7925_v63 }
 0x14f   :  { %5205 = vmatprep.subr.bf16.mxu0 %v7878_v59 }
 0x150   :  { %2386 = vmatmul.mubr.f32.gmra.mrb[26].mxu1 %v7836_v32  ;;  %v7953_v32 = vsub.f32 %v7884_v19, %v9090_v3  ;;  %v7958_v39 = vsub.f32 %v7889_v6, %v9660_v62  ;;  %v7969_v8 = vsub.f32 %v7895_v17, %v9663_v61  ;;  %v7974_v3 = vld [vmem:[%s8884_s1 + $0x3b8] sm:$0xff]  ;;  %v2146_v62 = vand.u32 4294901760, %v2145_v18 }
 0x151   :  { %5279 = vmatpush3.bf16.msra.mxu1 %v7745_v44  ;;  %2637 = vmatprep.mubr.f32.mxu1 %v9656_v46  ;;  %v2140_v46 = vand.u32 4294901760, %v2139_v22  ;;  %9665 = vst [vmem:[#allocation38_spill] sm:$0xff] %v7974_v3  ;;  %v9666_v6 = vand.u32 4294901760, %v7908_v1  ;;  %v9669_v22 = vld [vmem:[#allocation16_spill] sm:$0xff]  ;;  %v9670_v61 = vand.u32 4294901760, %v7920_v34  ;;  %v9685_v18 = vld [vmem:[#allocation18_spill] sm:$0xff] }
 0x152   :  { %5207 = vmatpush3.bf16.msra.mxu0 %v7903_v23  ;;  %9659 = vst [vmem:[#allocation17_spill] sm:$0xff] %v7953_v32  ;;  %9661 = vst [vmem:[#allocation55_spill] sm:$0xff] %v7958_v39  ;;  %5281 = vmatprep.subr.bf16.mxu1 %v7760_v20 }
 0x153   :  { %5241 = vmatprep.subr.bf16.mxu0 %v5240_v36  ;;  %9664 = vst [vmem:[#allocation5_spill] sm:$0xff] %v7969_v8  ;;  %v7979_v19 = vsub.f32 %v7908_v1, %v9666_v6  ;;  %v9668_v36 = vld [vmem:[#allocation20_spill] sm:$0xff]  ;;  %v7986_v17 = vsub.f32 %v7920_v34, %v9670_v61  ;;  %v7997_v6 = vld [vmem:[%s8884_s1 + $0x330] sm:$0xff] }
 0x154   :  { %v5246_v20 = vpack.c.bf16 %v9669_v22, %v9668_v36  ;;  %9674 = vst [vmem:[#allocation33_spill] sm:$0xff] %v7997_v6  ;;  %v9677_v61 = vld [vmem:[#allocation29_spill] sm:$0xff]  ;;  %v9678_v1 = vld [vmem:[#allocation36_spill] sm:$0xff] }
 0x155   :  { %2132 = vmatmul.mubr.f32.vlgmr.msra.gmra.mrb[24].mxu0 %v2131_v9  ;;  %9667 = vst [vmem:[#allocation30_spill] sm:$0xff] %v7979_v19  ;;  %9671 = vst [vmem:[#allocation40_spill] sm:$0xff] %v7986_v17  ;;  %v7991_v9 = vsub.f32 %v7925_v63, %v9672_v21  ;;  %5283 = vmatpush3.bf16.msra.mxu1 %v7773_v53  ;;  %v9100_v21 = vand.u32 4294901760, %v7953_v32  ;;  %v5250_v22 = vpack.c.bf16 %v9678_v1, %v9560_v16  ;;  %v8030_v16 = vld [vmem:[%s8884_s1 + $0x340] sm:$0xff]  ;;  %v8035_v1 = vld [vmem:[%s8884_s1 + $0x348] sm:$0xff] }
 0x156   :  { %2141 = vmatprep.mubr.f32.mxu0 %v2140_v46  ;;  %5243 = vmatpush3.bf16.msra.mxu0 %v5242_v48  ;;  %v8002_v48 = vld [vmem:[%s8884_s1 + $0x338] sm:$0xff]  ;;  %v9676_v46 = vld [vmem:[#allocation28_spill] sm:$0xff]  ;;  %9681 = vst [vmem:[#allocation15_spill] sm:$0xff] %v8030_v16  ;;  %9682 = vst [vmem:[#allocation11_spill] sm:$0xff] %v8035_v1  ;;  %v5252_v63 = vpack.c.bf16 %v7613_v50, %v9685_v18  ;;  %v9686_v53 = vand.u32 4294901760, %v7963_v41 }
 0x157   :  { %9673 = vst [vmem:[#allocation32_spill] sm:$0xff] %v7991_v9  ;;  %9675 = vst [vmem:[#allocation34_spill] sm:$0xff] %v8002_v48  ;;  %5245 = vmatprep.subr.bf16.mxu0 %v5244_v54  ;;  %v5248_v34 = vpack.c.bf16 %v9677_v61, %v9676_v46  ;;  %5285 = vmatprep.subr.bf16.mxu1 %v7780_v14  ;;  %v8017_v54 = vld [vmem:[%s8884_s1 + $0x3c0] sm:$0xff]  ;;  %v8022_v46 = vld [vmem:[%s8884_s1 + $0x3c8] sm:$0xff]  ;;  %v9690_v61 = vand.u32 4294901760, %v7969_v8  ;;  %v9691_v14 = vand.u32 4294901760, %v7979_v19 }
 0x158   :  { %9679 = vst [vmem:[#allocation42_spill] sm:$0xff] %v8017_v54  ;;  %9680 = vst [vmem:[#allocation44_spill] sm:$0xff] %v8022_v46  ;;  %v8051_v13 = vsub.f32 %v7963_v41, %v9686_v53  ;;  %v9693_v41 = vand.u32 4294901760, %v7986_v17  ;;  %v9703_v53 = vld [vmem:[#allocation45_spill] sm:$0xff]  ;;  %v9708_v17 = vand.u32 4294901760, %v8030_v16 }
 0x159   :  { %2147 = vmatmul.mubr.f32.gmra.mrb[26].mxu0 %v2146_v62  ;;  %v9683_v62 = vand.u32 4294901760, %v7958_v39  ;;  %5287 = vmatpush3.bf16.msra.mxu1 %v7800_v31  ;;  %v8156_v39 = vld [vmem:[%s8884_s1 + $0x3e8] sm:$0xff] }
 0x15a   :  { %5247 = vmatpush3.bf16.msra.mxu0 %v5246_v20  ;;  %2521 = vmatprep.mubr.f32.mxu0 %v7655_v47  ;;  %9687 = vst [vmem:[#allocation12_spill] sm:$0xff] %v8051_v13 }
 0x15b   :  { %v8041_v36 = vpack.c.bf16 %v9683_v62, %v9100_v21  ;;  %5249 = vmatprep.subr.bf16.mxu0 %v5248_v34  ;;  %v9688_v62 = vand.u32 4294901760, %v7974_v3  ;;  %5289 = vmatprep.subr.bf16.mxu1 %v7806_v42  ;;  %v9696_v21 = vand.u32 4294901760, %v7997_v6  ;;  %v8089_v34 = vld [vmem:[%s8884_s1 + $0x3d0] sm:$0xff] }
 0x15c   :  { %9700 = vst [vmem:[#allocation58_spill] sm:$0xff] %v8089_v34  ;;  %v9714_v32 = vand.u32 4294901760, %v8089_v34 }
 0x15d   :  { %9684 = vst [vmem:[#allocation19_spill] sm:$0xff] %v8041_v36  ;;  %v8057_v20 = vsub.f32 %v7974_v3, %v9688_v62  ;;  %v8065_v36 = vpack.c.bf16 %v9691_v14, %v9690_v61  ;;  %v9694_v62 = vand.u32 4294901760, %v7991_v9  ;;  %v8079_v47 = vsub.f32 %v7997_v6, %v9696_v21  ;;  %5291 = vmatpush3.bf16.msra.mxu1 %v7820_v56  ;;  %v3950_v9 = vpop.f32.mrb[0].mxu1 }
 0x15e   :  { %v9698_v14 = vand.u32 4294901760, %v8002_v48  ;;  %5251 = vmatpush3.bf16.msra.mxu0 %v5250_v22  ;;  %5293 = vmatprep.subr.bf16.mxu1 %v7830_v51  ;;  %v3951_v19 = vpop.f32.mrb[1].mxu1 }
 0x15f   :  { %9689 = vst [vmem:[#allocation28_spill] sm:$0xff] %v8057_v20  ;;  %9692 = vst [vmem:[#allocation29_spill] sm:$0xff] %v8065_v36  ;;  %v8074_v3 = vpack.c.bf16 %v9694_v62, %v9693_v41  ;;  %v8094_v41 = vld [vmem:[%s8884_s1 + $0x3d8] sm:$0xff]  ;;  %v9702_v62 = vld [vmem:[#allocation31_spill] sm:$0xff]  ;;  %5253 = vmatprep.subr.bf16.mxu0 %v5252_v63  ;;  %v8129_v63 = vsub.f32 %v8030_v16, %v9708_v17  ;;  %v3952_v17 = vadd.f32 %v3951_v19, %v3950_v9  ;;  %v3953_v19 = vpop.f32.mrb[2].mxu1 }
 0x160   :  { %9697 = vst [vmem:[#allocation18_spill] sm:$0xff] %v8079_v47  ;;  %v8084_v61 = vsub.f32 %v8002_v48, %v9698_v14  ;;  %9701 = vst [vmem:[#allocation59_spill] sm:$0xff] %v8094_v41  ;;  %v5254_v21 = vpack.c.bf16 %v7646_v52, %v9702_v62  ;;  %v5258_v14 = vpack.c.bf16 %v7219_v40, %v7214_v43  ;;  %v8105_v36 = vld [vmem:[%s8884_s1 + $0x350] sm:$0xff]  ;;  %v8110_v48 = vld [vmem:[%s8884_s1 + $0x358] sm:$0xff]  ;;  %v9707_v40 = vand.u32 4294901760, %v8022_v46 }
 0x161   :  { %9695 = vst [vmem:[#allocation36_spill] sm:$0xff] %v8074_v3  ;;  %v5256_v3 = vpack.c.bf16 %v9578_v35, %v9703_v53  ;;  %9704 = vst [vmem:[#allocation31_spill] sm:$0xff] %v8105_v36  ;;  %v9706_v53 = vand.u32 4294901760, %v8017_v54  ;;  %v9709_v35 = vand.u32 4294901760, %v8035_v1  ;;  %v5260_v16 = vpack.c.bf16 %v7676_v10, %v7671_v37  ;;  %5295 = vmatpush3.bf16.msra.mxu1 %v7843_v38 }
 0x162   :  { %9699 = vst [vmem:[#allocation57_spill] sm:$0xff] %v8084_v61  ;;  %9705 = vst [vmem:[#allocation45_spill] sm:$0xff] %v8110_v48  ;;  %v8123_v6 = vsub.f32 %v8022_v46, %v9707_v40  ;;  %v9124_v40 = vand.u32 4294901760, %v8079_v47  ;;  %v9123_v46 = vand.u32 4294901760, %v8084_v61  ;;  %5255 = vmatpush3.bf16.msra.mxu0 %v5254_v21  ;;  %v9711_v9 = vand.u32 4294901760, %v8057_v20  ;;  %5297 = vmatprep.subr.bf16.mxu1 %v7850_v58 }
 0x163   :  { %v8118_v43 = vsub.f32 %v8017_v54, %v9706_v53  ;;  %v8134_v22 = vsub.f32 %v8035_v1, %v9709_v35  ;;  %v5262_v35 = vpack.c.bf16 %v7273_v0, %v7268_v2  ;;  %v5264_v54 = vpack.c.bf16 %v7321_v26, %v7316_v30  ;;  %v8151_v53 = vld [vmem:[%s8884_s1 + $0x3e0] sm:$0xff]  ;;  %5257 = vmatprep.subr.bf16.mxu0 %v5256_v3  ;;  %v8169_v2 = vld [vmem:[%s8884_s1 + $0x368] sm:$0xff]  ;;  %v8174_v30 = vld [vmem:[%s8884_s1 + $0x3f0] sm:$0xff]  ;;  %v3954_v1 = vpop.f32.mrb[3].mxu1 }
 0x164   :  { %v8164_v26 = vld [vmem:[%s8884_s1 + $0x360] sm:$0xff]  ;;  %v9710_v3 = vand.u32 4294901760, %v8051_v13  ;;  %v8186_v0 = vpack.c.bf16 %v9123_v46, %v9124_v40  ;;  %v8194_v13 = vsub.f32 %v8089_v34, %v9714_v32  ;;  %v8204_v46 = vld [vmem:[%s8884_s1 + $0x3f8] sm:$0xff]  ;;  %v8209_v40 = vld [vmem:[%s8884_s1 + $0x370] sm:$0xff]  ;;  %v9718_v8 = vand.u32 4294901760, %v8105_v36 }
 0x165   :  { %9716 = vst [vmem:[#allocation62_spill] sm:$0xff] %v8204_v46  ;;  %9717 = vst [vmem:[#allocation63_spill] sm:$0xff] %v8209_v40  ;;  %v8226_v34 = vld [vmem:[%s8884_s1 + $0x378] sm:$0xff]  ;;  %v3955_v61 = vadd.f32 %v3954_v1, %v3953_v19  ;;  %5299 = vmatpush3.bf16.msra.mxu1 %v7869_v55  ;;  %v9724_v1 = vand.u32 4294901760, %v8129_v63  ;;  %v9730_v47 = vand.u32 4294901760, %v8169_v2 }
 0x166   :  { %v8180_v21 = vpack.c.bf16 %v9711_v9, %v9710_v3  ;;  %9713 = vst [vmem:[#allocation61_spill] sm:$0xff] %v8186_v0  ;;  %v9715_v3 = vand.u32 4294901760, %v8094_v41  ;;  %v8214_v32 = vsub.f32 %v8105_v36, %v9718_v8  ;;  %v9719_v0 = vand.u32 4294901760, %v8110_v48  ;;  %9720 = vst [vmem:[#allocation64_spill] sm:$0xff] %v8226_v34  ;;  %5259 = vmatpush3.bf16.msra.mxu0 %v5258_v14  ;;  %v3912_v36 = vpop.f32.mrb[0].mxu0 }
 0x167   :  { %5261 = vmatprep.subr.bf16.mxu0 %v5260_v16  ;;  %v9725_v14 = vand.u32 4294901760, %v8134_v22  ;;  %5301 = vmatprep.subr.bf16.mxu1 %v7878_v59  ;;  %v5266_v16 = vpack.c.bf16 %v7332_v25, %v7326_v49  ;;  %v9729_v25 = vand.u32 4294901760, %v8164_v26 }
 0x168   :  { %9712 = vst [vmem:[#allocation60_spill] sm:$0xff] %v8180_v21  ;;  %v8199_v9 = vsub.f32 %v8094_v41, %v9715_v3  ;;  %v8219_v3 = vsub.f32 %v8110_v48, %v9719_v0  ;;  %v9721_v21 = vand.u32 4294901760, %v8118_v43  ;;  %v9722_v48 = vand.u32 4294901760, %v8123_v6 }
 0x169   :  { %v8244_v19 = vpack.c.bf16 %v9725_v14, %v9724_v1  ;;  %v5268_v41 = vpack.c.bf16 %v7342_v12, %v7337_v57  ;;  %v9727_v14 = vand.u32 4294901760, %v8151_v53  ;;  %v9728_v12 = vand.u32 4294901760, %v8156_v39  ;;  %5303 = vmatpush3.bf16.msra.mxu1 %v7903_v23 }
 0x16a   :  { %v8238_v20 = vpack.c.bf16 %v9722_v48, %v9721_v21  ;;  %v9137_v48 = vand.u32 4294901760, %v8226_v34  ;;  %v3913_v21 = vpop.f32.mrb[1].mxu0  ;;  %5263 = vmatpush3.bf16.msra.mxu0 %v5262_v35  ;;  %v8269_v8 = vsub.f32 %v8164_v26, %v9729_v25  ;;  %v8274_v1 = vsub.f32 %v8169_v2, %v9730_v47  ;;  %5337 = vmatprep.subr.bf16.mxu1 %v7688_v60 }
 0x16b   :  { %9726 = vst [vmem:[#allocation66_spill] sm:$0xff] %v8244_v19  ;;  %v8259_v19 = vsub.f32 %v8151_v53, %v9727_v14  ;;  %v3914_v49 = vadd.f32 %v3913_v21, %v3912_v36  ;;  %v8264_v57 = vsub.f32 %v8156_v39, %v9728_v12  ;;  %5265 = vmatprep.subr.bf16.mxu0 %v5264_v54  ;;  %v9731_v36 = vand.u32 4294901760, %v8174_v30  ;;  %v3915_v0 = vpop.f32.mrb[2].mxu0 }
 0x16c   :  { %9723 = vst [vmem:[#allocation65_spill] sm:$0xff] %v8238_v20  ;;  %v9733_v21 = vand.u32 4294901760, %v8204_v46  ;;  %v9735_v12 = vand.u32 4294901760, %v8209_v40  ;;  %v8298_v54 = vsub.f32 %v8226_v34, %v9137_v48  ;;  %v5270_v60 = vpack.c.bf16 %v7361_v5, %v7356_v11 }
 0x16d   :  { %v8280_v35 = vsub.f32 %v8174_v30, %v9731_v36  ;;  %v8292_v47 = vadd.f32 %v3952_v17, %v3914_v49  ;;  %v9738_v36 = vand.u32 4294901760, %v8194_v13  ;;  %v3916_v49 = vpop.f32.mrb[3].mxu0  ;;  %v9744_v48 = vand.u32 4294901760, %v7854_v28 }
 0x16e   :  { %v8285_v14 = vsub.f32 %v8204_v46, %v9733_v21  ;;  %v8290_v25 = vsub.f32 %v8209_v40, %v9735_v12  ;;  %9737 = vst [vmem:[#allocation70_spill] sm:$0xff] %v8298_v54  ;;  %v9739_v21 = vand.u32 4294901760, %v8199_v9  ;;  %v9741_v46 = vand.u32 4294901760, %v8214_v32  ;;  %5267 = vmatpush3.bf16.msra.mxu0 %v5266_v16 }
 0x16f   :  { %9732 = vst [vmem:[#allocation67_spill] sm:$0xff] %v8280_v35  ;;  %v9742_v12 = vand.u32 4294901760, %v8219_v3  ;;  %v9146_v40 = vand.u32 4294901760, %v8259_v19  ;;  %2641 = vmatmul.mubr.f32.vlgmr.msra.gmra.mrb[28].mxu1 %v9744_v48  ;;  %v3917_v34 = vadd.f32 %v3916_v49, %v3915_v0  ;;  %v9746_v11 = vand.u32 4294901760, %v9652_v29  ;;  %5269 = vmatprep.subr.bf16.mxu0 %v5268_v41 }
 0x170   :  { %9734 = vst [vmem:[#allocation68_spill] sm:$0xff] %v8285_v14  ;;  %9736 = vst [vmem:[#allocation69_spill] sm:$0xff] %v8290_v25  ;;  %v8304_v20 = vpack.c.bf16 %v9739_v21, %v9738_v36  ;;  %v9143_v36 = vand.u32 4294901760, %v8264_v57  ;;  %v9140_v21 = vand.u32 4294901760, %v8269_v8  ;;  %5339 = vmatpush3.bf16.msra.mxu1 %v7713_v33  ;;  %v9747_v5 = vand.u32 4294901760, %v9653_v4  ;;  %v8349_v4 = vld [vmem:[%s8884_s1 + $0x380] sm:$0xff] }
 0x171   :  { %v8310_v17 = vpack.c.bf16 %v9742_v12, %v9741_v46  ;;  %v9745_v46 = vand.u32 4294901760, %v7858_v24  ;;  %v9142_v48 = vand.u32 4294901760, %v8280_v35  ;;  %v9141_v0 = vand.u32 4294901760, %v8285_v14  ;;  %5341 = vmatprep.subr.bf16.mxu1 %v7719_v45  ;;  %v8354_v45 = vld [vmem:[%s8884_s1 + $0x388] sm:$0xff] }
 0x172   :  { %9740 = vst [vmem:[#allocation71_spill] sm:$0xff] %v8304_v20  ;;  %v9139_v20 = vand.u32 4294901760, %v8274_v1  ;;  %v5304_v12 = vpack.c.bf16 %v9747_v5, %v9746_v11  ;;  %v9145_v16 = vand.u32 4294901760, %v8290_v25  ;;  %v8330_v49 = vadd.f32 %v3955_v61, %v3917_v34  ;;  %5271 = vmatpush3.bf16.msra.mxu0 %v5270_v60 }
 0x173   :  { %9743 = vst [vmem:[#allocation72_spill] sm:$0xff] %v8310_v17  ;;  %2648 = vmatprep.mubr.f32.mxu1 %v9745_v46  ;;  %v9144_v46 = vand.u32 4294901760, %v8298_v54  ;;  %v8338_v33 = vpack.c.bf16 %v9143_v36, %v9146_v40  ;;  %v8360_v34 = vpack.c.bf16 %v9141_v0, %v9142_v48  ;;  %v9751_v61 = vand.u32 4294901760, %v7862_v15  ;;  %v9756_v0 = vld [vmem:[#allocation13_spill] sm:$0xff] }
 0x174   :  { %v8344_v29 = vpack.c.bf16 %v9139_v20, %v9140_v21  ;;  %v9752_v41 = vand.u32 4294901760, %v9654_v7  ;;  %v9753_v11 = vand.u32 4294901760, %v9655_v27  ;;  %5343 = vmatpush3.bf16.msra.mxu1 %v7745_v44  ;;  %v9755_v21 = vld [vmem:[#allocation54_spill] sm:$0xff]  ;;  %v9757_v48 = vand.u32 4294901760, %v9756_v0  ;;  %v9758_v36 = vld [vmem:[#allocation25_spill] sm:$0xff]  ;;  %5305 = vmatprep.subr.bf16.mxu0 %v5304_v12  ;;  %v8391_v44 = vld [vmem:[%s8884_s1 + $0x308] sm:$0xff] }
 0x175   :  { %9748 = vst [vmem:[#allocation73_spill] sm:$0xff] %v8338_v33  ;;  %9750 = vst [vmem:[#allocation75_spill] sm:$0xff] %v8360_v34  ;;  %2652 = vmatmul.mubr.f32.gmra.mrb[30].mxu1 %v9751_v61  ;;  %v8372_v20 = vpack.c.bf16 %v9144_v46, %v9145_v16  ;;  %v9759_v61 = vand.u32 4294901760, %v9758_v36  ;;  %v9760_v7 = vld [vmem:[#allocation22_spill] sm:$0xff]  ;;  %v9155_v27 = vand.u32 4294901760, %v8349_v4  ;;  %2524 = vmatmul.mubr.f32.vlgmr.msra.gmra.mrb[28].mxu0 %v7854_v28  ;;  %v8397_v36 = vld [vmem:[%s8884_s1 + $0x390] sm:$0xff] }
 0x176   :  { %9749 = vst [vmem:[#allocation74_spill] sm:$0xff] %v8344_v29  ;;  %v5306_v5 = vpack.c.bf16 %v9753_v11, %v9752_v41  ;;  %2929 = vmatprep.mubr.f32.mxu1 %v9755_v21  ;;  %5345 = vmatprep.subr.bf16.mxu1 %v9760_v7  ;;  %v8386_v11 = vld [vmem:[%s8884_s1 + $0x300] sm:$0xff]  ;;  %v8402_v12 = vld [vmem:[%s8884_s1 + $0x398] sm:$0xff]  ;;  %v9151_v40 = vand.u32 4294901760, %v8391_v44  ;;  %s5592_s1 = smov [#allocation2]  }
 0x177   :  { %9754 = vst [vmem:[#allocation76_spill] sm:$0xff] %v8372_v20  ;;  %v5308_v60 = vpack.c.bf16 %v9759_v61, %v9757_v48  ;;  %2530 = vmatprep.mubr.f32.mxu0 %v7858_v24  ;;  %v9761_v48 = vld [vmem:[#allocation20_spill] sm:$0xff]  ;;  %v9765_v16 = vld [vmem:[#allocation46_spill] sm:$0xff]  ;;  %v9152_v28 = vand.u32 4294901760, %v8386_v11  ;;  %v9766_v41 = vld [vmem:[#allocation35_spill] sm:$0xff]  ;;  %v8416_v20 = vsub.f32 %v8349_v4, %v9155_v27  ;;  %v9767_v24 = vand.u32 4294901760, %v8354_v45 }
 0x178   :  { %5307 = vmatpush3.bf16.msra.mxu0 %v5306_v5  ;;  %v9762_v0 = vand.u32 4294901760, %v9761_v48  ;;  %v9763_v61 = vld [vmem:[#allocation16_spill] sm:$0xff]  ;;  %5347 = vmatpush3.bf16.msra.mxu1 %v9765_v16  ;;  %v9147_v48 = vand.u32 4294901760, %v8397_v36  ;;  %v9148_v16 = vand.u32 4294901760, %v8402_v12  ;;  %v9789_v34 = vld [vmem:[#allocation30_spill] sm:$0xff]  ;;  %s3869_s8 = sshll.u32 %s5592_s1, 4  ;;  %s3870_s8 = int_to_ptr.vmem [resolvable:$true] %s3869_s8 }
 0x179   :  { %v9764_v7 = vand.u32 4294901760, %v9763_v61  ;;  %5309 = vmatprep.subr.bf16.mxu0 %v5308_v60  ;;  %5349 = vmatprep.subr.bf16.mxu1 %v9766_v41  ;;  %v8421_v5 = vsub.f32 %v8354_v45, %v9767_v24  ;;  %v9768_v60 = vld [vmem:[#allocation41_spill] sm:$0xff]  ;;  %v9769_v41 = vand.u32 4294901760, %v9685_v18  ;;  %v9775_v24 = vand.u32 4294901760, %v9702_v62  ;;  %s5566_s9 = scalar_lea.vmem %s3870_s8, 256  ;;  %p5571_p1 = scmp.lt.s32.totalorder %s3870_s8, %s3870_s8 }
 0x17a   :  { %2533 = vmatmul.mubr.f32.gmra.mrb[30].mxu0 %v7862_v15  ;;  %v8441_v15 = vsub.f32 %v8391_v44, %v9151_v40  ;;  %v8454_v18 = vsub.f32 %v8402_v12, %v9148_v16  ;;  %v9790_v29 = vand.u32 4294901760, %v9789_v34  ;;  %p5567_p0 = scmp.ne.s32.totalorder %s3870_s8, %s5566_s9  ;;  %p5572_p2 = scmp.lt.s32.totalorder %s5566_s9, %s5566_s9 }
 0x17b   :  { %v5310_v46 = vpack.c.bf16 %v9764_v7, %v9762_v0  ;;  %2818 = vmatprep.mubr.f32.mxu0 %v9755_v21  ;;  %v9770_v0 = vand.u32 4294901760, %v7613_v50  ;;  %v8436_v7 = vsub.f32 %v8386_v11, %v9152_v28  ;;  %v9150_v21 = vand.u32 4294901760, %v8421_v5 }
 0x17c   :  { %5351 = vmatpush3.bf16.msra.mxu1 %v7800_v31  ;;  %9771 = vst [vmem:[#allocation54_spill] sm:$0xff] %v8441_v15  ;;  %v9149_v31 = vand.u32 4294901760, %v8416_v20  ;;  %v8449_v50 = vsub.f32 %v8397_v36, %v9147_v48  ;;  %9773 = vst [vmem:[#allocation25_spill] sm:$0xff] %v8454_v18  ;;  %v4026_v48 = vpop.f32.mrb[4].mxu1  ;;  %p5573_p3 = por %p5572_p2, %p5571_p1 }
 0x17d   :  { %5311 = vmatpush3.bf16.msra.mxu0 %v5310_v46  ;;  %v5316_v61 = vpack.c.bf16 %v9770_v0, %v9769_v41  ;;  %5353 = vmatprep.subr.bf16.mxu1 %v7806_v42  ;;  %v9774_v46 = vld [vmem:[#allocation7_spill] sm:$0xff]  ;;  %v9776_v42 = vand.u32 4294901760, %v7646_v52  ;;  %v9154_v41 = vand.u32 4294901760, %v8436_v7  ;;  %v9153_v0 = vand.u32 4294901760, %v8441_v15 }
 0x17e   :  { %5313 = vmatprep.subr.bf16.mxu0 %v9768_v60  ;;  %9772 = vst [vmem:[#allocation13_spill] sm:$0xff] %v8449_v50  ;;  %v3186_v16 = vsub.f32 %v8416_v20, %v9149_v31  ;;  %v3193_v62 = vsub.f32 %v8421_v5, %v9150_v21  ;;  %v9157_v52 = vand.u32 4294901760, %v8449_v50  ;;  %p5574_p4 = pnand %p5573_p3, %p5567_p0 }
 0x17f   :  { %v5318_v60 = vpack.c.bf16 %v9776_v42, %v9775_v24  ;;  %v9777_v24 = vld [vmem:[#allocation26_spill] sm:$0xff]  ;;  %v9779_v42 = vand.u32 4294901760, %v7676_v10  ;;  %v3074_v21 = vsub.f32 %v8436_v7, %v9154_v41  ;;  %v3081_v40 = vsub.f32 %v8441_v15, %v9153_v0  ;;  %v9785_v41 = vld [vmem:[#allocation37_spill] sm:$0xff] }
 0x180   :  { %5355 = vmatpush3.bf16.msra.mxu1 %v7820_v56  ;;  %v9156_v56 = vand.u32 4294901760, %v8454_v18  ;;  %v8502_v27 = vand.u32 4294901760, %v9785_v41 }
 0x181   :  { %5315 = vmatpush3.bf16.msra.mxu0 %v9774_v46  ;;  %5357 = vmatprep.subr.bf16.mxu1 %v7830_v51  ;;  %v9778_v51 = vand.u32 4294901760, %v7671_v37  ;;  %v3200_v37 = vsub.f32 %v8449_v50, %v9157_v52  ;;  %v3082_v52 = vand.u32 4294901760, %v3081_v40  ;;  %v9793_v40 = vld [vmem:[#allocation32_spill] sm:$0xff] }
 0x182   :  { %5317 = vmatprep.subr.bf16.mxu0 %v5316_v61  ;;  %v4027_v61 = vpop.f32.mrb[5].mxu1  ;;  %v3207_v10 = vsub.f32 %v8454_v18, %v9156_v56  ;;  %9786 = vst [vmem:[#allocation22_spill] sm:$0xff] %v8502_v27  ;;  %v3075_v56 = vand.u32 4294901760, %v3074_v21  ;;  %v9791_v18 = vld [vmem:[#allocation40_spill] sm:$0xff]  ;;  %v9794_v21 = vand.u32 4294901760, %v9793_v40 }
 0x183   :  { %v4028_v46 = vadd.f32 %v4027_v61, %v4026_v48  ;;  %v5324_v31 = vpack.c.bf16 %v9779_v42, %v9778_v51  ;;  %v4029_v28 = vpop.f32.mrb[6].mxu1  ;;  %v3187_v48 = vand.u32 4294901760, %v3186_v16  ;;  %v9781_v51 = vld [vmem:[#allocation17_spill] sm:$0xff]  ;;  %v3201_v17 = vand.u32 4294901760, %v3200_v37 }
 0x184   :  { %5359 = vmatpush3.bf16.msra.mxu1 %v7843_v38  ;;  %v3194_v38 = vand.u32 4294901760, %v3193_v62  ;;  %v9782_v42 = vand.u32 4294901760, %v9781_v51  ;;  %v3988_v33 = vpop.f32.mrb[4].mxu0  ;;  %v3109_v50 = vsub.f32 %v9793_v40, %v9794_v21 }
 0x185   :  { %5319 = vmatpush3.bf16.msra.mxu0 %v5318_v60  ;;  %5361 = vmatprep.subr.bf16.mxu1 %v7850_v58  ;;  %v4030_v60 = vpop.f32.mrb[7].mxu1  ;;  %v9783_v58 = vld [vmem:[#allocation55_spill] sm:$0xff] }
 0x186   :  { %5321 = vmatprep.subr.bf16.mxu0 %v9777_v24  ;;  %v8492_v61 = vadd.f32 %v4030_v60, %v4029_v28  ;;  %v9780_v24 = vld [vmem:[#allocation9_spill] sm:$0xff]  ;;  %v3088_v0 = vsub.f32 %v9781_v51, %v9782_v42  ;;  %v9784_v16 = vand.u32 4294901760, %v9783_v58  ;;  %v3221_v42 = vsub.f32 %v9789_v34, %v9790_v29  ;;  %v3989_v51 = vpop.f32.mrb[5].mxu0 }
 0x187   :  { %v9787_v28 = vld [vmem:[#allocation5_spill] sm:$0xff] }
 0x188   :  { %v3095_v62 = vsub.f32 %v9783_v58, %v9784_v16  ;;  %5363 = vmatpush3.bf16.msra.mxu1 %v7869_v55  ;;  %v9788_v60 = vand.u32 4294901760, %v9787_v28  ;;  %v5400_v16 = vpack.c.bf16 %v3194_v38, %v3187_v48  ;;  %v3208_v58 = vand.u32 4294901760, %v3207_v10  ;;  %v9796_v48 = vld [vmem:[#allocation52_spill] sm:$0xff] }
 0x189   :  { %5323 = vmatpush3.bf16.msra.mxu0 %v9780_v24  ;;  %5365 = vmatprep.subr.bf16.mxu1 %v7878_v59  ;;  %v9792_v55 = vand.u32 4294901760, %v9791_v18  ;;  %v3089_v15 = vand.u32 4294901760, %v3088_v0  ;;  %v8521_v59 = vsub.f32 %v9785_v41, %v8502_v27  ;;  %v5402_v38 = vpack.c.bf16 %v3082_v52, %v3075_v56 }
 0x18a   :  { %5325 = vmatprep.subr.bf16.mxu0 %v5324_v31  ;;  %v3214_v24 = vsub.f32 %v9787_v28, %v9788_v60  ;;  %v3990_v60 = vadd.f32 %v3989_v51, %v3988_v33  ;;  %v9795_v28 = vld [vmem:[#allocation51_spill] sm:$0xff]  ;;  %v3096_v29 = vand.u32 4294901760, %v3095_v62  ;;  %v3222_v10 = vand.u32 4294901760, %v3221_v42  ;;  %v3991_v51 = vpop.f32.mrb[6].mxu0  ;;  %v9799_v62 = vld [vmem:[#allocation28_spill] sm:$0xff] }
 0x18b   :  { %v3102_v31 = vsub.f32 %v9791_v18, %v9792_v55  ;;  %v9797_v55 = vld [vmem:[#allocation12_spill] sm:$0xff]  ;;  %v5404_v0 = vpack.c.bf16 %v3208_v58, %v3201_v17  ;;  %v3992_v40 = vpop.f32.mrb[7].mxu0  ;;  %v9802_v52 = vand.u32 4294901760, %v8354_v45  ;;  %v3110_v42 = vand.u32 4294901760, %v3109_v50  ;;  %v9806_v45 = vld [vmem:[#allocation18_spill] sm:$0xff]  ;;  %v9808_v50 = vld [vmem:[#allocation57_spill] sm:$0xff] }
 0x18c   :  { %5367 = vmatpush3.bf16.msra.mxu1 %v7903_v23  ;;  %v3215_v37 = vand.u32 4294901760, %v3214_v24  ;;  %v9798_v18 = vand.u32 4294901760, %v9797_v55  ;;  %v690_v33 = vadd.f32 %v3990_v60, %v8292_v47  ;;  %v9801_v23 = vand.u32 4294901760, %v8349_v4  ;;  %v9804_v47 = vld [vmem:[#allocation53_spill] sm:$0xff] }
 0x18d   :  { %5327 = vmatpush3.bf16.msra.mxu0 %v9795_v28  ;;  %5401 = vmatprep.subr.bf16.mxu1 %v5400_v16  ;;  %v9800_v28 = vand.u32 4294901760, %v9799_v62  ;;  %v3103_v24 = vand.u32 4294901760, %v3102_v31  ;;  %v5406_v16 = vpack.c.bf16 %v3096_v29, %v3089_v15  ;;  %v9169_v17 = vand.u32 4294901760, %v8521_v59  ;;  %v9805_v60 = vld [vmem:[#allocation21_spill] sm:$0xff]  ;;  %v9810_v15 = vld [vmem:[#allocation10_spill] sm:$0xff] }
 0x18e   :  { %5329 = vmatprep.subr.bf16.mxu0 %v9796_v48  ;;  %v3228_v21 = vsub.f32 %v9797_v55, %v9798_v18  ;;  %v8536_v56 = vpack.c.bf16 %v9802_v52, %v9801_v23  ;;  %v3993_v48 = vadd.f32 %v3992_v40, %v3991_v51  ;;  %v9803_v18 = vld [vmem:[#allocation47_spill] sm:$0xff]  ;;  %v8541_v58 = vadd.f32 %v4028_v46, %v690_v33 }
 0x18f   :  { %v3235_v41 = vsub.f32 %v9799_v62, %v9800_v28  ;;  %2931 = vmatmul.mubr.f32.vlgmr.msra.gmra.mrb[32].mxu1 %v9803_v18  ;;  %v5408_v4 = vpack.c.bf16 %v3222_v10, %v3215_v37  ;;  %v9807_v23 = vand.u32 4294901760, %v9806_v45  ;;  %v9809_v40 = vand.u32 4294901760, %v9808_v50 }
 0x190   :  { %2936 = vmatprep.mubr.f32.mxu1 %v9805_v60  ;;  %5403 = vmatpush3.bf16.msra.mxu1 %v5402_v38  ;;  %v3229_v28 = vand.u32 4294901760, %v3228_v21  ;;  %v699_v52 = vadd.f32 %v3993_v48, %v8330_v49  ;;  %v9811_v29 = vand.u32 4294901760, %v8118_v43  ;;  %v9812_v37 = vand.u32 4294901760, %v8123_v6  ;;  %v9817_v48 = vld [vmem:[#allocation48_spill] sm:$0xff] }
 0x191   :  { %5331 = vmatpush3.bf16.msra.mxu0 %v9804_v47  ;;  %v3116_v31 = vsub.f32 %v9806_v45, %v9807_v23  ;;  %v3123_v51 = vsub.f32 %v9808_v50, %v9809_v40  ;;  %5405 = vmatprep.subr.bf16.mxu1 %v5404_v0  ;;  %v3236_v46 = vand.u32 4294901760, %v3235_v41  ;;  %v9813_v21 = vand.u32 4294901760, %v8386_v11  ;;  %v9818_v40 = vld [vmem:[#allocation14_spill] sm:$0xff] }
 0x192   :  { %5333 = vmatprep.subr.bf16.mxu0 %v9810_v15  ;;  %v3242_v38 = vsub.f32 %v8118_v43, %v9811_v29  ;;  %v3249_v10 = vsub.f32 %v8123_v6, %v9812_v37  ;;  %v9814_v33 = vand.u32 4294901760, %v8391_v44  ;;  %v5410_v23 = vpack.c.bf16 %v3110_v42, %v3103_v24 }
 0x193   :  { %v9815_v49 = vand.u32 4294901760, %v8397_v36  ;;  %v9816_v0 = vand.u32 4294901760, %v8402_v12  ;;  %2938 = vmatmul.mubr.f32.gmra.mrb[34].mxu1 %v9817_v48  ;;  %v9819_v15 = vand.u32 4294901760, %v8129_v63  ;;  %v9820_v11 = vand.u32 4294901760, %v8134_v22 }
 0x194   :  { %v8562_v47 = vpack.c.bf16 %v9814_v33, %v9813_v21  ;;  %v8579_v24 = vadd.f32 %v8492_v61, %v699_v52  ;;  %5407 = vmatpush3.bf16.msra.mxu1 %v5406_v16  ;;  %3295 = vmatprep.mubr.f32.mxu1 %v8502_v27  ;;  %v3117_v36 = vand.u32 4294901760, %v3116_v31  ;;  %v3124_v12 = vand.u32 4294901760, %v3123_v51  ;;  %v9823_v31 = vld [vmem:[#allocation27_spill] sm:$0xff]  ;;  %v9861_v27 = vld [vmem:[#allocation58_spill] sm:$0xff] }
 0x195   :  { %v8568_v41 = vpack.c.bf16 %v9816_v0, %v9815_v49  ;;  %5335 = vmatpush3.bf16.msra.mxu0 %v9818_v40  ;;  %v3130_v29 = vsub.f32 %v8129_v63, %v9819_v15  ;;  %v3137_v44 = vsub.f32 %v8134_v22, %v9820_v11  ;;  %v9821_v42 = vand.u32 4294901760, %v8194_v13  ;;  %5409 = vmatprep.subr.bf16.mxu1 %v5408_v4  ;;  %v9825_v0 = vld [vmem:[#allocation49_spill] sm:$0xff] }
 0x196   :  { %v9822_v21 = vand.u32 4294901760, %v8199_v9  ;;  %5369 = vmatprep.subr.bf16.mxu0 %v8536_v56  ;;  %v5412_v49 = vpack.c.bf16 %v3236_v46, %v3229_v28  ;;  %v3042_v61 = vsub.f32 %v8521_v59, %v9169_v17  ;;  %v3243_v16 = vand.u32 4294901760, %v3242_v38 }
 0x197   :  { %v3256_v37 = vsub.f32 %v8194_v13, %v9821_v42  ;;  %v3250_v52 = vand.u32 4294901760, %v3249_v10  ;;  %v9824_v51 = vand.u32 4294901760, %v9823_v31  ;;  %v9826_v40 = vand.u32 4294901760, %v9825_v0  ;;  %v9829_v42 = vld [vmem:[#allocation8_spill] sm:$0xff]  ;;  %v9831_v31 = vld [vmem:[#allocation23_spill] sm:$0xff] }
 0x198   :  { %v3263_v33 = vsub.f32 %v8199_v9, %v9822_v21  ;;  %2820 = vmatmul.mubr.f32.vlgmr.msra.gmra.mrb[32].mxu0 %v9803_v18  ;;  %v3131_v4 = vand.u32 4294901760, %v3130_v29  ;;  %v3138_v28 = vand.u32 4294901760, %v3137_v44  ;;  %v9827_v46 = vand.u32 4294901760, %v8214_v32  ;;  %5411 = vmatpush3.bf16.msra.mxu1 %v5410_v23 }
 0x199   :  { %v8597_v15 = vpack.c.bf16 %v9826_v40, %v9824_v51  ;;  %2825 = vmatprep.mubr.f32.mxu0 %v9805_v60  ;;  %5371 = vmatpush3.bf16.msra.mxu0 %v8562_v47  ;;  %v9828_v38 = vand.u32 4294901760, %v8219_v3  ;;  %v5414_v10 = vpack.c.bf16 %v3124_v12, %v3117_v36  ;;  %v9830_v21 = vand.u32 4294901760, %v9829_v42  ;;  %v9835_v36 = vld [vmem:[#allocation50_spill] sm:$0xff]  ;;  %v9837_v42 = vld [vmem:[#allocation24_spill] sm:$0xff] }
 0x19a   :  { %v3144_v11 = vsub.f32 %v8214_v32, %v9827_v46  ;;  %5373 = vmatprep.subr.bf16.mxu0 %v8568_v41  ;;  %v9832_v60 = vand.u32 4294901760, %v9831_v31  ;;  %v3257_v29 = vand.u32 4294901760, %v3256_v37  ;;  %v3264_v44 = vand.u32 4294901760, %v3263_v33  ;;  %5413 = vmatprep.subr.bf16.mxu1 %v5412_v49  ;;  %v9839_v33 = vld [vmem:[#allocation56_spill] sm:$0xff] }
 0x19b   :  { %v3151_v18 = vsub.f32 %v8219_v3, %v9828_v38  ;;  %v3043_v0 = vand.u32 4294901760, %v3042_v61  ;;  %v5416_v40 = vpack.c.bf16 %v3250_v52, %v3243_v16  ;;  %v9833_v46 = vand.u32 4294901760, %v8259_v19  ;;  %v9841_v61 = vld [vmem:[#allocation38_spill] sm:$0xff] }
 0x19c   :  { %v8612_v51 = vpack.c.bf16 %v9832_v60, %v9830_v21  ;;  %v9834_v23 = vand.u32 4294901760, %v8264_v57  ;;  %2827 = vmatmul.mubr.f32.gmra.mrb[34].mxu0 %v9817_v48  ;;  %v9836_v12 = vand.u32 4294901760, %v9835_v36  ;;  %v9838_v21 = vand.u32 4294901760, %v9837_v42  ;;  %5415 = vmatpush3.bf16.msra.mxu1 %v5414_v10 }
 0x19d   :  { %v3270_v17 = vsub.f32 %v8259_v19, %v9833_v46  ;;  %5375 = vmatpush3.bf16.msra.mxu0 %v8597_v15  ;;  %3044 = vmatprep.mubr.f32.mxu0 %v3043_v0  ;;  %v5418_v37 = vpack.c.bf16 %v3138_v28, %v3131_v4  ;;  %v9840_v49 = vand.u32 4294901760, %v9839_v33  ;;  %v9842_v16 = vand.u32 4294901760, %v9841_v61 }
 0x19e   :  { %v3277_v38 = vsub.f32 %v8264_v57, %v9834_v23  ;;  %v8625_v31 = vpack.c.bf16 %v9838_v21, %v9836_v12  ;;  %v3145_v60 = vand.u32 4294901760, %v3144_v11  ;;  %v3152_v46 = vand.u32 4294901760, %v3151_v18  ;;  %5377 = vmatprep.subr.bf16.mxu0 %v8612_v51  ;;  %5417 = vmatprep.subr.bf16.mxu1 %v5416_v40  ;;  %v9849_v21 = vld [vmem:[#allocation34_spill] sm:$0xff] }
 0x19f   :  { %v8632_v52 = vpack.c.bf16 %v9842_v16, %v9840_v49  ;;  %v5420_v48 = vpack.c.bf16 %v3264_v44, %v3257_v29  ;;  %v9843_v23 = vand.u32 4294901760, %v8269_v8  ;;  %v9844_v12 = vand.u32 4294901760, %v8274_v1  ;;  %v9847_v29 = vld [vmem:[#allocation33_spill] sm:$0xff]  ;;  %v9851_v40 = vld [vmem:[#allocation42_spill] sm:$0xff] }
 0x1a0   :  { %v3271_v28 = vand.u32 4294901760, %v3270_v17  ;;  %v3278_v0 = vand.u32 4294901760, %v3277_v38  ;;  %v9845_v42 = vand.u32 4294901760, %v8280_v35  ;;  %v9846_v18 = vand.u32 4294901760, %v8285_v14  ;;  %v9853_v38 = vld [vmem:[#allocation44_spill] sm:$0xff]  ;;  %5419 = vmatpush3.bf16.msra.mxu1 %v5418_v37  ;;  %v9857_v37 = vld [vmem:[#allocation15_spill] sm:$0xff] }
 0x1a1   :  { %v3158_v36 = vsub.f32 %v8269_v8, %v9843_v23  ;;  %v3165_v4 = vsub.f32 %v8274_v1, %v9844_v12  ;;  %5379 = vmatpush3.bf16.msra.mxu0 %v8625_v31  ;;  %v9848_v44 = vand.u32 4294901760, %v9847_v29  ;;  %v9850_v33 = vand.u32 4294901760, %v9849_v21  ;;  %5421 = vmatprep.subr.bf16.mxu1 %v5420_v48  ;;  %v9865_v48 = vld [vmem:[#allocation6_spill] sm:$0xff] }
 0x1a2   :  { %v3284_v11 = vsub.f32 %v8280_v35, %v9845_v42  ;;  %v3291_v10 = vsub.f32 %v8285_v14, %v9846_v18  ;;  %v5422_v61 = vpack.c.bf16 %v3152_v46, %v3145_v60  ;;  %v9852_v17 = vand.u32 4294901760, %v9851_v40  ;;  %5381 = vmatprep.subr.bf16.mxu0 %v8632_v52  ;;  %v4102_v40 = vpop.f32.mrb[8].mxu1 }
 0x1a3   :  { %v8652_v49 = vpack.c.bf16 %v9850_v33, %v9848_v44  ;;  %v9854_v16 = vand.u32 4294901760, %v9853_v38  ;;  %v3159_v12 = vand.u32 4294901760, %v3158_v36  ;;  %v3166_v42 = vand.u32 4294901760, %v3165_v4  ;;  %v9859_v36 = vld [vmem:[#allocation11_spill] sm:$0xff] }
 0x1a4   :  { %v9855_v18 = vand.u32 4294901760, %v8290_v25  ;;  %v9856_v21 = vand.u32 4294901760, %v8298_v54  ;;  %v5424_v60 = vpack.c.bf16 %v3278_v0, %v3271_v28  ;;  %v3285_v46 = vand.u32 4294901760, %v3284_v11  ;;  %5423 = vmatpush3.bf16.msra.mxu1 %v5422_v61 }
 0x1a5   :  { %v8658_v23 = vpack.c.bf16 %v9854_v16, %v9852_v17  ;;  %v3292_v33 = vand.u32 4294901760, %v3291_v10  ;;  %v4103_v17 = vpop.f32.mrb[9].mxu1  ;;  %5383 = vmatpush3.bf16.msra.mxu0 %v8652_v49  ;;  %v9858_v38 = vand.u32 4294901760, %v9857_v37  ;;  %v9860_v4 = vand.u32 4294901760, %v9859_v36 }
 0x1a6   :  { %v3172_v29 = vsub.f32 %v8290_v25, %v9855_v18  ;;  %v3179_v44 = vsub.f32 %v8298_v54, %v9856_v21  ;;  %v9862_v18 = vand.u32 4294901760, %v9861_v27  ;;  %v9863_v25 = vld [vmem:[#allocation59_spill] sm:$0xff]  ;;  %v8681_v28 = vand.u32 4294901760, %v9865_v48  ;;  %5425 = vmatprep.subr.bf16.mxu1 %v5424_v60  ;;  %v4105_v27 = vpop.f32.mrb[10].mxu1 }
 0x1a7   :  { %v8672_v16 = vpack.c.bf16 %v9860_v4, %v9858_v38  ;;  %v9864_v14 = vand.u32 4294901760, %v9863_v25  ;;  %v4104_v0 = vadd.f32 %v4103_v17, %v4102_v40  ;;  %5385 = vmatprep.subr.bf16.mxu0 %v8658_v23  ;;  %v5426_v11 = vpack.c.bf16 %v3166_v42, %v3159_v12  ;;  %v9866_v38 = vld [vmem:[#allocation39_spill] sm:$0xff]  ;;  %v4106_v4 = vpop.f32.mrb[11].mxu1 }
 0x1a8   :  { %v3173_v10 = vand.u32 4294901760, %v3172_v29  ;;  %v3180_v21 = vand.u32 4294901760, %v3179_v44  ;;  %v5428_v37 = vpack.c.bf16 %v3292_v33, %v3285_v46  ;;  %v8685_v36 = vand.u32 4294901760, %v9866_v38  ;;  %v9873_v46 = vld [vmem:[#allocation43_spill] sm:$0xff] }
 0x1a9   :  { %v8678_v35 = vpack.c.bf16 %v9864_v14, %v9862_v18  ;;  %5387 = vmatpush3.bf16.msra.mxu0 %v8672_v16  ;;  %v9867_v14 = vld [vmem:[#allocation31_spill] sm:$0xff]  ;;  %v9869_v18 = vld [vmem:[#allocation45_spill] sm:$0xff]  ;;  %v8696_v61 = vsub.f32 %v9865_v48, %v8681_v28  ;;  %v4107_v12 = vadd.f32 %v4106_v4, %v4105_v27  ;;  %5427 = vmatpush3.bf16.msra.mxu1 %v5426_v11  ;;  %v9871_v29 = vand.u32 4294901760, %v8151_v53  ;;  %v9877_v4 = vld [vmem:[#allocation62_spill] sm:$0xff] }
 0x1aa   :  { %v9868_v25 = vand.u32 4294901760, %v9867_v14  ;;  %v9870_v54 = vand.u32 4294901760, %v9869_v18  ;;  %v5430_v42 = vpack.c.bf16 %v3180_v21, %v3173_v10  ;;  %v9872_v44 = vand.u32 4294901760, %v8156_v39  ;;  %5429 = vmatprep.subr.bf16.mxu1 %v5428_v37 }
 0x1ab   :  { %5389 = vmatprep.subr.bf16.mxu0 %v8678_v35  ;;  %v8706_v33 = vand.u32 4294901760, %v9873_v46  ;;  %v8710_v17 = vsub.f32 %v9866_v38, %v8685_v36  ;;  %v9874_v10 = vand.u32 4294901760, %v8164_v26  ;;  %v9875_v53 = vand.u32 4294901760, %v8169_v2 }
 0x1ac   :  { %v8692_v40 = vpack.c.bf16 %v9870_v54, %v9868_v25  ;;  %v8703_v60 = vpack.c.bf16 %v9872_v44, %v9871_v29  ;;  %v4064_v54 = vpop.f32.mrb[8].mxu0  ;;  %v3047_v21 = vand.u32 4294901760, %v8696_v61  ;;  %v9876_v26 = vand.u32 4294901760, %v8174_v30  ;;  %v9879_v29 = vld [vmem:[#allocation63_spill] sm:$0xff] }
 0x1ad   :  { %v4065_v48 = vpop.f32.mrb[9].mxu0  ;;  %v8717_v39 = vpack.c.bf16 %v9875_v53, %v9874_v10  ;;  %5431 = vmatpush3.bf16.msra.mxu1 %v5430_v42  ;;  %v8723_v37 = vsub.f32 %v9873_v46, %v8706_v33  ;;  %v9878_v2 = vand.u32 4294901760, %v9877_v4  ;;  %v3056_v25 = vand.u32 4294901760, %v8710_v17 }
 0x1ae   :  { %v4066_v11 = vadd.f32 %v4065_v48, %v4064_v54  ;;  %5391 = vmatpush3.bf16.msra.mxu0 %v8692_v40  ;;  %v4067_v27 = vpop.f32.mrb[10].mxu0  ;;  %5465 = vmatprep.subr.bf16.mxu1 %v8536_v56  ;;  %v9880_v44 = vand.u32 4294901760, %v9879_v29  ;;  %v3048_v30 = vsub.f32 %v8696_v61, %v3047_v21 }
 0x1af   :  { %5393 = vmatprep.subr.bf16.mxu0 %v8703_v60  ;;  %v8731_v14 = vpack.c.bf16 %v9878_v2, %v9876_v26  ;;  %v4068_v18 = vpop.f32.mrb[11].mxu0  ;;  %v3057_v53 = vsub.f32 %v8710_v17, %v3056_v25 }
 0x1b0   :  { %v986_v38 = vadd.f32 %v4066_v11, %v8541_v58  ;;  %v4069_v42 = vadd.f32 %v4068_v18, %v4067_v27  ;;  %3297 = vmatmul.mubr.f32.vlgmr.msra.gmra.mrb[36].mxu1 %v8681_v28  ;;  %v9881_v58 = vld [vmem:[#allocation64_spill] sm:$0xff]  ;;  %v3062_v11 = vand.u32 4294901760, %v8723_v37  ;;  %v3049_v4 = vand.u32 4294901760, %v3048_v30  ;;  %v9885_v18 = vld [vmem:[#allocation13_spill] sm:$0xff] }
 0x1b1   :  { %v9882_v46 = vand.u32 4294901760, %v9881_v58  ;;  %3302 = vmatprep.mubr.f32.mxu1 %v8685_v36  ;;  %5467 = vmatpush3.bf16.msra.mxu1 %v8562_v47  ;;  %v9888_v58 = vld [vmem:[#allocation55_spill] sm:$0xff] }
 0x1b2   :  { %5395 = vmatpush3.bf16.msra.mxu0 %v8717_v39  ;;  %v8742_v48 = vadd.f32 %v4104_v0, %v986_v38  ;;  %v993_v10 = vadd.f32 %v4069_v42, %v8579_v24  ;;  %5469 = vmatprep.subr.bf16.mxu1 %v8568_v41  ;;  %v5432_v0 = vpack.c.bf16 %v8421_v5, %v8416_v20  ;;  %v9883_v38 = vld [vmem:[#allocation54_spill] sm:$0xff]  ;;  %v9884_v24 = vand.u32 4294901760, %v8521_v59  ;;  %v9886_v42 = vld [vmem:[#allocation25_spill] sm:$0xff] }
 0x1b3   :  { %v8740_v54 = vpack.c.bf16 %v9882_v46, %v9880_v44  ;;  %5397 = vmatprep.subr.bf16.mxu0 %v8731_v14  ;;  %v5434_v27 = vpack.c.bf16 %v9883_v38, %v8436_v7  ;;  %v3063_v2 = vsub.f32 %v8723_v37, %v3062_v11  ;;  %v5436_v29 = vpack.c.bf16 %v9886_v42, %v9885_v18 }
 0x1b4   :  { %3304 = vmatmul.mubr.f32.gmra.mrb[38].mxu1 %v8706_v33  ;;  %v8762_v26 = vadd.f32 %v4107_v12, %v993_v10  ;;  %v3058_v44 = vand.u32 4294901760, %v3057_v53  ;;  %v9887_v12 = vld [vmem:[#allocation17_spill] sm:$0xff]  ;;  %v9891_v53 = vld [vmem:[#allocation32_spill] sm:$0xff] }
 0x1b5   :  { %5471 = vmatpush3.bf16.msra.mxu1 %v8597_v15  ;;  %3555 = vmatprep.mubr.f32.mxu1 %v9884_v24  ;;  %v5438_v46 = vpack.c.bf16 %v9888_v58, %v9887_v12  ;;  %v3064_v30 = vand.u32 4294901760, %v3063_v2  ;;  %v9889_v10 = vld [vmem:[#allocation5_spill] sm:$0xff]  ;;  %v9892_v58 = vld [vmem:[#allocation67_spill] sm:$0xff] }
 0x1b6   :  { %5399 = vmatpush3.bf16.msra.mxu0 %v8740_v54  ;;  %5473 = vmatprep.subr.bf16.mxu1 %v8612_v51  ;;  %v5440_v24 = vpack.c.bf16 %v9789_v34, %v9889_v10  ;;  %v5446_v34 = vpack.c.bf16 %v9808_v50, %v9806_v45  ;;  %v5452_v45 = vpack.c.bf16 %v8199_v9, %v8194_v13  ;;  %v9894_v10 = vld [vmem:[#allocation69_spill] sm:$0xff] }
 0x1b7   :  { %5433 = vmatprep.subr.bf16.mxu0 %v5432_v0  ;;  %v9890_v0 = vld [vmem:[#allocation40_spill] sm:$0xff]  ;;  %v5458_v9 = vpack.c.bf16 %v8274_v1, %v8269_v8 }
 0x1b9   :  { %3050 = vmatmul.mubr.f32.vlgmr.msra.gmra.mrb[36].mxu0 %v3049_v4  ;;  %5475 = vmatpush3.bf16.msra.mxu1 %v8625_v31  ;;  %v5442_v4 = vpack.c.bf16 %v9891_v53, %v9890_v0  ;;  %v9897_v0 = vand.u32 4294901760, %v8421_v5  ;;  %v9898_v53 = vand.u32 4294901760, %v8436_v7  ;;  %v9903_v7 = vld [vmem:[#allocation19_spill] sm:$0xff] }
 0x1ba   :  { %3059 = vmatprep.mubr.f32.mxu0 %v3058_v44  ;;  %5435 = vmatpush3.bf16.msra.mxu0 %v5434_v27  ;;  %v5444_v27 = vpack.c.bf16 %v9799_v62, %v9797_v55  ;;  %v5450_v55 = vpack.c.bf16 %v8134_v22, %v8129_v63  ;;  %v5456_v22 = vpack.c.bf16 %v8264_v57, %v8259_v19 }
 0x1bb   :  { %5437 = vmatprep.subr.bf16.mxu0 %v5436_v29  ;;  %5477 = vmatprep.subr.bf16.mxu1 %v8632_v52 }
 0x1bd   :  { %3065 = vmatmul.mubr.f32.gmra.mrb[38].mxu0 %v3064_v30  ;;  %5479 = vmatpush3.bf16.msra.mxu1 %v8652_v49  ;;  %v4178_v2 = vpop.f32.mrb[12].mxu1 }
 0x1be   :  { %5439 = vmatpush3.bf16.msra.mxu0 %v5438_v46  ;;  %3439 = vmatprep.mubr.f32.mxu0 %v8521_v59  ;;  %v5448_v59 = vpack.c.bf16 %v8123_v6, %v8118_v43  ;;  %v4179_v29 = vpop.f32.mrb[13].mxu1  ;;  %v5454_v6 = vpack.c.bf16 %v8219_v3, %v8214_v32  ;;  %v9893_v46 = vld [vmem:[#allocation68_spill] sm:$0xff] }
 0x1bf   :  { %5441 = vmatprep.subr.bf16.mxu0 %v5440_v24  ;;  %5481 = vmatprep.subr.bf16.mxu1 %v8658_v23  ;;  %v4180_v62 = vadd.f32 %v4179_v29, %v4178_v2  ;;  %v5460_v19 = vpack.c.bf16 %v9893_v46, %v9892_v58  ;;  %v9895_v24 = vld [vmem:[#allocation70_spill] sm:$0xff] }
 0x1c0   :  { %v5462_v8 = vpack.c.bf16 %v9895_v24, %v9894_v10 }
 0x1c1   :  { %5483 = vmatpush3.bf16.msra.mxu1 %v8672_v16  ;;  %v4181_v50 = vpop.f32.mrb[14].mxu1 }
 0x1c2   :  { %5443 = vmatpush3.bf16.msra.mxu0 %v5442_v4  ;;  %5485 = vmatprep.subr.bf16.mxu1 %v8678_v35  ;;  %v4182_v44 = vpop.f32.mrb[15].mxu1 }
 0x1c3   :  { %5445 = vmatprep.subr.bf16.mxu0 %v5444_v27  ;;  %v4183_v43 = vadd.f32 %v4182_v44, %v4181_v50 }
 0x1c5   :  { %5487 = vmatpush3.bf16.msra.mxu1 %v8692_v40  ;;  %v4140_v63 = vpop.f32.mrb[12].mxu0 }
 0x1c6   :  { %5447 = vmatpush3.bf16.msra.mxu0 %v5446_v34  ;;  %5489 = vmatprep.subr.bf16.mxu1 %v8703_v60  ;;  %v4141_v12 = vpop.f32.mrb[13].mxu0  ;;  %v9911_v34 = vld [vmem:[#allocation72_spill] sm:$0xff] }
 0x1c7   :  { %5449 = vmatprep.subr.bf16.mxu0 %v5448_v59  ;;  %v4142_v13 = vadd.f32 %v4141_v12, %v4140_v63 }
 0x1c9   :  { %5491 = vmatpush3.bf16.msra.mxu1 %v8717_v39  ;;  %v1216_v32 = vadd.f32 %v4142_v13, %v8742_v48  ;;  %v4143_v3 = vpop.f32.mrb[14].mxu0  ;;  %v9896_v48 = vand.u32 4294901760, %v8416_v20  ;;  %v9902_v20 = vand.u32 4294901760, %v9886_v42 }
 0x1ca   :  { %5451 = vmatpush3.bf16.msra.mxu0 %v5450_v55  ;;  %5493 = vmatprep.subr.bf16.mxu1 %v8731_v14  ;;  %v4144_v57 = vpop.f32.mrb[15].mxu0 }
 0x1cb   :  { %5453 = vmatprep.subr.bf16.mxu0 %v5452_v45  ;;  %v4145_v30 = vadd.f32 %v4144_v57, %v4143_v3  ;;  %v1463_v1 = vadd.f32 %v4180_v62, %v1216_v32  ;;  %v9915_v45 = vld [vmem:[#allocation76_spill] sm:$0xff] }
 0x1cd   :  { %5495 = vmatpush3.bf16.msra.mxu1 %v8740_v54 }
 0x1ce   :  { %5455 = vmatpush3.bf16.msra.mxu0 %v5454_v6  ;;  %5529 = vmatprep.subr.bf16.mxu1 %v8536_v56  ;;  %v1231_v56 = vadd.f32 %v4145_v30, %v8762_v26  ;;  %v9900_v26 = vld [vmem:[#allocation22_spill] sm:$0xff] }
 0x1cf   :  { %5457 = vmatprep.subr.bf16.mxu0 %v5456_v22 }
 0x1d0   :  { %3559 = vmatmul.mubr.f32.vlgmr.msra.gmra.mrb[40].mxu1 %v3047_v21  ;;  %v5496_v21 = vpack.c.bf16 %v9897_v0, %v9896_v48 }
 0x1d1   :  { %3566 = vmatprep.mubr.f32.mxu1 %v3056_v25  ;;  %5531 = vmatpush3.bf16.msra.mxu1 %v8562_v47  ;;  %v9899_v25 = vand.u32 4294901760, %v9883_v38  ;;  %v1470_v47 = vadd.f32 %v4183_v43, %v1231_v56  ;;  %v9909_v38 = vld [vmem:[#allocation66_spill] sm:$0xff] }
 0x1d2   :  { %5459 = vmatpush3.bf16.msra.mxu0 %v5458_v9  ;;  %5533 = vmatprep.subr.bf16.mxu1 %v8568_v41  ;;  %v9901_v41 = vand.u32 4294901760, %v9885_v18  ;;  %v9910_v18 = vld [vmem:[#allocation71_spill] sm:$0xff] }
 0x1d3   :  { %5461 = vmatprep.subr.bf16.mxu0 %v5460_v19  ;;  %v5498_v4 = vpack.c.bf16 %v9899_v25, %v9898_v53 }
 0x1d4   :  { %3570 = vmatmul.mubr.f32.gmra.mrb[42].mxu1 %v3062_v11  ;;  %v5500_v5 = vpack.c.bf16 %v9902_v20, %v9901_v41 }
 0x1d5   :  { %5535 = vmatpush3.bf16.msra.mxu1 %v8597_v15  ;;  %3847 = vmatprep.mubr.f32.mxu1 %v9900_v26  ;;  %v9904_v15 = vld [vmem:[#allocation29_spill] sm:$0xff] }
 0x1d6   :  { %5463 = vmatpush3.bf16.msra.mxu0 %v5462_v8  ;;  %5537 = vmatprep.subr.bf16.mxu1 %v8612_v51  ;;  %v9905_v51 = vld [vmem:[#allocation36_spill] sm:$0xff] }
 0x1d7   :  { %5497 = vmatprep.subr.bf16.mxu0 %v5496_v21 }
 0x1d9   :  { %3442 = vmatmul.mubr.f32.vlgmr.msra.gmra.mrb[40].mxu0 %v8696_v61  ;;  %5539 = vmatpush3.bf16.msra.mxu1 %v8625_v31  ;;  %v9906_v31 = vld [vmem:[#allocation60_spill] sm:$0xff] }
 0x1da   :  { %3448 = vmatprep.mubr.f32.mxu0 %v8710_v17  ;;  %5499 = vmatpush3.bf16.msra.mxu0 %v5498_v4  ;;  %v9907_v17 = vld [vmem:[#allocation61_spill] sm:$0xff] }
 0x1db   :  { %5501 = vmatprep.subr.bf16.mxu0 %v5500_v5  ;;  %5541 = vmatprep.subr.bf16.mxu1 %v8632_v52 }
 0x1dd   :  { %3451 = vmatmul.mubr.f32.gmra.mrb[42].mxu0 %v8723_v37  ;;  %5543 = vmatpush3.bf16.msra.mxu1 %v8652_v49  ;;  %v9908_v49 = vld [vmem:[#allocation65_spill] sm:$0xff] }
 0x1de   :  { %5503 = vmatpush3.bf16.msra.mxu0 %v9903_v7  ;;  %3736 = vmatprep.mubr.f32.mxu0 %v9900_v26  ;;  %v4254_v52 = vpop.f32.mrb[16].mxu1 }
 0x1df   :  { %5505 = vmatprep.subr.bf16.mxu0 %v9904_v15  ;;  %5545 = vmatprep.subr.bf16.mxu1 %v8658_v23  ;;  %v4255_v61 = vpop.f32.mrb[17].mxu1 }
 0x1e0   :  { %v4256_v37 = vadd.f32 %v4255_v61, %v4254_v52 }
 0x1e1   :  { %5547 = vmatpush3.bf16.msra.mxu1 %v8672_v16 }
 0x1e2   :  { %5507 = vmatpush3.bf16.msra.mxu0 %v9905_v51  ;;  %5549 = vmatprep.subr.bf16.mxu1 %v8678_v35 }
 0x1e3   :  { %5509 = vmatprep.subr.bf16.mxu0 %v9906_v31  ;;  %v4257_v23 = vpop.f32.mrb[18].mxu1 }
 0x1e4   :  { %v4258_v11 = vpop.f32.mrb[19].mxu1 }
 0x1e5   :  { %5551 = vmatpush3.bf16.msra.mxu1 %v8692_v40  ;;  %v4259_v16 = vadd.f32 %v4258_v11, %v4257_v23  ;;  %v4216_v35 = vpop.f32.mrb[16].mxu0  ;;  %v9912_v40 = vld [vmem:[#allocation73_spill] sm:$0xff] }
 0x1e6   :  { %5511 = vmatpush3.bf16.msra.mxu0 %v9907_v17  ;;  %5553 = vmatprep.subr.bf16.mxu1 %v8703_v60  ;;  %v4217_v42 = vpop.f32.mrb[17].mxu0 }
 0x1e7   :  { %5513 = vmatprep.subr.bf16.mxu0 %v9908_v49  ;;  %v4218_v27 = vadd.f32 %v4217_v42, %v4216_v35 }
 0x1e9   :  { %5555 = vmatpush3.bf16.msra.mxu1 %v8717_v39  ;;  %v1608_v60 = vadd.f32 %v4218_v27, %v1463_v1  ;;  %v4219_v59 = vpop.f32.mrb[18].mxu0  ;;  %v9913_v39 = vld [vmem:[#allocation74_spill] sm:$0xff] }
 0x1ea   :  { %5515 = vmatpush3.bf16.msra.mxu0 %v9909_v38  ;;  %5557 = vmatprep.subr.bf16.mxu1 %v8731_v14  ;;  %v4220_v2 = vpop.f32.mrb[19].mxu0  ;;  %v9914_v14 = vld [vmem:[#allocation75_spill] sm:$0xff] }
 0x1eb   :  { %5517 = vmatprep.subr.bf16.mxu0 %v9910_v18  ;;  %v4221_v29 = vadd.f32 %v4220_v2, %v4219_v59  ;;  %v1725_v55 = vadd.f32 %v4256_v37, %v1608_v60 }
 0x1ed   :  { %5559 = vmatpush3.bf16.msra.mxu1 %v8740_v54  ;;  %v1617_v62 = vadd.f32 %v4221_v29, %v1470_v47 }
 0x1ee   :  { %5519 = vmatpush3.bf16.msra.mxu0 %v9911_v34 }
 0x1ef   :  { %5521 = vmatprep.subr.bf16.mxu0 %v9912_v40  ;;  %v1736_v54 = vadd.f32 %v4259_v16, %v1617_v62 }
 0x1f0   :  { %3849 = vmatmul.mubr.f32.vlgmr.msra.gmra.mrb[44].mxu1 %v8681_v28 }
 0x1f1   :  { %3854 = vmatprep.mubr.f32.mxu1 %v8685_v36 }
 0x1f2   :  { %5523 = vmatpush3.bf16.msra.mxu0 %v9913_v39 }
 0x1f3   :  { %5525 = vmatprep.subr.bf16.mxu0 %v9914_v14 }
 0x1f4   :  { %3856 = vmatmul.mubr.f32.gmra.mrb[46].mxu1 %v8706_v33 }
 0x1f6   :  { %5527 = vmatpush3.bf16.msra.mxu0 %v9915_v45 }
 0x1f9   :  { %3738 = vmatmul.mubr.f32.vlgmr.msra.gmra.mrb[44].mxu0 %v8681_v28 }
 0x1fa   :  { %3743 = vmatprep.mubr.f32.mxu0 %v8685_v36 }
 0x1fd   :  { %3745 = vmatmul.mubr.f32.gmra.mrb[46].mxu0 %v8706_v33 }
 0x1ff   :  { %v4330_v50 = vpop.f32.mrb[20].mxu1 }
 0x200   :  { %v4331_v44 = vpop.f32.mrb[21].mxu1 }
 0x201   :  { %v4332_v6 = vadd.f32 %v4331_v44, %v4330_v50 }
 0x203   :  { %v4333_v43 = vpop.f32.mrb[22].mxu1 }
 0x204   :  { %v4334_v22 = vpop.f32.mrb[23].mxu1 }
 0x205   :  { %v4335_v63 = vadd.f32 %v4334_v22, %v4333_v43  ;;  %v4292_v12 = vpop.f32.mrb[20].mxu0 }
 0x206   :  { %v4293_v13 = vpop.f32.mrb[21].mxu0 }
 0x207   :  { %v4294_v9 = vadd.f32 %v4293_v13, %v4292_v12 }
 0x209   :  { %v1904_v32 = vadd.f32 %v4294_v9, %v1725_v55  ;;  %v4295_v3 = vpop.f32.mrb[22].mxu0 }
 0x20a   :  { %v4296_v58 = vpop.f32.mrb[23].mxu0 }
 0x20b   :  { %v4297_v46 = vadd.f32 %v4296_v58, %v4295_v3  ;;  %v2015_v19 = vadd.f32 %v4332_v6, %v1904_v32 }
 0x20d   :  { %v1911_v57 = vadd.f32 %v4297_v46, %v1736_v54 }
 0x20f   :  { %v2022_v28 = vadd.f32 %v4335_v63, %v1911_v57 }
 0x21f   :  { %v4406_v30 = vpop.f32.mrb[24].mxu1 }
 0x220   :  { %v4407_v36 = vpop.f32.mrb[25].mxu1 }
 0x221   :  { %v4408_v10 = vadd.f32 %v4407_v36, %v4406_v30 }
 0x223   :  { %v4409_v33 = vpop.f32.mrb[26].mxu1 }
 0x224   :  { %v4410_v24 = vpop.f32.mrb[27].mxu1 }
 0x225   :  { %v4411_v8 = vadd.f32 %v4410_v24, %v4409_v33 }
 0x228   :  { %v4368_v1 = vpop.f32.mrb[24].mxu0 }
 0x229   :  { %v4369_v56 = vpop.f32.mrb[25].mxu0 }
 0x22a   :  { %v4370_v48 = vadd.f32 %v4369_v56, %v4368_v1 }
 0x22c   :  { %v2134_v0 = vadd.f32 %v4370_v48, %v2015_v19  ;;  %v4371_v21 = vpop.f32.mrb[26].mxu0 }
 0x22d   :  { %v4372_v53 = vpop.f32.mrb[27].mxu0 }
 0x22e   :  { %v4373_v25 = vadd.f32 %v4372_v53, %v4371_v21  ;;  %v2381_v4 = vadd.f32 %v4408_v10, %v2134_v0 }
 0x230   :  { %v2149_v47 = vadd.f32 %v4373_v25, %v2022_v28 }
 0x232   :  { %v2388_v26 = vadd.f32 %v4411_v8, %v2149_v47 }
 0x242   :  { %v4482_v41 = vpop.f32.mrb[28].mxu1 }
 0x243   :  { %v4483_v20 = vpop.f32.mrb[29].mxu1 }
 0x244   :  { %v4484_v5 = vadd.f32 %v4483_v20, %v4482_v41 }
 0x248   :  { %v4485_v7 = vpop.f32.mrb[30].mxu1  ;;  %v4444_v31 = vpop.f32.mrb[28].mxu0 }
 0x249   :  { %v4486_v15 = vpop.f32.mrb[31].mxu1  ;;  %v4445_v52 = vpop.f32.mrb[29].mxu0 }
 0x24a   :  { %v4487_v51 = vadd.f32 %v4486_v15, %v4485_v7  ;;  %v4446_v61 = vadd.f32 %v4445_v52, %v4444_v31 }
 0x24c   :  { %v2526_v17 = vadd.f32 %v4446_v61, %v2381_v4 }
 0x24d   :  { %v4447_v37 = vpop.f32.mrb[30].mxu0 }
 0x24e   :  { %v4448_v49 = vpop.f32.mrb[31].mxu0  ;;  %v2643_v11 = vadd.f32 %v4484_v5, %v2526_v17 }
 0x24f   :  { %v4449_v23 = vadd.f32 %v4448_v49, %v4447_v37 }
 0x251   :  { %v2535_v38 = vadd.f32 %v4449_v23, %v2388_v26 }
 0x253   :  { %v2654_v16 = vadd.f32 %v4487_v51, %v2535_v38 }
 0x262   :  { %v4558_v18 = vpop.f32.mrb[32].mxu1 }
 0x263   :  { %v4559_v35 = vpop.f32.mrb[33].mxu1 }
 0x264   :  { %v4560_v42 = vadd.f32 %v4559_v35, %v4558_v18 }
 0x266   :  { %v4561_v27 = vpop.f32.mrb[34].mxu1 }
 0x267   :  { %v4562_v34 = vpop.f32.mrb[35].mxu1 }
 0x268   :  { %v4563_v40 = vadd.f32 %v4562_v34, %v4561_v27 }
 0x26b   :  { %v4520_v60 = vpop.f32.mrb[32].mxu0 }
 0x26c   :  { %v4521_v59 = vpop.f32.mrb[33].mxu0 }
 0x26d   :  { %v4522_v2 = vadd.f32 %v4521_v59, %v4520_v60 }
 0x26f   :  { %v2822_v29 = vadd.f32 %v4522_v2, %v2643_v11  ;;  %v4523_v39 = vpop.f32.mrb[34].mxu0 }
 0x270   :  { %v4524_v55 = vpop.f32.mrb[35].mxu0 }
 0x271   :  { %v4525_v14 = vadd.f32 %v4524_v55, %v4523_v39  ;;  %v2933_v62 = vadd.f32 %v4560_v42, %v2822_v29 }
 0x273   :  { %v2829_v45 = vadd.f32 %v4525_v14, %v2654_v16 }
 0x275   :  { %v2940_v54 = vadd.f32 %v4563_v40, %v2829_v45 }
 0x283   :  { %v4634_v50 = vpop.f32.mrb[36].mxu1 }
 0x284   :  { %v4635_v44 = vpop.f32.mrb[37].mxu1 }
 0x285   :  { %v4636_v6 = vadd.f32 %v4635_v44, %v4634_v50 }
 0x287   :  { %v4637_v43 = vpop.f32.mrb[38].mxu1 }
 0x288   :  { %v4638_v22 = vpop.f32.mrb[39].mxu1 }
 0x289   :  { %v4639_v63 = vadd.f32 %v4638_v22, %v4637_v43 }
 0x28c   :  { %v4596_v12 = vpop.f32.mrb[36].mxu0 }
 0x28d   :  { %v4597_v13 = vpop.f32.mrb[37].mxu0 }
 0x28e   :  { %v4598_v9 = vadd.f32 %v4597_v13, %v4596_v12 }
 0x290   :  { %v3052_v32 = vadd.f32 %v4598_v9, %v2933_v62  ;;  %v4599_v3 = vpop.f32.mrb[38].mxu0 }
 0x291   :  { %v4600_v58 = vpop.f32.mrb[39].mxu0 }
 0x292   :  { %v4601_v46 = vadd.f32 %v4600_v58, %v4599_v3  ;;  %v3299_v19 = vadd.f32 %v4636_v6, %v3052_v32 }
 0x294   :  { %v3067_v57 = vadd.f32 %v4601_v46, %v2940_v54 }
 0x296   :  { %v3306_v28 = vadd.f32 %v4639_v63, %v3067_v57 }
 0x2a3   :  { %v4710_v30 = vpop.f32.mrb[40].mxu1 }
 0x2a4   :  { %v4711_v36 = vpop.f32.mrb[41].mxu1 }
 0x2a5   :  { %v4712_v10 = vadd.f32 %v4711_v36, %v4710_v30 }
 0x2a7   :  { %v4713_v33 = vpop.f32.mrb[42].mxu1 }
 0x2a8   :  { %v4714_v24 = vpop.f32.mrb[43].mxu1 }
 0x2a9   :  { %v4715_v8 = vadd.f32 %v4714_v24, %v4713_v33 }
 0x2ac   :  { %v4672_v1 = vpop.f32.mrb[40].mxu0 }
 0x2ad   :  { %v4673_v56 = vpop.f32.mrb[41].mxu0 }
 0x2ae   :  { %v4674_v48 = vadd.f32 %v4673_v56, %v4672_v1 }
 0x2b0   :  { %v3444_v0 = vadd.f32 %v4674_v48, %v3299_v19  ;;  %v4675_v21 = vpop.f32.mrb[42].mxu0 }
 0x2b1   :  { %v4676_v53 = vpop.f32.mrb[43].mxu0 }
 0x2b2   :  { %v4677_v25 = vadd.f32 %v4676_v53, %v4675_v21  ;;  %v3561_v4 = vadd.f32 %v4712_v10, %v3444_v0 }
 0x2b4   :  { %v3453_v47 = vadd.f32 %v4677_v25, %v3306_v28 }
 0x2b6   :  { %v3572_v26 = vadd.f32 %v4715_v8, %v3453_v47 }
 0x2c3   :  { %v4786_v41 = vpop.f32.mrb[44].mxu1 }
 0x2c4   :  { %v4787_v20 = vpop.f32.mrb[45].mxu1 }
 0x2c5   :  { %v4788_v5 = vadd.f32 %v4787_v20, %v4786_v41 }
 0x2c7   :  { %v4789_v7 = vpop.f32.mrb[46].mxu1 }
 0x2c8   :  { %v4790_v15 = vpop.f32.mrb[47].mxu1 }
 0x2c9   :  { %v4791_v51 = vadd.f32 %v4790_v15, %v4789_v7 }
 0x2cc   :  { %v4748_v31 = vpop.f32.mrb[44].mxu0 }
 0x2cd   :  { %v4749_v52 = vpop.f32.mrb[45].mxu0 }
 0x2ce   :  { %v4750_v61 = vadd.f32 %v4749_v52, %v4748_v31 }
 0x2d0   :  { %v3740_v17 = vadd.f32 %v4750_v61, %v3561_v4  ;;  %v4751_v37 = vpop.f32.mrb[46].mxu0 }
 0x2d1   :  { %v4752_v49 = vpop.f32.mrb[47].mxu0 }
 0x2d2   :  { %v3851_v23 = vadd.f32 %v4788_v5, %v3740_v17  ;;  %v4753_v11 = vadd.f32 %v4752_v49, %v4751_v37 }
 0x2d4   :  { %3862 = vst.msk [vmem:[#allocation2] sm:$0xff] %vm3861_vm0, %v3851_v23  ;;  %v3747_v38 = vadd.f32 %v4753_v11, %v3572_v26 }
 0x2d6   :  { %v3858_v16 = vadd.f32 %v4791_v51, %v3747_v38 }
 0x2d8   :  { %3863 = vst.msk [vmem:[#allocation2 + $0x8] sm:$0xff] %vm3861_vm0, %v3858_v16 }
 0x2d9   :  { %5577 = shalt.err (!%p5574_p4)
}
 0x2da   :  { %s5578_s12 = scalar_lea.hbm %s8885_s2, 256 }
 0x2db   :  { %p5579_p5 = scmp.ne.s32.totalorder %s8885_s2, %s5578_s12  ;;  %p5582_p6 = scmp.lt.u32.totalorder %s5578_s12, %s8885_s2 }
 0x2dd   :  { %p5584_p7 = pnand %p5582_p6, %p5579_p5 }
 0x2df   :  { %5587 = shalt.err (!%p5584_p7)
}
 0x2e0   :  { %s5593_s17 = smov 128   ;;  %s5594_s18 = smov 8  }
 0x2e1   :  { %3875 = dma.vmem_to_hbm [thread:$0]  %s3870_s8, 256, %s8885_s2, [#allocation3], %s5593_s17, %s5593_s17, %s5594_s18  }
 0x2e2   :  { %5588 = dma.done.wait [#allocation3], 256  }
 0x2e3   :  { %5589 = vsyncadd [#allocation3], 4294967040 }
 0x2e4   :  { %3879 = vsyncpa [#allocation3], 1 }

</bundles_post_ra>
